<compile_context>
chip_gen: v7x
topology: tpu7x:2x2x1
jax: 0.10.0
libtpu: 0.0.40
codegen_flags: <defaults>
</compile_context>

<pallas_src>
import functools

import jax
import jax.numpy as jnp
import numpy as np
from jax.experimental import pallas as pl
from jax.experimental.pallas import tpu as pltpu

K = 10          # HiGCN_prop K
ALPHA = 0.5     # HiGCN_prop alpha (init schedule for the learnable fW)
BN_EPS = 1e-5

_VMEM = pl.BlockSpec(memory_space=pltpu.MemorySpace.VMEM)
_SMEM = pl.BlockSpec(memory_space=pltpu.MemorySpace.SMEM)


def _vmem_limit_bytes():
    try:
        cap = int(pltpu.get_tpu_info().vmem_capacity_bytes)
    except Exception:
        cap = 64 * 1024 * 1024          # conservative fallback (v7x physical per-TC VMEM)
    return (cap * 3) // 4               # ~48 MiB v7x, ~96 MiB v5e/v6e


# ----------------------------- fused Pallas kernel -----------------------------

def _higcn_fused_kernel(fw_ref, x_ref, hl_ref, pool_ref, *rest,
                        num_layers, order, hidden):
    """Whole HiGCN forward, feature-major layout [features, nodes].

    rest = num_layers * (w_in, b_in, w_out, b_out, w1, b1, s1, o1, w2, b2, s2, o2)
           + (head_w1, head_b1, head_w2, head_b2) + (out_ref,)
    """
    layer_refs = rest[: num_layers * 12]
    head_w1, head_b1, head_w2, head_b2, out_ref = rest[num_layers * 12:]
    k1 = K + 1

    h = x_ref[...]                                           # [F_in, N] f32
    for l in range(num_layers):
        (w_in, b_in, w_out, b_out,
         w1, b1, s1, o1, w2, b2, s2, o2) = layer_refs[l * 12:(l + 1) * 12]

        # lin_in for all orders as ONE lane-dense (N on lanes) matmul: [order*H, N]
        xx0 = jnp.dot(w_in[...], h.astype(jnp.bfloat16),
                      preferred_element_type=jnp.float32) + b_in[...]

        # Per-order K-step propagation (f32), lin_out decomposed per order (no concat).
        y = b_out[...]                                       # [H, 1] -> broadcasts
        for i in range(order):
            xs = xx0[i * hidden:(i + 1) * hidden, :]         # sublane-aligned static view
            acc = fw_ref[l * order * k1 + i * k1] * xs       # fW[0] * x
            for k in range(K):
                # x <- HL @ x  (transposed layout: xT <- xT @ HL^T); HL stays f32.
                xs = jnp.dot(xs, hl_ref[i], preferred_element_type=jnp.float32)
                acc = acc + fw_ref[l * order * k1 + i * k1 + k + 1] * xs
            y = y + jnp.dot(w_out[i], acc.astype(jnp.bfloat16),
                            preferred_element_type=jnp.float32)

        # Sequential(Linear, BN(eval, folded), ReLU, Linear, BN(eval, folded), ReLU)
        t = jnp.dot(w1[...], y.astype(jnp.bfloat16),
                    preferred_element_type=jnp.float32) + b1[...]
        t = jnp.maximum(t * s1[...] + o1[...], 0.0)
        t = jnp.dot(w2[...], t.astype(jnp.bfloat16),
                    preferred_element_type=jnp.float32) + b2[...]
        h = jnp.maximum(t * s2[...] + o2[...], 0.0)          # [H, N]

    # Head: readout='sum' global-add-pool (exact f32 sum) + lin1 + ReLU + (dropout=id) + lin2
    pooled = jnp.dot(h, pool_ref[...], preferred_element_type=jnp.float32)   # [H, B]
    t = jnp.dot(head_w1[...], pooled.astype(jnp.bfloat16),
                preferred_element_type=jnp.float32) + head_b1[...]
    t = jnp.maximum(t, 0.0)
    out = jnp.dot(head_w2[...], t.astype(jnp.bfloat16),
                  preferred_element_type=jnp.float32) + head_b2[...]         # [C, B]
    out_ref[...] = out


# ----------------------------- model wrapper -----------------------------

def _cost_estimate(n, f, b, c, order, hidden, num_layers, args):
    flops = 0
    in_dim = f
    for _ in range(num_layers):
        flops += 2 * order * hidden * in_dim * n        # lin_in
        flops += 2 * K * order * hidden * n * n         # HiGCN_prop
        flops += 2 * order * hidden * hidden * n        # lin_out
        flops += 2 * 2 * hidden * hidden * n            # Sequential nn
        in_dim = hidden
    flops += 2 * hidden * n * b + 2 * hidden * hidden * b + 2 * c * hidden * b   # head
    bytes_accessed = sum(int(a.size) * a.dtype.itemsize for a in args) + c * b * 4
    return pl.CostEstimate(flops=int(flops), transcendentals=0,
                           bytes_accessed=int(bytes_accessed))


def higcn_forward(params, x, hl, pool_mat, *, order, hidden, num_layers):
    n, f = x.shape
    b = pool_mat.shape[0]
    c = params["head_w2"].shape[0]

    # Feature-major layout: nodes on the 128-lane axis everywhere in the kernel.
    x_t = x.T.astype(jnp.float32)                          # [F, N]
    hl_t = jnp.swapaxes(hl, 1, 2).astype(jnp.float32)      # [order, N, N] = HL^T per order
    pool_t = pool_mat.T.astype(jnp.float32)                # [N, B]

    layer_params = [params["conv1"]] + list(params["convs"])
    fw = jnp.concatenate([p["fw"].reshape(-1) for p in layer_params]).astype(jnp.float32)

    flat = []
    for p in layer_params:
        flat += [p["w_in"], p["b_in"], p["w_out"], p["b_out"],
                 p["nn_w1"], p["nn_b1"], p["nn_s1"], p["nn_o1"],
                 p["nn_w2"], p["nn_b2"], p["nn_s2"], p["nn_o2"]]

    args = [fw, x_t, hl_t, pool_t] + flat + [params["head_w1"], params["head_b1"],
                                             params["head_w2"], params["head_b2"]]
    in_specs = [_SMEM] + [_VMEM] * (len(args) - 1)

    kernel = functools.partial(_higcn_fused_kernel, num_layers=num_layers,
                               order=order, hidden=hidden)
    out_t = pl.pallas_call(
        kernel,
        out_shape=jax.ShapeDtypeStruct((c, b), jnp.float32),
        in_specs=in_specs,
        out_specs=_VMEM,
        compiler_params=pltpu.CompilerParams(vmem_limit_bytes=_vmem_limit_bytes()),
        cost_estimate=_cost_estimate(n, f, b, c, order, hidden, num_layers, args),
    )(*args)
    return out_t.T                                          # [B, num_classes]


# ----------------------------- pure-JAX reference -----------------------------

def higcn_reference(params, x, hl, pool_mat, *, order, hidden, num_layers):
    hi = jax.lax.Precision.HIGHEST
    layer_params = [params["conv1"]] + list(params["convs"])
    h = x.astype(jnp.float32)
    for p in layer_params:
        xx0 = jnp.dot(h.astype(jnp.bfloat16), p["w_in"].T,
                      preferred_element_type=jnp.float32) + p["b_in"][:, 0][None, :]
        y = p["b_out"][:, 0][None, :]
        for i in range(order):
            xs = xx0[:, i * hidden:(i + 1) * hidden]
            acc = p["fw"][i, 0] * xs
            for k in range(K):
                xs = jnp.dot(hl[i], xs, precision=hi, preferred_element_type=jnp.float32)
                acc = acc + p["fw"][i, k + 1] * xs
            y = y + jnp.dot(acc.astype(jnp.bfloat16), p["w_out"][i].T,
                            preferred_element_type=jnp.float32)
        t = jnp.dot(y.astype(jnp.bfloat16), p["nn_w1"].T,
                    preferred_element_type=jnp.float32) + p["nn_b1"][:, 0][None, :]
        t = jnp.maximum(t * p["nn_s1"][:, 0][None, :] + p["nn_o1"][:, 0][None, :], 0.0)
        t = jnp.dot(t.astype(jnp.bfloat16), p["nn_w2"].T,
                    preferred_element_type=jnp.float32) + p["nn_b2"][:, 0][None, :]
        h = jnp.maximum(t * p["nn_s2"][:, 0][None, :] + p["nn_o2"][:, 0][None, :], 0.0)
    pooled = jnp.dot(pool_mat, h, precision=hi, preferred_element_type=jnp.float32)
    t = jnp.dot(pooled.astype(jnp.bfloat16), params["head_w1"].T,
                preferred_element_type=jnp.float32) + params["head_b1"][:, 0][None, :]
    t = jnp.maximum(t, 0.0)
    return jnp.dot(t.astype(jnp.bfloat16), params["head_w2"].T,
                   preferred_element_type=jnp.float32) + params["head_b2"][:, 0][None, :]


# ----------------------------- parameter init -----------------------------

def init_params(key, num_features, hidden, num_classes, order, num_layers):
    """Kernel-ready params in PyTorch [out, in] (transposed-layout) convention:
    bf16 weights, [out, 1] f32 biases, eval-mode BN folded to scale/offset,
    learnable HiGCN_prop filter weights fW per layer per order."""

    def linear_init(k, fan_in, fan_out):
        kw, kb = jax.random.split(k)
        bound = 1.0 / (fan_in ** 0.5)
        w = jax.random.uniform(kw, (fan_out, fan_in), jnp.float32, -bound, bound)
        b = jax.random.uniform(kb, (fan_out, 1), jnp.float32, -bound, bound)
        return w, b

    def bn_fold():
        gamma = jnp.ones((hidden, 1), jnp.float32)
        beta = jnp.zeros((hidden, 1), jnp.float32)
        mean = jnp.zeros((hidden, 1), jnp.float32)
        var = jnp.ones((hidden, 1), jnp.float32)
        scale = gamma / jnp.sqrt(var + BN_EPS)
        return scale, beta - mean * scale

    fw_init = jnp.array([ALPHA * (1.0 - ALPHA) ** k for k in range(K)]
                        + [(1.0 - ALPHA) ** K], jnp.float32)          # HiGCN_prop.reset_parameters

    def conv_init(k, in_dim):
        ks = jax.random.split(k, order + 3)
        ws, bs = zip(*[linear_init(ks[i], in_dim, hidden) for i in range(order)])
        w_in = jnp.concatenate(ws, axis=0).astype(jnp.bfloat16)       # [order*H, in]
        b_in = jnp.concatenate(bs, axis=0)                            # [order*H, 1]
        w_out_full, b_out = linear_init(ks[order], hidden * order, hidden)
        w_out = (w_out_full.reshape(hidden, order, hidden)
                 .transpose(1, 0, 2).astype(jnp.bfloat16))            # [order, H_out, H_in]
        w1, b1 = linear_init(ks[order + 1], hidden, hidden)
        w2, b2 = linear_init(ks[order + 2], hidden, hidden)
        s1, o1 = bn_fold()
        s2, o2 = bn_fold()
        fw = jnp.stack([fw_init for _ in range(order)])               # [order, K+1] (learnable)
        return dict(w_in=w_in, b_in=b_in, w_out=w_out, b_out=b_out, fw=fw,
                    nn_w1=w1.astype(jnp.bfloat16), nn_b1=b1, nn_s1=s1, nn_o1=o1,
                    nn_w2=w2.astype(jnp.bfloat16), nn_b2=b2, nn_s2=s2, nn_o2=o2)

    keys = jax.random.split(key, num_layers + 2)
    params = dict(conv1=conv_init(keys[0], num_features),
                  convs=[conv_init(keys[1 + i], hidden) for i in range(num_layers - 1)])
    hw1, hb1 = linear_init(keys[num_layers], hidden, hidden)
    hw2, hb2 = linear_init(keys[num_layers + 1], hidden, num_classes)
    params.update(head_w1=hw1.astype(jnp.bfloat16), head_b1=hb1,
                  head_w2=hw2.astype(jnp.bfloat16), head_b2=hb2)
    return params


# ----------------------------- main -----------------------------

if __name__ == "__main__":
    N, FEAT, HIDDEN = 128, 8, 32
    ORDER, NUM_LAYERS, NUM_CLASSES, NUM_GRAPHS = 2, 2, 4, 2

    key = jax.random.PRNGKey(0)
    k_x, k_hl, k_p = jax.random.split(key, 3)

    x = jax.random.normal(k_x, (N, FEAT), jnp.float32)
    # dense Hodge-Laplacians: hl[i] corresponds to the module's HL[i+1]
    hl = jax.random.uniform(k_hl, (ORDER, N, N), jnp.float32) / N
    batch = jnp.repeat(jnp.arange(NUM_GRAPHS), N // NUM_GRAPHS)                          # [N]
    pool_mat = (batch[None, :] == jnp.arange(NUM_GRAPHS)[:, None]).astype(jnp.float32)   # [B, N]

    params = init_params(k_p, FEAT, HIDDEN, NUM_CLASSES, ORDER, NUM_LAYERS)

    fwd = jax.jit(functools.partial(higcn_forward, order=ORDER, hidden=HIDDEN,
                                    num_layers=NUM_LAYERS))
    out = jax.block_until_ready(fwd(params, x, hl, pool_mat))
    assert out.shape == (NUM_GRAPHS, NUM_CLASSES)

    ref = higcn_reference(params, x, hl, pool_mat, order=ORDER, hidden=HIDDEN,
                          num_layers=NUM_LAYERS)
    np.testing.assert_allclose(np.asarray(out), np.asarray(ref), rtol=5e-2, atol=5e-2)
    print("KERNEL_OK")
</pallas_src>

<mosaic_0001>
module attributes {stable_mosaic.version = 11 : i64} {
  func.func @_higcn_fused_kernel(%arg0: memref<44xf32, #tpu.memory_space<smem>>, %arg1: memref<8x128xf32, #tpu.memory_space<vmem>>, %arg2: memref<2x128x128xf32, #tpu.memory_space<vmem>>, %arg3: memref<128x2xf32, #tpu.memory_space<vmem>>, %arg4: memref<64x8xbf16, #tpu.memory_space<vmem>>, %arg5: memref<64x1xf32, #tpu.memory_space<vmem>>, %arg6: memref<2x32x32xbf16, #tpu.memory_space<vmem>>, %arg7: memref<32x1xf32, #tpu.memory_space<vmem>>, %arg8: memref<32x32xbf16, #tpu.memory_space<vmem>>, %arg9: memref<32x1xf32, #tpu.memory_space<vmem>>, %arg10: memref<32x1xf32, #tpu.memory_space<vmem>>, %arg11: memref<32x1xf32, #tpu.memory_space<vmem>>, %arg12: memref<32x32xbf16, #tpu.memory_space<vmem>>, %arg13: memref<32x1xf32, #tpu.memory_space<vmem>>, %arg14: memref<32x1xf32, #tpu.memory_space<vmem>>, %arg15: memref<32x1xf32, #tpu.memory_space<vmem>>, %arg16: memref<64x32xbf16, #tpu.memory_space<vmem>>, %arg17: memref<64x1xf32, #tpu.memory_space<vmem>>, %arg18: memref<2x32x32xbf16, #tpu.memory_space<vmem>>, %arg19: memref<32x1xf32, #tpu.memory_space<vmem>>, %arg20: memref<32x32xbf16, #tpu.memory_space<vmem>>, %arg21: memref<32x1xf32, #tpu.memory_space<vmem>>, %arg22: memref<32x1xf32, #tpu.memory_space<vmem>>, %arg23: memref<32x1xf32, #tpu.memory_space<vmem>>, %arg24: memref<32x32xbf16, #tpu.memory_space<vmem>>, %arg25: memref<32x1xf32, #tpu.memory_space<vmem>>, %arg26: memref<32x1xf32, #tpu.memory_space<vmem>>, %arg27: memref<32x1xf32, #tpu.memory_space<vmem>>, %arg28: memref<32x32xbf16, #tpu.memory_space<vmem>>, %arg29: memref<32x1xf32, #tpu.memory_space<vmem>>, %arg30: memref<4x32xbf16, #tpu.memory_space<vmem>>, %arg31: memref<4x1xf32, #tpu.memory_space<vmem>>, %arg32: memref<4x2xf32, #tpu.memory_space<vmem>>) attributes {dimension_semantics = [], scalar_prefetch = 0 : i64, scratch_operands = 0 : i64, tpu.core_type = #tpu.core_type<tc>} {
    %c0 = arith.constant 0 : index
    %c0_0 = arith.constant 0 : index
    %0 = vector.load %arg1[%c0, %c0_0] : memref<8x128xf32, #tpu.memory_space<vmem>>, vector<8x128xf32>
    %c0_1 = arith.constant 0 : index
    %c0_2 = arith.constant 0 : index
    %1 = vector.load %arg4[%c0_1, %c0_2] : memref<64x8xbf16, #tpu.memory_space<vmem>>, vector<64x8xbf16>
    %2 = arith.truncf %0 : vector<8x128xf32> to vector<8x128xbf16>
    %cst = arith.constant dense<0.000000e+00> : vector<64x128xf32>
    %3 = tpu.matmul %1, %2, %cst {dimension_numbers = #tpu.dot_dimension_numbers<[1], [0], [0], [1], [0, 0, 1, 1], [], []>} : vector<64x8xbf16>, vector<8x128xbf16>, vector<64x128xf32> -> vector<64x128xf32>
    %c0_3 = arith.constant 0 : index
    %c0_4 = arith.constant 0 : index
    %4 = vector.load %arg5[%c0_3, %c0_4] : memref<64x1xf32, #tpu.memory_space<vmem>>, vector<64x1xf32>
    %5 = vector.broadcast %4 : vector<64x1xf32> to vector<64x128xf32>
    %6 = arith.addf %3, %5 : vector<64x128xf32>
    %c0_5 = arith.constant 0 : index
    %c0_6 = arith.constant 0 : index
    %7 = vector.load %arg7[%c0_5, %c0_6] : memref<32x1xf32, #tpu.memory_space<vmem>>, vector<32x1xf32>
    %8 = vector.extract_strided_slice %6 {offsets = [0, 0], sizes = [32, 128], strides = [1, 1]} : vector<64x128xf32> to vector<32x128xf32>
    %c0_7 = arith.constant 0 : index
    %9 = memref.load %arg0[%c0_7] : memref<44xf32, #tpu.memory_space<smem>>
    %10 = vector.broadcast %9 : f32 to vector<32x128xf32>
    %11 = arith.mulf %10, %8 : vector<32x128xf32>
    %c0_8 = arith.constant 0 : index
    %c0_9 = arith.constant 0 : index
    %c0_10 = arith.constant 0 : index
    %12 = vector.load %arg2[%c0_8, %c0_9, %c0_10] : memref<2x128x128xf32, #tpu.memory_space<vmem>>, vector<1x128x128xf32>
    %13 = vector.shape_cast %12 : vector<1x128x128xf32> to vector<128x128xf32>
    %cst_11 = arith.constant dense<0.000000e+00> : vector<32x128xf32>
    %14 = tpu.matmul %8, %13, %cst_11 {dimension_numbers = #tpu.dot_dimension_numbers<[1], [0], [0], [1], [0, 0, 1, 1], [], []>} : vector<32x128xf32>, vector<128x128xf32>, vector<32x128xf32> -> vector<32x128xf32>
    %c1 = arith.constant 1 : index
    %15 = memref.load %arg0[%c1] : memref<44xf32, #tpu.memory_space<smem>>
    %16 = vector.broadcast %15 : f32 to vector<32x128xf32>
    %17 = arith.mulf %16, %14 : vector<32x128xf32>
    %18 = arith.addf %11, %17 : vector<32x128xf32>
    %c0_12 = arith.constant 0 : index
    %c0_13 = arith.constant 0 : index
    %c0_14 = arith.constant 0 : index
    %19 = vector.load %arg2[%c0_12, %c0_13, %c0_14] : memref<2x128x128xf32, #tpu.memory_space<vmem>>, vector<1x128x128xf32>
    %20 = vector.shape_cast %19 : vector<1x128x128xf32> to vector<128x128xf32>
    %cst_15 = arith.constant dense<0.000000e+00> : vector<32x128xf32>
    %21 = tpu.matmul %14, %20, %cst_15 {dimension_numbers = #tpu.dot_dimension_numbers<[1], [0], [0], [1], [0, 0, 1, 1], [], []>} : vector<32x128xf32>, vector<128x128xf32>, vector<32x128xf32> -> vector<32x128xf32>
    %c2 = arith.constant 2 : index
    %22 = memref.load %arg0[%c2] : memref<44xf32, #tpu.memory_space<smem>>
    %23 = vector.broadcast %22 : f32 to vector<32x128xf32>
    %24 = arith.mulf %23, %21 : vector<32x128xf32>
    %25 = arith.addf %18, %24 : vector<32x128xf32>
    %c0_16 = arith.constant 0 : index
    %c0_17 = arith.constant 0 : index
    %c0_18 = arith.constant 0 : index
    %26 = vector.load %arg2[%c0_16, %c0_17, %c0_18] : memref<2x128x128xf32, #tpu.memory_space<vmem>>, vector<1x128x128xf32>
    %27 = vector.shape_cast %26 : vector<1x128x128xf32> to vector<128x128xf32>
    %cst_19 = arith.constant dense<0.000000e+00> : vector<32x128xf32>
    %28 = tpu.matmul %21, %27, %cst_19 {dimension_numbers = #tpu.dot_dimension_numbers<[1], [0], [0], [1], [0, 0, 1, 1], [], []>} : vector<32x128xf32>, vector<128x128xf32>, vector<32x128xf32> -> vector<32x128xf32>
    %c3 = arith.constant 3 : index
    %29 = memref.load %arg0[%c3] : memref<44xf32, #tpu.memory_space<smem>>
    %30 = vector.broadcast %29 : f32 to vector<32x128xf32>
    %31 = arith.mulf %30, %28 : vector<32x128xf32>
    %32 = arith.addf %25, %31 : vector<32x128xf32>
    %c0_20 = arith.constant 0 : index
    %c0_21 = arith.constant 0 : index
    %c0_22 = arith.constant 0 : index
    %33 = vector.load %arg2[%c0_20, %c0_21, %c0_22] : memref<2x128x128xf32, #tpu.memory_space<vmem>>, vector<1x128x128xf32>
    %34 = vector.shape_cast %33 : vector<1x128x128xf32> to vector<128x128xf32>
    %cst_23 = arith.constant dense<0.000000e+00> : vector<32x128xf32>
    %35 = tpu.matmul %28, %34, %cst_23 {dimension_numbers = #tpu.dot_dimension_numbers<[1], [0], [0], [1], [0, 0, 1, 1], [], []>} : vector<32x128xf32>, vector<128x128xf32>, vector<32x128xf32> -> vector<32x128xf32>
    %c4 = arith.constant 4 : index
    %36 = memref.load %arg0[%c4] : memref<44xf32, #tpu.memory_space<smem>>
    %37 = vector.broadcast %36 : f32 to vector<32x128xf32>
    %38 = arith.mulf %37, %35 : vector<32x128xf32>
    %39 = arith.addf %32, %38 : vector<32x128xf32>
    %c0_24 = arith.constant 0 : index
    %c0_25 = arith.constant 0 : index
    %c0_26 = arith.constant 0 : index
    %40 = vector.load %arg2[%c0_24, %c0_25, %c0_26] : memref<2x128x128xf32, #tpu.memory_space<vmem>>, vector<1x128x128xf32>
    %41 = vector.shape_cast %40 : vector<1x128x128xf32> to vector<128x128xf32>
    %cst_27 = arith.constant dense<0.000000e+00> : vector<32x128xf32>
    %42 = tpu.matmul %35, %41, %cst_27 {dimension_numbers = #tpu.dot_dimension_numbers<[1], [0], [0], [1], [0, 0, 1, 1], [], []>} : vector<32x128xf32>, vector<128x128xf32>, vector<32x128xf32> -> vector<32x128xf32>
    %c5 = arith.constant 5 : index
    %43 = memref.load %arg0[%c5] : memref<44xf32, #tpu.memory_space<smem>>
    %44 = vector.broadcast %43 : f32 to vector<32x128xf32>
    %45 = arith.mulf %44, %42 : vector<32x128xf32>
    %46 = arith.addf %39, %45 : vector<32x128xf32>
    %c0_28 = arith.constant 0 : index
    %c0_29 = arith.constant 0 : index
    %c0_30 = arith.constant 0 : index
    %47 = vector.load %arg2[%c0_28, %c0_29, %c0_30] : memref<2x128x128xf32, #tpu.memory_space<vmem>>, vector<1x128x128xf32>
    %48 = vector.shape_cast %47 : vector<1x128x128xf32> to vector<128x128xf32>
    %cst_31 = arith.constant dense<0.000000e+00> : vector<32x128xf32>
    %49 = tpu.matmul %42, %48, %cst_31 {dimension_numbers = #tpu.dot_dimension_numbers<[1], [0], [0], [1], [0, 0, 1, 1], [], []>} : vector<32x128xf32>, vector<128x128xf32>, vector<32x128xf32> -> vector<32x128xf32>
    %c6 = arith.constant 6 : index
    %50 = memref.load %arg0[%c6] : memref<44xf32, #tpu.memory_space<smem>>
    %51 = vector.broadcast %50 : f32 to vector<32x128xf32>
    %52 = arith.mulf %51, %49 : vector<32x128xf32>
    %53 = arith.addf %46, %52 : vector<32x128xf32>
    %c0_32 = arith.constant 0 : index
    %c0_33 = arith.constant 0 : index
    %c0_34 = arith.constant 0 : index
    %54 = vector.load %arg2[%c0_32, %c0_33, %c0_34] : memref<2x128x128xf32, #tpu.memory_space<vmem>>, vector<1x128x128xf32>
    %55 = vector.shape_cast %54 : vector<1x128x128xf32> to vector<128x128xf32>
    %cst_35 = arith.constant dense<0.000000e+00> : vector<32x128xf32>
    %56 = tpu.matmul %49, %55, %cst_35 {dimension_numbers = #tpu.dot_dimension_numbers<[1], [0], [0], [1], [0, 0, 1, 1], [], []>} : vector<32x128xf32>, vector<128x128xf32>, vector<32x128xf32> -> vector<32x128xf32>
    %c7 = arith.constant 7 : index
    %57 = memref.load %arg0[%c7] : memref<44xf32, #tpu.memory_space<smem>>
    %58 = vector.broadcast %57 : f32 to vector<32x128xf32>
    %59 = arith.mulf %58, %56 : vector<32x128xf32>
    %60 = arith.addf %53, %59 : vector<32x128xf32>
    %c0_36 = arith.constant 0 : index
    %c0_37 = arith.constant 0 : index
    %c0_38 = arith.constant 0 : index
    %61 = vector.load %arg2[%c0_36, %c0_37, %c0_38] : memref<2x128x128xf32, #tpu.memory_space<vmem>>, vector<1x128x128xf32>
    %62 = vector.shape_cast %61 : vector<1x128x128xf32> to vector<128x128xf32>
    %cst_39 = arith.constant dense<0.000000e+00> : vector<32x128xf32>
    %63 = tpu.matmul %56, %62, %cst_39 {dimension_numbers = #tpu.dot_dimension_numbers<[1], [0], [0], [1], [0, 0, 1, 1], [], []>} : vector<32x128xf32>, vector<128x128xf32>, vector<32x128xf32> -> vector<32x128xf32>
    %c8 = arith.constant 8 : index
    %64 = memref.load %arg0[%c8] : memref<44xf32, #tpu.memory_space<smem>>
    %65 = vector.broadcast %64 : f32 to vector<32x128xf32>
    %66 = arith.mulf %65, %63 : vector<32x128xf32>
    %67 = arith.addf %60, %66 : vector<32x128xf32>
    %c0_40 = arith.constant 0 : index
    %c0_41 = arith.constant 0 : index
    %c0_42 = arith.constant 0 : index
    %68 = vector.load %arg2[%c0_40, %c0_41, %c0_42] : memref<2x128x128xf32, #tpu.memory_space<vmem>>, vector<1x128x128xf32>
    %69 = vector.shape_cast %68 : vector<1x128x128xf32> to vector<128x128xf32>
    %cst_43 = arith.constant dense<0.000000e+00> : vector<32x128xf32>
    %70 = tpu.matmul %63, %69, %cst_43 {dimension_numbers = #tpu.dot_dimension_numbers<[1], [0], [0], [1], [0, 0, 1, 1], [], []>} : vector<32x128xf32>, vector<128x128xf32>, vector<32x128xf32> -> vector<32x128xf32>
    %c9 = arith.constant 9 : index
    %71 = memref.load %arg0[%c9] : memref<44xf32, #tpu.memory_space<smem>>
    %72 = vector.broadcast %71 : f32 to vector<32x128xf32>
    %73 = arith.mulf %72, %70 : vector<32x128xf32>
    %74 = arith.addf %67, %73 : vector<32x128xf32>
    %c0_44 = arith.constant 0 : index
    %c0_45 = arith.constant 0 : index
    %c0_46 = arith.constant 0 : index
    %75 = vector.load %arg2[%c0_44, %c0_45, %c0_46] : memref<2x128x128xf32, #tpu.memory_space<vmem>>, vector<1x128x128xf32>
    %76 = vector.shape_cast %75 : vector<1x128x128xf32> to vector<128x128xf32>
    %cst_47 = arith.constant dense<0.000000e+00> : vector<32x128xf32>
    %77 = tpu.matmul %70, %76, %cst_47 {dimension_numbers = #tpu.dot_dimension_numbers<[1], [0], [0], [1], [0, 0, 1, 1], [], []>} : vector<32x128xf32>, vector<128x128xf32>, vector<32x128xf32> -> vector<32x128xf32>
    %c10 = arith.constant 10 : index
    %78 = memref.load %arg0[%c10] : memref<44xf32, #tpu.memory_space<smem>>
    %79 = vector.broadcast %78 : f32 to vector<32x128xf32>
    %80 = arith.mulf %79, %77 : vector<32x128xf32>
    %81 = arith.addf %74, %80 : vector<32x128xf32>
    %c0_48 = arith.constant 0 : index
    %c0_49 = arith.constant 0 : index
    %c0_50 = arith.constant 0 : index
    %82 = vector.load %arg6[%c0_48, %c0_49, %c0_50] : memref<2x32x32xbf16, #tpu.memory_space<vmem>>, vector<1x32x32xbf16>
    %83 = vector.shape_cast %82 : vector<1x32x32xbf16> to vector<32x32xbf16>
    %84 = arith.truncf %81 : vector<32x128xf32> to vector<32x128xbf16>
    %cst_51 = arith.constant dense<0.000000e+00> : vector<32x128xf32>
    %85 = tpu.matmul %83, %84, %cst_51 {dimension_numbers = #tpu.dot_dimension_numbers<[1], [0], [0], [1], [0, 0, 1, 1], [], []>} : vector<32x32xbf16>, vector<32x128xbf16>, vector<32x128xf32> -> vector<32x128xf32>
    %86 = vector.broadcast %7 : vector<32x1xf32> to vector<32x128xf32>
    %87 = arith.addf %86, %85 : vector<32x128xf32>
    %88 = vector.extract_strided_slice %6 {offsets = [32, 0], sizes = [32, 128], strides = [1, 1]} : vector<64x128xf32> to vector<32x128xf32>
    %c11 = arith.constant 11 : index
    %89 = memref.load %arg0[%c11] : memref<44xf32, #tpu.memory_space<smem>>
    %90 = vector.broadcast %89 : f32 to vector<32x128xf32>
    %91 = arith.mulf %90, %88 : vector<32x128xf32>
    %c1_52 = arith.constant 1 : index
    %c0_53 = arith.constant 0 : index
    %c0_54 = arith.constant 0 : index
    %92 = vector.load %arg2[%c1_52, %c0_53, %c0_54] : memref<2x128x128xf32, #tpu.memory_space<vmem>>, vector<1x128x128xf32>
    %93 = vector.shape_cast %92 : vector<1x128x128xf32> to vector<128x128xf32>
    %cst_55 = arith.constant dense<0.000000e+00> : vector<32x128xf32>
    %94 = tpu.matmul %88, %93, %cst_55 {dimension_numbers = #tpu.dot_dimension_numbers<[1], [0], [0], [1], [0, 0, 1, 1], [], []>} : vector<32x128xf32>, vector<128x128xf32>, vector<32x128xf32> -> vector<32x128xf32>
    %c12 = arith.constant 12 : index
    %95 = memref.load %arg0[%c12] : memref<44xf32, #tpu.memory_space<smem>>
    %96 = vector.broadcast %95 : f32 to vector<32x128xf32>
    %97 = arith.mulf %96, %94 : vector<32x128xf32>
    %98 = arith.addf %91, %97 : vector<32x128xf32>
    %c1_56 = arith.constant 1 : index
    %c0_57 = arith.constant 0 : index
    %c0_58 = arith.constant 0 : index
    %99 = vector.load %arg2[%c1_56, %c0_57, %c0_58] : memref<2x128x128xf32, #tpu.memory_space<vmem>>, vector<1x128x128xf32>
    %100 = vector.shape_cast %99 : vector<1x128x128xf32> to vector<128x128xf32>
    %cst_59 = arith.constant dense<0.000000e+00> : vector<32x128xf32>
    %101 = tpu.matmul %94, %100, %cst_59 {dimension_numbers = #tpu.dot_dimension_numbers<[1], [0], [0], [1], [0, 0, 1, 1], [], []>} : vector<32x128xf32>, vector<128x128xf32>, vector<32x128xf32> -> vector<32x128xf32>
    %c13 = arith.constant 13 : index
    %102 = memref.load %arg0[%c13] : memref<44xf32, #tpu.memory_space<smem>>
    %103 = vector.broadcast %102 : f32 to vector<32x128xf32>
    %104 = arith.mulf %103, %101 : vector<32x128xf32>
    %105 = arith.addf %98, %104 : vector<32x128xf32>
    %c1_60 = arith.constant 1 : index
    %c0_61 = arith.constant 0 : index
    %c0_62 = arith.constant 0 : index
    %106 = vector.load %arg2[%c1_60, %c0_61, %c0_62] : memref<2x128x128xf32, #tpu.memory_space<vmem>>, vector<1x128x128xf32>
    %107 = vector.shape_cast %106 : vector<1x128x128xf32> to vector<128x128xf32>
    %cst_63 = arith.constant dense<0.000000e+00> : vector<32x128xf32>
    %108 = tpu.matmul %101, %107, %cst_63 {dimension_numbers = #tpu.dot_dimension_numbers<[1], [0], [0], [1], [0, 0, 1, 1], [], []>} : vector<32x128xf32>, vector<128x128xf32>, vector<32x128xf32> -> vector<32x128xf32>
    %c14 = arith.constant 14 : index
    %109 = memref.load %arg0[%c14] : memref<44xf32, #tpu.memory_space<smem>>
    %110 = vector.broadcast %109 : f32 to vector<32x128xf32>
    %111 = arith.mulf %110, %108 : vector<32x128xf32>
    %112 = arith.addf %105, %111 : vector<32x128xf32>
    %c1_64 = arith.constant 1 : index
    %c0_65 = arith.constant 0 : index
    %c0_66 = arith.constant 0 : index
    %113 = vector.load %arg2[%c1_64, %c0_65, %c0_66] : memref<2x128x128xf32, #tpu.memory_space<vmem>>, vector<1x128x128xf32>
    %114 = vector.shape_cast %113 : vector<1x128x128xf32> to vector<128x128xf32>
    %cst_67 = arith.constant dense<0.000000e+00> : vector<32x128xf32>
    %115 = tpu.matmul %108, %114, %cst_67 {dimension_numbers = #tpu.dot_dimension_numbers<[1], [0], [0], [1], [0, 0, 1, 1], [], []>} : vector<32x128xf32>, vector<128x128xf32>, vector<32x128xf32> -> vector<32x128xf32>
    %c15 = arith.constant 15 : index
    %116 = memref.load %arg0[%c15] : memref<44xf32, #tpu.memory_space<smem>>
    %117 = vector.broadcast %116 : f32 to vector<32x128xf32>
    %118 = arith.mulf %117, %115 : vector<32x128xf32>
    %119 = arith.addf %112, %118 : vector<32x128xf32>
    %c1_68 = arith.constant 1 : index
    %c0_69 = arith.constant 0 : index
    %c0_70 = arith.constant 0 : index
    %120 = vector.load %arg2[%c1_68, %c0_69, %c0_70] : memref<2x128x128xf32, #tpu.memory_space<vmem>>, vector<1x128x128xf32>
    %121 = vector.shape_cast %120 : vector<1x128x128xf32> to vector<128x128xf32>
    %cst_71 = arith.constant dense<0.000000e+00> : vector<32x128xf32>
    %122 = tpu.matmul %115, %121, %cst_71 {dimension_numbers = #tpu.dot_dimension_numbers<[1], [0], [0], [1], [0, 0, 1, 1], [], []>} : vector<32x128xf32>, vector<128x128xf32>, vector<32x128xf32> -> vector<32x128xf32>
    %c16 = arith.constant 16 : index
    %123 = memref.load %arg0[%c16] : memref<44xf32, #tpu.memory_space<smem>>
    %124 = vector.broadcast %123 : f32 to vector<32x128xf32>
    %125 = arith.mulf %124, %122 : vector<32x128xf32>
    %126 = arith.addf %119, %125 : vector<32x128xf32>
    %c1_72 = arith.constant 1 : index
    %c0_73 = arith.constant 0 : index
    %c0_74 = arith.constant 0 : index
    %127 = vector.load %arg2[%c1_72, %c0_73, %c0_74] : memref<2x128x128xf32, #tpu.memory_space<vmem>>, vector<1x128x128xf32>
    %128 = vector.shape_cast %127 : vector<1x128x128xf32> to vector<128x128xf32>
    %cst_75 = arith.constant dense<0.000000e+00> : vector<32x128xf32>
    %129 = tpu.matmul %122, %128, %cst_75 {dimension_numbers = #tpu.dot_dimension_numbers<[1], [0], [0], [1], [0, 0, 1, 1], [], []>} : vector<32x128xf32>, vector<128x128xf32>, vector<32x128xf32> -> vector<32x128xf32>
    %c17 = arith.constant 17 : index
    %130 = memref.load %arg0[%c17] : memref<44xf32, #tpu.memory_space<smem>>
    %131 = vector.broadcast %130 : f32 to vector<32x128xf32>
    %132 = arith.mulf %131, %129 : vector<32x128xf32>
    %133 = arith.addf %126, %132 : vector<32x128xf32>
    %c1_76 = arith.constant 1 : index
    %c0_77 = arith.constant 0 : index
    %c0_78 = arith.constant 0 : index
    %134 = vector.load %arg2[%c1_76, %c0_77, %c0_78] : memref<2x128x128xf32, #tpu.memory_space<vmem>>, vector<1x128x128xf32>
    %135 = vector.shape_cast %134 : vector<1x128x128xf32> to vector<128x128xf32>
    %cst_79 = arith.constant dense<0.000000e+00> : vector<32x128xf32>
    %136 = tpu.matmul %129, %135, %cst_79 {dimension_numbers = #tpu.dot_dimension_numbers<[1], [0], [0], [1], [0, 0, 1, 1], [], []>} : vector<32x128xf32>, vector<128x128xf32>, vector<32x128xf32> -> vector<32x128xf32>
    %c18 = arith.constant 18 : index
    %137 = memref.load %arg0[%c18] : memref<44xf32, #tpu.memory_space<smem>>
    %138 = vector.broadcast %137 : f32 to vector<32x128xf32>
    %139 = arith.mulf %138, %136 : vector<32x128xf32>
    %140 = arith.addf %133, %139 : vector<32x128xf32>
    %c1_80 = arith.constant 1 : index
    %c0_81 = arith.constant 0 : index
    %c0_82 = arith.constant 0 : index
    %141 = vector.load %arg2[%c1_80, %c0_81, %c0_82] : memref<2x128x128xf32, #tpu.memory_space<vmem>>, vector<1x128x128xf32>
    %142 = vector.shape_cast %141 : vector<1x128x128xf32> to vector<128x128xf32>
    %cst_83 = arith.constant dense<0.000000e+00> : vector<32x128xf32>
    %143 = tpu.matmul %136, %142, %cst_83 {dimension_numbers = #tpu.dot_dimension_numbers<[1], [0], [0], [1], [0, 0, 1, 1], [], []>} : vector<32x128xf32>, vector<128x128xf32>, vector<32x128xf32> -> vector<32x128xf32>
    %c19 = arith.constant 19 : index
    %144 = memref.load %arg0[%c19] : memref<44xf32, #tpu.memory_space<smem>>
    %145 = vector.broadcast %144 : f32 to vector<32x128xf32>
    %146 = arith.mulf %145, %143 : vector<32x128xf32>
    %147 = arith.addf %140, %146 : vector<32x128xf32>
    %c1_84 = arith.constant 1 : index
    %c0_85 = arith.constant 0 : index
    %c0_86 = arith.constant 0 : index
    %148 = vector.load %arg2[%c1_84, %c0_85, %c0_86] : memref<2x128x128xf32, #tpu.memory_space<vmem>>, vector<1x128x128xf32>
    %149 = vector.shape_cast %148 : vector<1x128x128xf32> to vector<128x128xf32>
    %cst_87 = arith.constant dense<0.000000e+00> : vector<32x128xf32>
    %150 = tpu.matmul %143, %149, %cst_87 {dimension_numbers = #tpu.dot_dimension_numbers<[1], [0], [0], [1], [0, 0, 1, 1], [], []>} : vector<32x128xf32>, vector<128x128xf32>, vector<32x128xf32> -> vector<32x128xf32>
    %c20 = arith.constant 20 : index
    %151 = memref.load %arg0[%c20] : memref<44xf32, #tpu.memory_space<smem>>
    %152 = vector.broadcast %151 : f32 to vector<32x128xf32>
    %153 = arith.mulf %152, %150 : vector<32x128xf32>
    %154 = arith.addf %147, %153 : vector<32x128xf32>
    %c1_88 = arith.constant 1 : index
    %c0_89 = arith.constant 0 : index
    %c0_90 = arith.constant 0 : index
    %155 = vector.load %arg2[%c1_88, %c0_89, %c0_90] : memref<2x128x128xf32, #tpu.memory_space<vmem>>, vector<1x128x128xf32>
    %156 = vector.shape_cast %155 : vector<1x128x128xf32> to vector<128x128xf32>
    %cst_91 = arith.constant dense<0.000000e+00> : vector<32x128xf32>
    %157 = tpu.matmul %150, %156, %cst_91 {dimension_numbers = #tpu.dot_dimension_numbers<[1], [0], [0], [1], [0, 0, 1, 1], [], []>} : vector<32x128xf32>, vector<128x128xf32>, vector<32x128xf32> -> vector<32x128xf32>
    %c21 = arith.constant 21 : index
    %158 = memref.load %arg0[%c21] : memref<44xf32, #tpu.memory_space<smem>>
    %159 = vector.broadcast %158 : f32 to vector<32x128xf32>
    %160 = arith.mulf %159, %157 : vector<32x128xf32>
    %161 = arith.addf %154, %160 : vector<32x128xf32>
    %c1_92 = arith.constant 1 : index
    %c0_93 = arith.constant 0 : index
    %c0_94 = arith.constant 0 : index
    %162 = vector.load %arg6[%c1_92, %c0_93, %c0_94] : memref<2x32x32xbf16, #tpu.memory_space<vmem>>, vector<1x32x32xbf16>
    %163 = vector.shape_cast %162 : vector<1x32x32xbf16> to vector<32x32xbf16>
    %164 = arith.truncf %161 : vector<32x128xf32> to vector<32x128xbf16>
    %cst_95 = arith.constant dense<0.000000e+00> : vector<32x128xf32>
    %165 = tpu.matmul %163, %164, %cst_95 {dimension_numbers = #tpu.dot_dimension_numbers<[1], [0], [0], [1], [0, 0, 1, 1], [], []>} : vector<32x32xbf16>, vector<32x128xbf16>, vector<32x128xf32> -> vector<32x128xf32>
    %166 = arith.addf %87, %165 : vector<32x128xf32>
    %c0_96 = arith.constant 0 : index
    %c0_97 = arith.constant 0 : index
    %167 = vector.load %arg8[%c0_96, %c0_97] : memref<32x32xbf16, #tpu.memory_space<vmem>>, vector<32x32xbf16>
    %168 = arith.truncf %166 : vector<32x128xf32> to vector<32x128xbf16>
    %cst_98 = arith.constant dense<0.000000e+00> : vector<32x128xf32>
    %169 = tpu.matmul %167, %168, %cst_98 {dimension_numbers = #tpu.dot_dimension_numbers<[1], [0], [0], [1], [0, 0, 1, 1], [], []>} : vector<32x32xbf16>, vector<32x128xbf16>, vector<32x128xf32> -> vector<32x128xf32>
    %c0_99 = arith.constant 0 : index
    %c0_100 = arith.constant 0 : index
    %170 = vector.load %arg9[%c0_99, %c0_100] : memref<32x1xf32, #tpu.memory_space<vmem>>, vector<32x1xf32>
    %171 = vector.broadcast %170 : vector<32x1xf32> to vector<32x128xf32>
    %172 = arith.addf %169, %171 : vector<32x128xf32>
    %c0_101 = arith.constant 0 : index
    %c0_102 = arith.constant 0 : index
    %173 = vector.load %arg10[%c0_101, %c0_102] : memref<32x1xf32, #tpu.memory_space<vmem>>, vector<32x1xf32>
    %174 = vector.broadcast %173 : vector<32x1xf32> to vector<32x128xf32>
    %175 = arith.mulf %172, %174 : vector<32x128xf32>
    %c0_103 = arith.constant 0 : index
    %c0_104 = arith.constant 0 : index
    %176 = vector.load %arg11[%c0_103, %c0_104] : memref<32x1xf32, #tpu.memory_space<vmem>>, vector<32x1xf32>
    %177 = vector.broadcast %176 : vector<32x1xf32> to vector<32x128xf32>
    %178 = arith.addf %175, %177 : vector<32x128xf32>
    %cst_105 = arith.constant 0.000000e+00 : f32
    %179 = vector.broadcast %cst_105 : f32 to vector<32x128xf32>
    %180 = arith.maximumf %178, %179 : vector<32x128xf32>
    %c0_106 = arith.constant 0 : index
    %c0_107 = arith.constant 0 : index
    %181 = vector.load %arg12[%c0_106, %c0_107] : memref<32x32xbf16, #tpu.memory_space<vmem>>, vector<32x32xbf16>
    %182 = arith.truncf %180 : vector<32x128xf32> to vector<32x128xbf16>
    %cst_108 = arith.constant dense<0.000000e+00> : vector<32x128xf32>
    %183 = tpu.matmul %181, %182, %cst_108 {dimension_numbers = #tpu.dot_dimension_numbers<[1], [0], [0], [1], [0, 0, 1, 1], [], []>} : vector<32x32xbf16>, vector<32x128xbf16>, vector<32x128xf32> -> vector<32x128xf32>
    %c0_109 = arith.constant 0 : index
    %c0_110 = arith.constant 0 : index
    %184 = vector.load %arg13[%c0_109, %c0_110] : memref<32x1xf32, #tpu.memory_space<vmem>>, vector<32x1xf32>
    %185 = vector.broadcast %184 : vector<32x1xf32> to vector<32x128xf32>
    %186 = arith.addf %183, %185 : vector<32x128xf32>
    %c0_111 = arith.constant 0 : index
    %c0_112 = arith.constant 0 : index
    %187 = vector.load %arg14[%c0_111, %c0_112] : memref<32x1xf32, #tpu.memory_space<vmem>>, vector<32x1xf32>
    %188 = vector.broadcast %187 : vector<32x1xf32> to vector<32x128xf32>
    %189 = arith.mulf %186, %188 : vector<32x128xf32>
    %c0_113 = arith.constant 0 : index
    %c0_114 = arith.constant 0 : index
    %190 = vector.load %arg15[%c0_113, %c0_114] : memref<32x1xf32, #tpu.memory_space<vmem>>, vector<32x1xf32>
    %191 = vector.broadcast %190 : vector<32x1xf32> to vector<32x128xf32>
    %192 = arith.addf %189, %191 : vector<32x128xf32>
    %cst_115 = arith.constant 0.000000e+00 : f32
    %193 = vector.broadcast %cst_115 : f32 to vector<32x128xf32>
    %194 = arith.maximumf %192, %193 : vector<32x128xf32>
    %c0_116 = arith.constant 0 : index
    %c0_117 = arith.constant 0 : index
    %195 = vector.load %arg16[%c0_116, %c0_117] : memref<64x32xbf16, #tpu.memory_space<vmem>>, vector<64x32xbf16>
    %196 = arith.truncf %194 : vector<32x128xf32> to vector<32x128xbf16>
    %cst_118 = arith.constant dense<0.000000e+00> : vector<64x128xf32>
    %197 = tpu.matmul %195, %196, %cst_118 {dimension_numbers = #tpu.dot_dimension_numbers<[1], [0], [0], [1], [0, 0, 1, 1], [], []>} : vector<64x32xbf16>, vector<32x128xbf16>, vector<64x128xf32> -> vector<64x128xf32>
    %c0_119 = arith.constant 0 : index
    %c0_120 = arith.constant 0 : index
    %198 = vector.load %arg17[%c0_119, %c0_120] : memref<64x1xf32, #tpu.memory_space<vmem>>, vector<64x1xf32>
    %199 = vector.broadcast %198 : vector<64x1xf32> to vector<64x128xf32>
    %200 = arith.addf %197, %199 : vector<64x128xf32>
    %c0_121 = arith.constant 0 : index
    %c0_122 = arith.constant 0 : index
    %201 = vector.load %arg19[%c0_121, %c0_122] : memref<32x1xf32, #tpu.memory_space<vmem>>, vector<32x1xf32>
    %202 = vector.extract_strided_slice %200 {offsets = [0, 0], sizes = [32, 128], strides = [1, 1]} : vector<64x128xf32> to vector<32x128xf32>
    %c22 = arith.constant 22 : index
    %203 = memref.load %arg0[%c22] : memref<44xf32, #tpu.memory_space<smem>>
    %204 = vector.broadcast %203 : f32 to vector<32x128xf32>
    %205 = arith.mulf %204, %202 : vector<32x128xf32>
    %c0_123 = arith.constant 0 : index
    %c0_124 = arith.constant 0 : index
    %c0_125 = arith.constant 0 : index
    %206 = vector.load %arg2[%c0_123, %c0_124, %c0_125] : memref<2x128x128xf32, #tpu.memory_space<vmem>>, vector<1x128x128xf32>
    %207 = vector.shape_cast %206 : vector<1x128x128xf32> to vector<128x128xf32>
    %cst_126 = arith.constant dense<0.000000e+00> : vector<32x128xf32>
    %208 = tpu.matmul %202, %207, %cst_126 {dimension_numbers = #tpu.dot_dimension_numbers<[1], [0], [0], [1], [0, 0, 1, 1], [], []>} : vector<32x128xf32>, vector<128x128xf32>, vector<32x128xf32> -> vector<32x128xf32>
    %c23 = arith.constant 23 : index
    %209 = memref.load %arg0[%c23] : memref<44xf32, #tpu.memory_space<smem>>
    %210 = vector.broadcast %209 : f32 to vector<32x128xf32>
    %211 = arith.mulf %210, %208 : vector<32x128xf32>
    %212 = arith.addf %205, %211 : vector<32x128xf32>
    %c0_127 = arith.constant 0 : index
    %c0_128 = arith.constant 0 : index
    %c0_129 = arith.constant 0 : index
    %213 = vector.load %arg2[%c0_127, %c0_128, %c0_129] : memref<2x128x128xf32, #tpu.memory_space<vmem>>, vector<1x128x128xf32>
    %214 = vector.shape_cast %213 : vector<1x128x128xf32> to vector<128x128xf32>
    %cst_130 = arith.constant dense<0.000000e+00> : vector<32x128xf32>
    %215 = tpu.matmul %208, %214, %cst_130 {dimension_numbers = #tpu.dot_dimension_numbers<[1], [0], [0], [1], [0, 0, 1, 1], [], []>} : vector<32x128xf32>, vector<128x128xf32>, vector<32x128xf32> -> vector<32x128xf32>
    %c24 = arith.constant 24 : index
    %216 = memref.load %arg0[%c24] : memref<44xf32, #tpu.memory_space<smem>>
    %217 = vector.broadcast %216 : f32 to vector<32x128xf32>
    %218 = arith.mulf %217, %215 : vector<32x128xf32>
    %219 = arith.addf %212, %218 : vector<32x128xf32>
    %c0_131 = arith.constant 0 : index
    %c0_132 = arith.constant 0 : index
    %c0_133 = arith.constant 0 : index
    %220 = vector.load %arg2[%c0_131, %c0_132, %c0_133] : memref<2x128x128xf32, #tpu.memory_space<vmem>>, vector<1x128x128xf32>
    %221 = vector.shape_cast %220 : vector<1x128x128xf32> to vector<128x128xf32>
    %cst_134 = arith.constant dense<0.000000e+00> : vector<32x128xf32>
    %222 = tpu.matmul %215, %221, %cst_134 {dimension_numbers = #tpu.dot_dimension_numbers<[1], [0], [0], [1], [0, 0, 1, 1], [], []>} : vector<32x128xf32>, vector<128x128xf32>, vector<32x128xf32> -> vector<32x128xf32>
    %c25 = arith.constant 25 : index
    %223 = memref.load %arg0[%c25] : memref<44xf32, #tpu.memory_space<smem>>
    %224 = vector.broadcast %223 : f32 to vector<32x128xf32>
    %225 = arith.mulf %224, %222 : vector<32x128xf32>
    %226 = arith.addf %219, %225 : vector<32x128xf32>
    %c0_135 = arith.constant 0 : index
    %c0_136 = arith.constant 0 : index
    %c0_137 = arith.constant 0 : index
    %227 = vector.load %arg2[%c0_135, %c0_136, %c0_137] : memref<2x128x128xf32, #tpu.memory_space<vmem>>, vector<1x128x128xf32>
    %228 = vector.shape_cast %227 : vector<1x128x128xf32> to vector<128x128xf32>
    %cst_138 = arith.constant dense<0.000000e+00> : vector<32x128xf32>
    %229 = tpu.matmul %222, %228, %cst_138 {dimension_numbers = #tpu.dot_dimension_numbers<[1], [0], [0], [1], [0, 0, 1, 1], [], []>} : vector<32x128xf32>, vector<128x128xf32>, vector<32x128xf32> -> vector<32x128xf32>
    %c26 = arith.constant 26 : index
    %230 = memref.load %arg0[%c26] : memref<44xf32, #tpu.memory_space<smem>>
    %231 = vector.broadcast %230 : f32 to vector<32x128xf32>
    %232 = arith.mulf %231, %229 : vector<32x128xf32>
    %233 = arith.addf %226, %232 : vector<32x128xf32>
    %c0_139 = arith.constant 0 : index
    %c0_140 = arith.constant 0 : index
    %c0_141 = arith.constant 0 : index
    %234 = vector.load %arg2[%c0_139, %c0_140, %c0_141] : memref<2x128x128xf32, #tpu.memory_space<vmem>>, vector<1x128x128xf32>
    %235 = vector.shape_cast %234 : vector<1x128x128xf32> to vector<128x128xf32>
    %cst_142 = arith.constant dense<0.000000e+00> : vector<32x128xf32>
    %236 = tpu.matmul %229, %235, %cst_142 {dimension_numbers = #tpu.dot_dimension_numbers<[1], [0], [0], [1], [0, 0, 1, 1], [], []>} : vector<32x128xf32>, vector<128x128xf32>, vector<32x128xf32> -> vector<32x128xf32>
    %c27 = arith.constant 27 : index
    %237 = memref.load %arg0[%c27] : memref<44xf32, #tpu.memory_space<smem>>
    %238 = vector.broadcast %237 : f32 to vector<32x128xf32>
    %239 = arith.mulf %238, %236 : vector<32x128xf32>
    %240 = arith.addf %233, %239 : vector<32x128xf32>
    %c0_143 = arith.constant 0 : index
    %c0_144 = arith.constant 0 : index
    %c0_145 = arith.constant 0 : index
    %241 = vector.load %arg2[%c0_143, %c0_144, %c0_145] : memref<2x128x128xf32, #tpu.memory_space<vmem>>, vector<1x128x128xf32>
    %242 = vector.shape_cast %241 : vector<1x128x128xf32> to vector<128x128xf32>
    %cst_146 = arith.constant dense<0.000000e+00> : vector<32x128xf32>
    %243 = tpu.matmul %236, %242, %cst_146 {dimension_numbers = #tpu.dot_dimension_numbers<[1], [0], [0], [1], [0, 0, 1, 1], [], []>} : vector<32x128xf32>, vector<128x128xf32>, vector<32x128xf32> -> vector<32x128xf32>
    %c28 = arith.constant 28 : index
    %244 = memref.load %arg0[%c28] : memref<44xf32, #tpu.memory_space<smem>>
    %245 = vector.broadcast %244 : f32 to vector<32x128xf32>
    %246 = arith.mulf %245, %243 : vector<32x128xf32>
    %247 = arith.addf %240, %246 : vector<32x128xf32>
    %c0_147 = arith.constant 0 : index
    %c0_148 = arith.constant 0 : index
    %c0_149 = arith.constant 0 : index
    %248 = vector.load %arg2[%c0_147, %c0_148, %c0_149] : memref<2x128x128xf32, #tpu.memory_space<vmem>>, vector<1x128x128xf32>
    %249 = vector.shape_cast %248 : vector<1x128x128xf32> to vector<128x128xf32>
    %cst_150 = arith.constant dense<0.000000e+00> : vector<32x128xf32>
    %250 = tpu.matmul %243, %249, %cst_150 {dimension_numbers = #tpu.dot_dimension_numbers<[1], [0], [0], [1], [0, 0, 1, 1], [], []>} : vector<32x128xf32>, vector<128x128xf32>, vector<32x128xf32> -> vector<32x128xf32>
    %c29 = arith.constant 29 : index
    %251 = memref.load %arg0[%c29] : memref<44xf32, #tpu.memory_space<smem>>
    %252 = vector.broadcast %251 : f32 to vector<32x128xf32>
    %253 = arith.mulf %252, %250 : vector<32x128xf32>
    %254 = arith.addf %247, %253 : vector<32x128xf32>
    %c0_151 = arith.constant 0 : index
    %c0_152 = arith.constant 0 : index
    %c0_153 = arith.constant 0 : index
    %255 = vector.load %arg2[%c0_151, %c0_152, %c0_153] : memref<2x128x128xf32, #tpu.memory_space<vmem>>, vector<1x128x128xf32>
    %256 = vector.shape_cast %255 : vector<1x128x128xf32> to vector<128x128xf32>
    %cst_154 = arith.constant dense<0.000000e+00> : vector<32x128xf32>
    %257 = tpu.matmul %250, %256, %cst_154 {dimension_numbers = #tpu.dot_dimension_numbers<[1], [0], [0], [1], [0, 0, 1, 1], [], []>} : vector<32x128xf32>, vector<128x128xf32>, vector<32x128xf32> -> vector<32x128xf32>
    %c30 = arith.constant 30 : index
    %258 = memref.load %arg0[%c30] : memref<44xf32, #tpu.memory_space<smem>>
    %259 = vector.broadcast %258 : f32 to vector<32x128xf32>
    %260 = arith.mulf %259, %257 : vector<32x128xf32>
    %261 = arith.addf %254, %260 : vector<32x128xf32>
    %c0_155 = arith.constant 0 : index
    %c0_156 = arith.constant 0 : index
    %c0_157 = arith.constant 0 : index
    %262 = vector.load %arg2[%c0_155, %c0_156, %c0_157] : memref<2x128x128xf32, #tpu.memory_space<vmem>>, vector<1x128x128xf32>
    %263 = vector.shape_cast %262 : vector<1x128x128xf32> to vector<128x128xf32>
    %cst_158 = arith.constant dense<0.000000e+00> : vector<32x128xf32>
    %264 = tpu.matmul %257, %263, %cst_158 {dimension_numbers = #tpu.dot_dimension_numbers<[1], [0], [0], [1], [0, 0, 1, 1], [], []>} : vector<32x128xf32>, vector<128x128xf32>, vector<32x128xf32> -> vector<32x128xf32>
    %c31 = arith.constant 31 : index
    %265 = memref.load %arg0[%c31] : memref<44xf32, #tpu.memory_space<smem>>
    %266 = vector.broadcast %265 : f32 to vector<32x128xf32>
    %267 = arith.mulf %266, %264 : vector<32x128xf32>
    %268 = arith.addf %261, %267 : vector<32x128xf32>
    %c0_159 = arith.constant 0 : index
    %c0_160 = arith.constant 0 : index
    %c0_161 = arith.constant 0 : index
    %269 = vector.load %arg2[%c0_159, %c0_160, %c0_161] : memref<2x128x128xf32, #tpu.memory_space<vmem>>, vector<1x128x128xf32>
    %270 = vector.shape_cast %269 : vector<1x128x128xf32> to vector<128x128xf32>
    %cst_162 = arith.constant dense<0.000000e+00> : vector<32x128xf32>
    %271 = tpu.matmul %264, %270, %cst_162 {dimension_numbers = #tpu.dot_dimension_numbers<[1], [0], [0], [1], [0, 0, 1, 1], [], []>} : vector<32x128xf32>, vector<128x128xf32>, vector<32x128xf32> -> vector<32x128xf32>
    %c32 = arith.constant 32 : index
    %272 = memref.load %arg0[%c32] : memref<44xf32, #tpu.memory_space<smem>>
    %273 = vector.broadcast %272 : f32 to vector<32x128xf32>
    %274 = arith.mulf %273, %271 : vector<32x128xf32>
    %275 = arith.addf %268, %274 : vector<32x128xf32>
    %c0_163 = arith.constant 0 : index
    %c0_164 = arith.constant 0 : index
    %c0_165 = arith.constant 0 : index
    %276 = vector.load %arg18[%c0_163, %c0_164, %c0_165] : memref<2x32x32xbf16, #tpu.memory_space<vmem>>, vector<1x32x32xbf16>
    %277 = vector.shape_cast %276 : vector<1x32x32xbf16> to vector<32x32xbf16>
    %278 = arith.truncf %275 : vector<32x128xf32> to vector<32x128xbf16>
    %cst_166 = arith.constant dense<0.000000e+00> : vector<32x128xf32>
    %279 = tpu.matmul %277, %278, %cst_166 {dimension_numbers = #tpu.dot_dimension_numbers<[1], [0], [0], [1], [0, 0, 1, 1], [], []>} : vector<32x32xbf16>, vector<32x128xbf16>, vector<32x128xf32> -> vector<32x128xf32>
    %280 = vector.broadcast %201 : vector<32x1xf32> to vector<32x128xf32>
    %281 = arith.addf %280, %279 : vector<32x128xf32>
    %282 = vector.extract_strided_slice %200 {offsets = [32, 0], sizes = [32, 128], strides = [1, 1]} : vector<64x128xf32> to vector<32x128xf32>
    %c33 = arith.constant 33 : index
    %283 = memref.load %arg0[%c33] : memref<44xf32, #tpu.memory_space<smem>>
    %284 = vector.broadcast %283 : f32 to vector<32x128xf32>
    %285 = arith.mulf %284, %282 : vector<32x128xf32>
    %c1_167 = arith.constant 1 : index
    %c0_168 = arith.constant 0 : index
    %c0_169 = arith.constant 0 : index
    %286 = vector.load %arg2[%c1_167, %c0_168, %c0_169] : memref<2x128x128xf32, #tpu.memory_space<vmem>>, vector<1x128x128xf32>
    %287 = vector.shape_cast %286 : vector<1x128x128xf32> to vector<128x128xf32>
    %cst_170 = arith.constant dense<0.000000e+00> : vector<32x128xf32>
    %288 = tpu.matmul %282, %287, %cst_170 {dimension_numbers = #tpu.dot_dimension_numbers<[1], [0], [0], [1], [0, 0, 1, 1], [], []>} : vector<32x128xf32>, vector<128x128xf32>, vector<32x128xf32> -> vector<32x128xf32>
    %c34 = arith.constant 34 : index
    %289 = memref.load %arg0[%c34] : memref<44xf32, #tpu.memory_space<smem>>
    %290 = vector.broadcast %289 : f32 to vector<32x128xf32>
    %291 = arith.mulf %290, %288 : vector<32x128xf32>
    %292 = arith.addf %285, %291 : vector<32x128xf32>
    %c1_171 = arith.constant 1 : index
    %c0_172 = arith.constant 0 : index
    %c0_173 = arith.constant 0 : index
    %293 = vector.load %arg2[%c1_171, %c0_172, %c0_173] : memref<2x128x128xf32, #tpu.memory_space<vmem>>, vector<1x128x128xf32>
    %294 = vector.shape_cast %293 : vector<1x128x128xf32> to vector<128x128xf32>
    %cst_174 = arith.constant dense<0.000000e+00> : vector<32x128xf32>
    %295 = tpu.matmul %288, %294, %cst_174 {dimension_numbers = #tpu.dot_dimension_numbers<[1], [0], [0], [1], [0, 0, 1, 1], [], []>} : vector<32x128xf32>, vector<128x128xf32>, vector<32x128xf32> -> vector<32x128xf32>
    %c35 = arith.constant 35 : index
    %296 = memref.load %arg0[%c35] : memref<44xf32, #tpu.memory_space<smem>>
    %297 = vector.broadcast %296 : f32 to vector<32x128xf32>
    %298 = arith.mulf %297, %295 : vector<32x128xf32>
    %299 = arith.addf %292, %298 : vector<32x128xf32>
    %c1_175 = arith.constant 1 : index
    %c0_176 = arith.constant 0 : index
    %c0_177 = arith.constant 0 : index
    %300 = vector.load %arg2[%c1_175, %c0_176, %c0_177] : memref<2x128x128xf32, #tpu.memory_space<vmem>>, vector<1x128x128xf32>
    %301 = vector.shape_cast %300 : vector<1x128x128xf32> to vector<128x128xf32>
    %cst_178 = arith.constant dense<0.000000e+00> : vector<32x128xf32>
    %302 = tpu.matmul %295, %301, %cst_178 {dimension_numbers = #tpu.dot_dimension_numbers<[1], [0], [0], [1], [0, 0, 1, 1], [], []>} : vector<32x128xf32>, vector<128x128xf32>, vector<32x128xf32> -> vector<32x128xf32>
    %c36 = arith.constant 36 : index
    %303 = memref.load %arg0[%c36] : memref<44xf32, #tpu.memory_space<smem>>
    %304 = vector.broadcast %303 : f32 to vector<32x128xf32>
    %305 = arith.mulf %304, %302 : vector<32x128xf32>
    %306 = arith.addf %299, %305 : vector<32x128xf32>
    %c1_179 = arith.constant 1 : index
    %c0_180 = arith.constant 0 : index
    %c0_181 = arith.constant 0 : index
    %307 = vector.load %arg2[%c1_179, %c0_180, %c0_181] : memref<2x128x128xf32, #tpu.memory_space<vmem>>, vector<1x128x128xf32>
    %308 = vector.shape_cast %307 : vector<1x128x128xf32> to vector<128x128xf32>
    %cst_182 = arith.constant dense<0.000000e+00> : vector<32x128xf32>
    %309 = tpu.matmul %302, %308, %cst_182 {dimension_numbers = #tpu.dot_dimension_numbers<[1], [0], [0], [1], [0, 0, 1, 1], [], []>} : vector<32x128xf32>, vector<128x128xf32>, vector<32x128xf32> -> vector<32x128xf32>
    %c37 = arith.constant 37 : index
    %310 = memref.load %arg0[%c37] : memref<44xf32, #tpu.memory_space<smem>>
    %311 = vector.broadcast %310 : f32 to vector<32x128xf32>
    %312 = arith.mulf %311, %309 : vector<32x128xf32>
    %313 = arith.addf %306, %312 : vector<32x128xf32>
    %c1_183 = arith.constant 1 : index
    %c0_184 = arith.constant 0 : index
    %c0_185 = arith.constant 0 : index
    %314 = vector.load %arg2[%c1_183, %c0_184, %c0_185] : memref<2x128x128xf32, #tpu.memory_space<vmem>>, vector<1x128x128xf32>
    %315 = vector.shape_cast %314 : vector<1x128x128xf32> to vector<128x128xf32>
    %cst_186 = arith.constant dense<0.000000e+00> : vector<32x128xf32>
    %316 = tpu.matmul %309, %315, %cst_186 {dimension_numbers = #tpu.dot_dimension_numbers<[1], [0], [0], [1], [0, 0, 1, 1], [], []>} : vector<32x128xf32>, vector<128x128xf32>, vector<32x128xf32> -> vector<32x128xf32>
    %c38 = arith.constant 38 : index
    %317 = memref.load %arg0[%c38] : memref<44xf32, #tpu.memory_space<smem>>
    %318 = vector.broadcast %317 : f32 to vector<32x128xf32>
    %319 = arith.mulf %318, %316 : vector<32x128xf32>
    %320 = arith.addf %313, %319 : vector<32x128xf32>
    %c1_187 = arith.constant 1 : index
    %c0_188 = arith.constant 0 : index
    %c0_189 = arith.constant 0 : index
    %321 = vector.load %arg2[%c1_187, %c0_188, %c0_189] : memref<2x128x128xf32, #tpu.memory_space<vmem>>, vector<1x128x128xf32>
    %322 = vector.shape_cast %321 : vector<1x128x128xf32> to vector<128x128xf32>
    %cst_190 = arith.constant dense<0.000000e+00> : vector<32x128xf32>
    %323 = tpu.matmul %316, %322, %cst_190 {dimension_numbers = #tpu.dot_dimension_numbers<[1], [0], [0], [1], [0, 0, 1, 1], [], []>} : vector<32x128xf32>, vector<128x128xf32>, vector<32x128xf32> -> vector<32x128xf32>
    %c39 = arith.constant 39 : index
    %324 = memref.load %arg0[%c39] : memref<44xf32, #tpu.memory_space<smem>>
    %325 = vector.broadcast %324 : f32 to vector<32x128xf32>
    %326 = arith.mulf %325, %323 : vector<32x128xf32>
    %327 = arith.addf %320, %326 : vector<32x128xf32>
    %c1_191 = arith.constant 1 : index
    %c0_192 = arith.constant 0 : index
    %c0_193 = arith.constant 0 : index
    %328 = vector.load %arg2[%c1_191, %c0_192, %c0_193] : memref<2x128x128xf32, #tpu.memory_space<vmem>>, vector<1x128x128xf32>
    %329 = vector.shape_cast %328 : vector<1x128x128xf32> to vector<128x128xf32>
    %cst_194 = arith.constant dense<0.000000e+00> : vector<32x128xf32>
    %330 = tpu.matmul %323, %329, %cst_194 {dimension_numbers = #tpu.dot_dimension_numbers<[1], [0], [0], [1], [0, 0, 1, 1], [], []>} : vector<32x128xf32>, vector<128x128xf32>, vector<32x128xf32> -> vector<32x128xf32>
    %c40 = arith.constant 40 : index
    %331 = memref.load %arg0[%c40] : memref<44xf32, #tpu.memory_space<smem>>
    %332 = vector.broadcast %331 : f32 to vector<32x128xf32>
    %333 = arith.mulf %332, %330 : vector<32x128xf32>
    %334 = arith.addf %327, %333 : vector<32x128xf32>
    %c1_195 = arith.constant 1 : index
    %c0_196 = arith.constant 0 : index
    %c0_197 = arith.constant 0 : index
    %335 = vector.load %arg2[%c1_195, %c0_196, %c0_197] : memref<2x128x128xf32, #tpu.memory_space<vmem>>, vector<1x128x128xf32>
    %336 = vector.shape_cast %335 : vector<1x128x128xf32> to vector<128x128xf32>
    %cst_198 = arith.constant dense<0.000000e+00> : vector<32x128xf32>
    %337 = tpu.matmul %330, %336, %cst_198 {dimension_numbers = #tpu.dot_dimension_numbers<[1], [0], [0], [1], [0, 0, 1, 1], [], []>} : vector<32x128xf32>, vector<128x128xf32>, vector<32x128xf32> -> vector<32x128xf32>
    %c41 = arith.constant 41 : index
    %338 = memref.load %arg0[%c41] : memref<44xf32, #tpu.memory_space<smem>>
    %339 = vector.broadcast %338 : f32 to vector<32x128xf32>
    %340 = arith.mulf %339, %337 : vector<32x128xf32>
    %341 = arith.addf %334, %340 : vector<32x128xf32>
    %c1_199 = arith.constant 1 : index
    %c0_200 = arith.constant 0 : index
    %c0_201 = arith.constant 0 : index
    %342 = vector.load %arg2[%c1_199, %c0_200, %c0_201] : memref<2x128x128xf32, #tpu.memory_space<vmem>>, vector<1x128x128xf32>
    %343 = vector.shape_cast %342 : vector<1x128x128xf32> to vector<128x128xf32>
    %cst_202 = arith.constant dense<0.000000e+00> : vector<32x128xf32>
    %344 = tpu.matmul %337, %343, %cst_202 {dimension_numbers = #tpu.dot_dimension_numbers<[1], [0], [0], [1], [0, 0, 1, 1], [], []>} : vector<32x128xf32>, vector<128x128xf32>, vector<32x128xf32> -> vector<32x128xf32>
    %c42 = arith.constant 42 : index
    %345 = memref.load %arg0[%c42] : memref<44xf32, #tpu.memory_space<smem>>
    %346 = vector.broadcast %345 : f32 to vector<32x128xf32>
    %347 = arith.mulf %346, %344 : vector<32x128xf32>
    %348 = arith.addf %341, %347 : vector<32x128xf32>
    %c1_203 = arith.constant 1 : index
    %c0_204 = arith.constant 0 : index
    %c0_205 = arith.constant 0 : index
    %349 = vector.load %arg2[%c1_203, %c0_204, %c0_205] : memref<2x128x128xf32, #tpu.memory_space<vmem>>, vector<1x128x128xf32>
    %350 = vector.shape_cast %349 : vector<1x128x128xf32> to vector<128x128xf32>
    %cst_206 = arith.constant dense<0.000000e+00> : vector<32x128xf32>
    %351 = tpu.matmul %344, %350, %cst_206 {dimension_numbers = #tpu.dot_dimension_numbers<[1], [0], [0], [1], [0, 0, 1, 1], [], []>} : vector<32x128xf32>, vector<128x128xf32>, vector<32x128xf32> -> vector<32x128xf32>
    %c43 = arith.constant 43 : index
    %352 = memref.load %arg0[%c43] : memref<44xf32, #tpu.memory_space<smem>>
    %353 = vector.broadcast %352 : f32 to vector<32x128xf32>
    %354 = arith.mulf %353, %351 : vector<32x128xf32>
    %355 = arith.addf %348, %354 : vector<32x128xf32>
    %c1_207 = arith.constant 1 : index
    %c0_208 = arith.constant 0 : index
    %c0_209 = arith.constant 0 : index
    %356 = vector.load %arg18[%c1_207, %c0_208, %c0_209] : memref<2x32x32xbf16, #tpu.memory_space<vmem>>, vector<1x32x32xbf16>
    %357 = vector.shape_cast %356 : vector<1x32x32xbf16> to vector<32x32xbf16>
    %358 = arith.truncf %355 : vector<32x128xf32> to vector<32x128xbf16>
    %cst_210 = arith.constant dense<0.000000e+00> : vector<32x128xf32>
    %359 = tpu.matmul %357, %358, %cst_210 {dimension_numbers = #tpu.dot_dimension_numbers<[1], [0], [0], [1], [0, 0, 1, 1], [], []>} : vector<32x32xbf16>, vector<32x128xbf16>, vector<32x128xf32> -> vector<32x128xf32>
    %360 = arith.addf %281, %359 : vector<32x128xf32>
    %c0_211 = arith.constant 0 : index
    %c0_212 = arith.constant 0 : index
    %361 = vector.load %arg20[%c0_211, %c0_212] : memref<32x32xbf16, #tpu.memory_space<vmem>>, vector<32x32xbf16>
    %362 = arith.truncf %360 : vector<32x128xf32> to vector<32x128xbf16>
    %cst_213 = arith.constant dense<0.000000e+00> : vector<32x128xf32>
    %363 = tpu.matmul %361, %362, %cst_213 {dimension_numbers = #tpu.dot_dimension_numbers<[1], [0], [0], [1], [0, 0, 1, 1], [], []>} : vector<32x32xbf16>, vector<32x128xbf16>, vector<32x128xf32> -> vector<32x128xf32>
    %c0_214 = arith.constant 0 : index
    %c0_215 = arith.constant 0 : index
    %364 = vector.load %arg21[%c0_214, %c0_215] : memref<32x1xf32, #tpu.memory_space<vmem>>, vector<32x1xf32>
    %365 = vector.broadcast %364 : vector<32x1xf32> to vector<32x128xf32>
    %366 = arith.addf %363, %365 : vector<32x128xf32>
    %c0_216 = arith.constant 0 : index
    %c0_217 = arith.constant 0 : index
    %367 = vector.load %arg22[%c0_216, %c0_217] : memref<32x1xf32, #tpu.memory_space<vmem>>, vector<32x1xf32>
    %368 = vector.broadcast %367 : vector<32x1xf32> to vector<32x128xf32>
    %369 = arith.mulf %366, %368 : vector<32x128xf32>
    %c0_218 = arith.constant 0 : index
    %c0_219 = arith.constant 0 : index
    %370 = vector.load %arg23[%c0_218, %c0_219] : memref<32x1xf32, #tpu.memory_space<vmem>>, vector<32x1xf32>
    %371 = vector.broadcast %370 : vector<32x1xf32> to vector<32x128xf32>
    %372 = arith.addf %369, %371 : vector<32x128xf32>
    %cst_220 = arith.constant 0.000000e+00 : f32
    %373 = vector.broadcast %cst_220 : f32 to vector<32x128xf32>
    %374 = arith.maximumf %372, %373 : vector<32x128xf32>
    %c0_221 = arith.constant 0 : index
    %c0_222 = arith.constant 0 : index
    %375 = vector.load %arg24[%c0_221, %c0_222] : memref<32x32xbf16, #tpu.memory_space<vmem>>, vector<32x32xbf16>
    %376 = arith.truncf %374 : vector<32x128xf32> to vector<32x128xbf16>
    %cst_223 = arith.constant dense<0.000000e+00> : vector<32x128xf32>
    %377 = tpu.matmul %375, %376, %cst_223 {dimension_numbers = #tpu.dot_dimension_numbers<[1], [0], [0], [1], [0, 0, 1, 1], [], []>} : vector<32x32xbf16>, vector<32x128xbf16>, vector<32x128xf32> -> vector<32x128xf32>
    %c0_224 = arith.constant 0 : index
    %c0_225 = arith.constant 0 : index
    %378 = vector.load %arg25[%c0_224, %c0_225] : memref<32x1xf32, #tpu.memory_space<vmem>>, vector<32x1xf32>
    %379 = vector.broadcast %378 : vector<32x1xf32> to vector<32x128xf32>
    %380 = arith.addf %377, %379 : vector<32x128xf32>
    %c0_226 = arith.constant 0 : index
    %c0_227 = arith.constant 0 : index
    %381 = vector.load %arg26[%c0_226, %c0_227] : memref<32x1xf32, #tpu.memory_space<vmem>>, vector<32x1xf32>
    %382 = vector.broadcast %381 : vector<32x1xf32> to vector<32x128xf32>
    %383 = arith.mulf %380, %382 : vector<32x128xf32>
    %c0_228 = arith.constant 0 : index
    %c0_229 = arith.constant 0 : index
    %384 = vector.load %arg27[%c0_228, %c0_229] : memref<32x1xf32, #tpu.memory_space<vmem>>, vector<32x1xf32>
    %385 = vector.broadcast %384 : vector<32x1xf32> to vector<32x128xf32>
    %386 = arith.addf %383, %385 : vector<32x128xf32>
    %cst_230 = arith.constant 0.000000e+00 : f32
    %387 = vector.broadcast %cst_230 : f32 to vector<32x128xf32>
    %388 = arith.maximumf %386, %387 : vector<32x128xf32>
    %c0_231 = arith.constant 0 : index
    %c0_232 = arith.constant 0 : index
    %389 = vector.load %arg3[%c0_231, %c0_232] : memref<128x2xf32, #tpu.memory_space<vmem>>, vector<128x2xf32>
    %cst_233 = arith.constant dense<0.000000e+00> : vector<32x2xf32>
    %390 = tpu.matmul %388, %389, %cst_233 {dimension_numbers = #tpu.dot_dimension_numbers<[1], [0], [0], [1], [0, 0, 1, 1], [], []>} : vector<32x128xf32>, vector<128x2xf32>, vector<32x2xf32> -> vector<32x2xf32>
    %c0_234 = arith.constant 0 : index
    %c0_235 = arith.constant 0 : index
    %391 = vector.load %arg28[%c0_234, %c0_235] : memref<32x32xbf16, #tpu.memory_space<vmem>>, vector<32x32xbf16>
    %392 = arith.truncf %390 : vector<32x2xf32> to vector<32x2xbf16>
    %cst_236 = arith.constant dense<0.000000e+00> : vector<32x2xf32>
    %393 = tpu.matmul %391, %392, %cst_236 {dimension_numbers = #tpu.dot_dimension_numbers<[1], [0], [0], [1], [0, 0, 1, 1], [], []>} : vector<32x32xbf16>, vector<32x2xbf16>, vector<32x2xf32> -> vector<32x2xf32>
    %c0_237 = arith.constant 0 : index
    %c0_238 = arith.constant 0 : index
    %394 = vector.load %arg29[%c0_237, %c0_238] : memref<32x1xf32, #tpu.memory_space<vmem>>, vector<32x1xf32>
    %395 = vector.broadcast %394 : vector<32x1xf32> to vector<32x2xf32>
    %396 = arith.addf %393, %395 : vector<32x2xf32>
    %cst_239 = arith.constant 0.000000e+00 : f32
    %397 = vector.broadcast %cst_239 : f32 to vector<32x2xf32>
    %398 = arith.maximumf %396, %397 : vector<32x2xf32>
    %c0_240 = arith.constant 0 : index
    %c0_241 = arith.constant 0 : index
    %399 = vector.load %arg30[%c0_240, %c0_241] : memref<4x32xbf16, #tpu.memory_space<vmem>>, vector<4x32xbf16>
    %400 = arith.truncf %398 : vector<32x2xf32> to vector<32x2xbf16>
    %cst_242 = arith.constant dense<0.000000e+00> : vector<4x2xf32>
    %401 = tpu.matmul %399, %400, %cst_242 {dimension_numbers = #tpu.dot_dimension_numbers<[1], [0], [0], [1], [0, 0, 1, 1], [], []>} : vector<4x32xbf16>, vector<32x2xbf16>, vector<4x2xf32> -> vector<4x2xf32>
    %c0_243 = arith.constant 0 : index
    %c0_244 = arith.constant 0 : index
    %402 = vector.load %arg31[%c0_243, %c0_244] : memref<4x1xf32, #tpu.memory_space<vmem>>, vector<4x1xf32>
    %403 = vector.broadcast %402 : vector<4x1xf32> to vector<4x2xf32>
    %404 = arith.addf %401, %403 : vector<4x2xf32>
    %c0_245 = arith.constant 0 : index
    %c0_246 = arith.constant 0 : index
    %405 = vector.load %arg32[%c0_245, %c0_246] : memref<4x2xf32, #tpu.memory_space<vmem>>, vector<4x2xf32>
    tpu.vector_store %arg32[%c0_245, %c0_246], %404 {strides = array<i32>} : memref<4x2xf32, #tpu.memory_space<vmem>>, vector<4x2xf32>,
    return
  }
}

</mosaic_0001>

<bundles_post_ra>
// kernel: higcn_forward.1
= control target key start
LH: loop header
LB: loop body
LE: loop exit
PB: predicated region body
PF: predicated region fallthrough
CT: control target
= control target key end

     0   :  { %s9639_s6 = smov 1   ;;  %s9640_s10 = smov 2   ;;  %s10770_s0 = inlined_call_operand.smem [shape: u32[33], index: -1, kind: input, shape index: {}] }
   0x1   :  { %s9683_s5 = sld [smem:[%s10770_s0]]   ;;  %s9641_s14 = smov 3  }
   0x2   :  { %s9688_s9 = sld [smem:[%s10770_s0 + %s9639_s6]]   ;;  %s9642_s18 = smov 4  }
   0x3   :  { %s9693_s13 = sld [smem:[%s10770_s0 + %s9640_s10]]   ;;  %s9643_s22 = smov 5  }
   0x4   :  { %s9698_s17 = sld [smem:[%s10770_s0 + %s9641_s14]]   ;;  %s9644_s26 = smov 6  }
   0x5   :  { %s9703_s21 = sld [smem:[%s10770_s0 + %s9642_s18]]   ;;  %s9645_s30 = smov 7  }
   0x6   :  { %s9708_s25 = sld [smem:[%s10770_s0 + %s9643_s22]]   ;;  %s9646_s4 = smov 8  }
   0x7   :  { %s9713_s29 = sld [smem:[%s10770_s0 + %s9644_s26]]   ;;  %s9647_s10 = smov 9  }
   0x8   :  { %s9718_s3 = sld [smem:[%s10770_s0 + %s9645_s30]]   ;;  %s9648_s15 = smov 10  }
   0x9   :  { %s9723_s8 = sld [smem:[%s10770_s0 + %s9646_s4]]   ;;  %s9649_s20 = smov 11  }
   0xa   :  { %10786 = sst [smem:[#allocation5_spill]] %s9698_s17  ;;  %s9650_s26 = smov 12  }
   0xb   :  { %s9728_s14 = sld [smem:[%s10770_s0 + %s9647_s10]]   ;;  %s9651_s1 = smov 13  }
   0xc   :  { %s9733_s19 = sld [smem:[%s10770_s0 + %s9648_s15]]   ;;  %s9652_s7 = smov 14  }
   0xd   :  { %10787 = sst [smem:[#allocation6_spill]] %s9713_s29  ;;  %s9653_s15 = smov 15  }
   0xe   :  { %s9738_s24 = sld [smem:[%s10770_s0 + %s9649_s20]]   ;;  %s9654_s22 = smov 16  }
   0xf   :  { %10788 = sst [smem:[#allocation7_spill]] %s9723_s8  ;;  %s9655_s28 = smov 17  }
  0x10   :  { %s9743_s30 = sld [smem:[%s10770_s0 + %s9650_s26]]  }
  0x11   :  { %s9748_s6 = sld [smem:[%s10770_s0 + %s9651_s1]]  }
  0x12   :  { %s9753_s12 = sld [smem:[%s10770_s0 + %s9652_s7]]   ;;  %s9656_s7 = smov 18  }
  0x13   :  { %s9758_s20 = sld [smem:[%s10770_s0 + %s9653_s15]]   ;;  %s9657_s15 = smov 19  }
  0x14   :  { %s9763_s27 = sld [smem:[%s10770_s0 + %s9654_s22]]   ;;  %s9658_s22 = smov 20  }
  0x15   :  { %s9768_s4 = sld [smem:[%s10770_s0 + %s9655_s28]]   ;;  %s9659_s28 = smov 21  }
  0x16   :  { %10789 = sst [smem:[#allocation8_spill]] %s9743_s30 }
  0x17   :  { %s9773_s17 = sld [smem:[%s10770_s0 + %s9656_s7]]   ;;  %s9660_s7 = smov 22  }
  0x18   :  { %s9778_s30 = sld [smem:[%s10770_s0 + %s9657_s15]]   ;;  %s9661_s15 = smov 23  }
  0x19   :  { %s9788_s8 = sld [smem:[%s10770_s0 + %s9659_s28]]   ;;  %s9663_s28 = smov 25  }
  0x1a   :  { %10790 = sst [smem:[#allocation9_spill]] %s9763_s27 }
  0x1b   :  { %s9783_s27 = sld [smem:[%s10770_s0 + %s9658_s22]]   ;;  %s9662_s22 = smov 24  }
  0x1c   :  { %s9798_s29 = sld [smem:[%s10770_s0 + %s9661_s15]]   ;;  %s9665_s15 = smov 27  }
  0x1d   :  { %10791 = sst [smem:[#allocation10_spill]] %s9773_s17 }
  0x1e   :  { %s9793_s17 = sld [smem:[%s10770_s0 + %s9660_s7]]   ;;  %s9664_s7 = smov 26  }
  0x1f   :  { %10793 = sst [smem:[#allocation12_spill]] %s9788_s8 }
  0x20   :  { %s9808_s8 = sld [smem:[%s10770_s0 + %s9663_s28]]   ;;  %s9667_s28 = smov 29  }
  0x21   :  { %10792 = sst [smem:[#allocation11_spill]] %s9783_s27 }
  0x22   :  { %10795 = sst [smem:[#allocation14_spill]] %s9798_s29 }
  0x23   :  { %s9803_s27 = sld [smem:[%s10770_s0 + %s9662_s22]]   ;;  %s9666_s22 = smov 28  }
  0x24   :  { %10794 = sst [smem:[#allocation13_spill]] %s9793_s17 }
  0x25   :  { %s9813_s17 = sld [smem:[%s10770_s0 + %s9664_s7]]   ;;  %s9668_s7 = smov 30  }
  0x26   :  { %10797 = sst [smem:[#allocation16_spill]] %s9808_s8 }
  0x27   :  { %s9818_s29 = sld [smem:[%s10770_s0 + %s9665_s15]]   ;;  %s9669_s15 = smov 31  }
  0x28   :  { %s9828_s8 = sld [smem:[%s10770_s0 + %s9667_s28]]  }
  0x29   :  { %10796 = sst [smem:[#allocation15_spill]] %s9803_s27 }
  0x2a   :  { %s9823_s27 = sld [smem:[%s10770_s0 + %s9666_s22]]   ;;  %s9670_s22 = smov 32  }
  0x2b   :  { %10798 = sst [smem:[#allocation17_spill]] %s9813_s17 }
  0x2c   :  { %s9833_s17 = sld [smem:[%s10770_s0 + %s9668_s7]]  }
  0x2d   :  { %10799 = sst [smem:[#allocation18_spill]] %s9818_s29 }
  0x2e   :  { %s9838_s29 = sld [smem:[%s10770_s0 + %s9669_s15]]  }
  0x30   :  { %10800 = sst [smem:[#allocation19_spill]] %s9823_s27 }
  0x31   :  { %s9843_s27 = sld [smem:[%s10770_s0 + %s9670_s22]]  }
  0x32   :  { %70 = vsyncpa [#allocation3], 0  ;;  %s77_s28 = sshll.u32 %s9683_s5, 4  ;;  %s78_s28 = int_to_ptr.vmem [resolvable:$true] %s77_s28 }
  0x33   :  { %s9625_s1 = scalar_lea.vmem %s78_s28, 16  ;;  %p9630_p1 = scmp.lt.s32.totalorder %s78_s28, %s78_s28 }
  0x34   :  { %p9626_p0 = scmp.ne.s32.totalorder %s78_s28, %s9625_s1  ;;  %p9631_p2 = scmp.lt.s32.totalorder %s9625_s1, %s9625_s1 }
  0x36   :  { %p9632_p3 = por %p9631_p2, %p9630_p1 }
  0x38   :  { %p9633_p4 = pnand %p9632_p3, %p9626_p0 }
  0x3a   :  { %9636 = shalt.err (!%p9633_p4)
}
  0x3b   :  { %s9671_s2 = smov [#allocation2]  }
  0x3c   :  { %80 = dma.vmem_to_smem %s78_s28, 16, %s9671_s2, [#allocation3]  }
  0x3d   :  { %9637 = dma.done.wait [#allocation3], 16  }
  0x3e   :  { %9638 = vsyncadd [#allocation3], 4294967280 }
  0x3f   :  { %146 = sfence }
  0x40   :  { %v160_v0 = vld [vmem:[%s9708_s25 + $0x10] sm:$0xff]  ;;  %v158_v1 = vld [vmem:[%s9708_s25] sm:$0xff]  ;;  %vm239_vm0 = vcmask 1043456   ;;  %v9672_v3 = vmov 0   ;;  %v161_v5 = vld [vmem:[%s9708_s25 + $0x18] sm:$0xff]  ;;  %vm226_vm1 = vcmask 64512  }
  0x41   :  { %v148_v2 = vld [vmem:[%s9688_s9] sm:$0xff]  ;;  %9598 = vset.pattern.permute.xlu1 %v9672_v3  ;;  %9597 = vset.pattern.permute.xlu0 %v9672_v3  ;;  %v159_v8 = vld [vmem:[%s9708_s25 + $0x8] sm:$0xff]  ;;  %v9601_v10 = vld [vmem:[%s9703_s21 + $0x10] sm:$0xff]   ;;  %s10801_s0 = sld [smem:[#allocation12_spill]]  ;;  %s10802_s5 = sld [smem:[#allocation13_spill]]  ;;  %vm1300_vm2 = vcmask 261120  }
  0x42   :  { %v157_v4 = vpack.c.bf16 %v148_v2, %v148_v2  ;;  %178 = vperm.xlu1 %9598, %v160_v0   ;;  %168 = vperm.xlu0 %9597, %v158_v1   ;;  %v9599_v6 = vld [vmem:[%s9703_s21] sm:$0xff]   ;;  %v9600_v9 = vld [vmem:[%s9703_s21 + $0x8] sm:$0xff]   ;;  %v165_v13 = vld [vmem:[%s9708_s25 + $0x38] sm:$0xff]  ;;  %s10803_s9 = sld [smem:[#allocation14_spill]]  ;;  %s5621_s10 = sld [smem:[#allocation2 + $0xc]]  ;;  %vm9674_vm3 = vmmov 0  }
  0x43   :  { %6574 = vmatprep.mubr.msk.bf16.mxu1 %vm226_vm1, %v9599_v6  ;;  %v163_v11 = vld [vmem:[%s9708_s25 + $0x28] sm:$0xff]  ;;  %v162_v12 = vld [vmem:[%s9708_s25 + $0x20] sm:$0xff]  ;;  %v164_v14 = vld [vmem:[%s9708_s25 + $0x30] sm:$0xff]  ;;  %s10805_s25 = sld [smem:[#allocation17_spill]]  ;;  %s5599_s7 = sld [smem:[#allocation2 + $0xa]]  ;;  %vm5543_vm4 = vcmask 11264  }
  0x44   :  { %9560 = vmatprep.subr.msk.bf16.mxu1 %vm239_vm0, %v157_v4  ;;  %v241_v7 = vsel %vm239_vm0, %v157_v4, 0  ;;  %v9602_v15 = vld [vmem:[%s9703_s21 + $0x18] sm:$0xff]   ;;  %v309_v16 = vld [vmem:[%s9718_s3 + $0x8] sm:$0xff]  ;;  %v308_v17 = vld [vmem:[%s9718_s3] sm:$0xff]  ;;  %s10804_s21 = sld [smem:[#allocation16_spill]]  ;;  %s5604_s11 = sld [smem:[#allocation2 + $0xb]] }
  0x45   :  { %6573 = vmatpush3.bf16.msra.mxu1 %v241_v7  ;;  %v311_v18 = vld [vmem:[%s9718_s3 + $0x18] sm:$0xff]  ;;  %v310_v19 = vld [vmem:[%s9718_s3 + $0x10] sm:$0xff]  ;;  %v2436_v20 = vld [vmem:[%s9728_s14 + $0x8] sm:$0xff]  ;;  %s10806_s3 = sld [smem:[#allocation18_spill]]  ;;  %s5622_s15 = sld [smem:[#allocation2 + $0xd]] }
  0x46   :  { %183 = vperm.xlu1 %9598, %v161_v5   ;;  %173 = vperm.xlu0 %9597, %v159_v8   ;;  %v2435_v21 = vld [vmem:[%s9728_s14] sm:$0xff]  ;;  %v2525_v22 = vld [vmem:[%s9733_s19 + $0x8] sm:$0xff]  ;;  %v2438_v24 = vld [vmem:[%s9728_s14 + $0x18] sm:$0xff]  ;;  %s5623_s16 = sld [smem:[#allocation2 + $0xe]]  ;;  %s5624_s18 = sld [smem:[#allocation2 + $0xf]] }
  0x47   :  { %v2524_v23 = vld [vmem:[%s9733_s19] sm:$0xff]  ;;  %v2437_v25 = vld [vmem:[%s9728_s14 + $0x10] sm:$0xff]  ;;  %v2553_v26 = vld [vmem:[%s9738_s24 + $0x8] sm:$0xff]  ;;  %s5591_s14 = sld [smem:[#allocation2 + $0x2]]  ;;  %s5625_s22 = sld [smem:[#allocation2 + $0x10]] }
  0x48   :  { %6575 = vmatmul.mubr.msk.bf16.vlgmr.msra.gmra.mrb[0].mxu1 %vm226_vm1, %v9600_v9  ;;  %v2552_v27 = vld [vmem:[%s9738_s24] sm:$0xff]  ;;  %v2527_v28 = vld [vmem:[%s9733_s19 + $0x18] sm:$0xff]  ;;  %v2526_v29 = vld [vmem:[%s9733_s19 + $0x10] sm:$0xff]  ;;  %s5592_s19 = sld [smem:[#allocation2 + $0x3]]  ;;  %s5626_s23 = sld [smem:[#allocation2 + $0x11]] }
  0x49   :  { %6578 = vmatprep.mubr.msk.bf16.mxu1 %vm226_vm1, %v9601_v10  ;;  %v2555_v30 = vld [vmem:[%s9738_s24 + $0x18] sm:$0xff]  ;;  %v2554_v31 = vld [vmem:[%s9738_s24 + $0x10] sm:$0xff]  ;;  %v2591_v32 = vld [vmem:[%s9748_s6 + $0x8] sm:$0xff]  ;;  %s5593_s24 = sld [smem:[#allocation2 + $0x4]]  ;;  %s5627_s26 = sld [smem:[#allocation2 + $0x12]] }
  0x4a   :  { %193 = vperm.xlu1 %9598, %v163_v11   ;;  %188 = vperm.xlu0 %9597, %v162_v12   ;;  %v2590_v33 = vld [vmem:[%s9748_s6] sm:$0xff]  ;;  %v2680_v34 = vld [vmem:[%s9753_s12 + $0x8] sm:$0xff]  ;;  %v2593_v36 = vld [vmem:[%s9748_s6 + $0x18] sm:$0xff]  ;;  %s5628_s28 = sld [smem:[#allocation2 + $0x13]]  ;;  %s5629_s1 = sld [smem:[#allocation2 + $0x14]] }
  0x4b   :  { %v2679_v35 = vld [vmem:[%s9753_s12] sm:$0xff]  ;;  %v2592_v37 = vld [vmem:[%s9748_s6 + $0x10] sm:$0xff]  ;;  %v2708_v38 = vld [vmem:[%s9758_s20 + $0x8] sm:$0xff]  ;;  %s5595_s6 = sld [smem:[#allocation2 + $0x6]]  ;;  %s5630_s2 = sld [smem:[#allocation2 + $0x15]] }
  0x4c   :  { %v2707_v39 = vld [vmem:[%s9758_s20] sm:$0xff]  ;;  %v319_v41 = vld [vmem:[%s9693_s13 + $0x8] sm:$0xff]  ;;  %v2682_v43 = vld [vmem:[%s9753_s12 + $0x18] sm:$0xff] }
  0x4d   :  { %v318_v40 = vld [vmem:[%s9693_s13] sm:$0xff]  ;;  %v2681_v44 = vld [vmem:[%s9753_s12 + $0x10] sm:$0xff]  ;;  %v321_v46 = vld [vmem:[%s9693_s13 + $0x18] sm:$0xff]  ;;  %s5596_s12 = sld [smem:[#allocation2 + $0x7]] }
  0x4e   :  { %203 = vperm.xlu1 %9598, %v165_v13   ;;  %198 = vperm.xlu0 %9597, %v164_v14   ;;  %v9889_v42 = vpack.c.bf16 %v319_v41, %v318_v40  ;;  %v320_v45 = vld [vmem:[%s9693_s13 + $0x10] sm:$0xff]  ;;  %v2710_v48 = vld [vmem:[%s9758_s20 + $0x18] sm:$0xff]  ;;  %v322_v50 = vld [vmem:[%s9693_s13 + $0x20] sm:$0xff] }
  0x4f   :  { %v9899_v47 = vpack.c.bf16 %v321_v46, %v320_v45  ;;  %v2709_v49 = vld [vmem:[%s9758_s20 + $0x10] sm:$0xff]  ;;  %v323_v51 = vld [vmem:[%s9693_s13 + $0x28] sm:$0xff]  ;;  %v2749_v54 = vld [vmem:[%s9768_s4] sm:$0xff]  ;;  %s5597_s20 = sld [smem:[#allocation2 + $0x8]] }
  0x50   :  { %6579 = vmatmul.mubr.msk.bf16.gmra.mrb[4].mxu1 %vm226_vm1, %v9602_v15  ;;  %8233 = vmatprep.subr.bf16.mxu1 %v9889_v42  ;;  %v9909_v52 = vpack.c.bf16 %v323_v51, %v322_v50  ;;  %v2750_v53 = vld [vmem:[%s9768_s4 + $0x8] sm:$0xff]  ;;  %v324_v55 = vld [vmem:[%s9693_s13 + $0x30] sm:$0xff]  ;;  %v325_v56 = vld [vmem:[%s9693_s13 + $0x38] sm:$0xff] }
  0x51   :  { %8265 = vmatprep.subr.bf16.mxu0 %v9889_v42  ;;  %8235 = vmatpush3.bf16.msra.mxu1 %v9889_v42  ;;  %v9919_v57 = vpack.c.bf16 %v325_v56, %v324_v55  ;;  %v2752_v58 = vld [vmem:[%s9768_s4 + $0x18] sm:$0xff]  ;;  %v2751_v59 = vld [vmem:[%s9768_s4 + $0x10] sm:$0xff]  ;;  %v326_v60 = vld [vmem:[%s9693_s13 + $0x40] sm:$0xff] }
  0x52   :  { %1363 = vperm.xlu1 %9598, %v309_v16   ;;  %1358 = vperm.xlu0 %9597, %v308_v17   ;;  %v327_v61 = vld [vmem:[%s9693_s13 + $0x48] sm:$0xff]  ;;  %v2753_v0 = vld [vmem:[%s9768_s4 + $0x20] sm:$0xff]  ;;  %v328_v1 = vld [vmem:[%s9693_s13 + $0x50] sm:$0xff] }
  0x53   :  { %8267 = vmatpush3.bf16.msra.mxu0 %v9889_v42  ;;  %8237 = vmatprep.subr.bf16.mxu1 %v9899_v47  ;;  %v9929_v62 = vpack.c.bf16 %v327_v61, %v326_v60  ;;  %v2754_v63 = vld [vmem:[%s9768_s4 + $0x28] sm:$0xff]  ;;  %v329_v2 = vld [vmem:[%s9693_s13 + $0x58] sm:$0xff]  ;;  %v2755_v5 = vld [vmem:[%s9768_s4 + $0x30] sm:$0xff] }
  0x54   :  { %8269 = vmatprep.subr.bf16.mxu0 %v9899_v47  ;;  %v9939_v3 = vpack.c.bf16 %v329_v2, %v328_v1  ;;  %v2756_v4 = vld [vmem:[%s9768_s4 + $0x38] sm:$0xff]  ;;  %v330_v6 = vld [vmem:[%s9693_s13 + $0x60] sm:$0xff]  ;;  %v331_v7 = vld [vmem:[%s9693_s13 + $0x68] sm:$0xff]  ;;  %s5598_s4 = sld [smem:[#allocation2 + $0x9]] }
  0x55   :  { %8239 = vmatpush3.bf16.msra.mxu1 %v9899_v47  ;;  %v9949_v8 = vpack.c.bf16 %v331_v7, %v330_v6  ;;  %v2895_v9 = vld [vmem:[%s9778_s30 + $0x8] sm:$0xff]  ;;  %v2894_v10 = vld [vmem:[%s9778_s30] sm:$0xff]  ;;  %v332_v11 = vld [vmem:[%s9693_s13 + $0x70] sm:$0xff] }
  0x56   :  { %1373 = vperm.xlu1 %9598, %v311_v18   ;;  %1368 = vperm.xlu0 %9597, %v310_v19   ;;  %v333_v12 = vld [vmem:[%s9693_s13 + $0x78] sm:$0xff]  ;;  %v2896_v15 = vld [vmem:[%s9778_s30 + $0x10] sm:$0xff]  ;;  %v4988_v16 = vld [vmem:[%s10801_s0 + $0x8] sm:$0xff] }
  0x57   :  { %8271 = vmatpush3.bf16.msra.mxu0 %v9899_v47  ;;  %8241 = vmatprep.subr.bf16.mxu1 %v9909_v52  ;;  %v9959_v13 = vpack.c.bf16 %v333_v12, %v332_v11  ;;  %v2897_v14 = vld [vmem:[%s9778_s30 + $0x18] sm:$0xff]  ;;  %v4987_v17 = vld [vmem:[%s10801_s0] sm:$0xff]  ;;  %v5077_v18 = vld [vmem:[%s10802_s5 + $0x8] sm:$0xff]  ;;  %s5594_s30 = sld [smem:[#allocation2 + $0x5]] }
  0x58   :  { %8273 = vmatprep.subr.bf16.mxu0 %v9909_v52  ;;  %v5076_v19 = vld [vmem:[%s10802_s5] sm:$0xff]  ;;  %v5399_v40 = vld [vmem:[%s9828_s8 + $0x8] sm:$0xff] }
  0x59   :  { %8243 = vmatpush3.bf16.msra.mxu1 %v9909_v52  ;;  %v5398_v41 = vld [vmem:[%s9828_s8] sm:$0xff] }
  0x5a   :  { %2446 = vperm.xlu1 %9598, %v2436_v20   ;;  %2441 = vperm.xlu0 %9597, %v2435_v21   ;;  %v4990_v20 = vld [vmem:[%s10801_s0 + $0x18] sm:$0xff]  ;;  %v4989_v21 = vld [vmem:[%s10801_s0 + $0x10] sm:$0xff]  ;;  %v5494_v45 = vld [vmem:[%s9838_s29] sm:$0xf]  ;;  %s5590_s29 = sld [smem:[#allocation2 + $0x1]]  ;;  %s10808_s0 = sld [smem:[#allocation7_spill]] }
  0x5b   :  { %8275 = vmatpush3.bf16.msra.mxu0 %v9909_v52  ;;  %8245 = vmatprep.subr.bf16.mxu1 %v9919_v57 }
  0x5c   :  { %8277 = vmatprep.subr.bf16.mxu0 %v9919_v57 }
  0x5d   :  { %8247 = vmatpush3.bf16.msra.mxu1 %v9919_v57 }
  0x5e   :  { %2535 = vperm.xlu1 %9598, %v2525_v22   ;;  %2530 = vperm.xlu0 %9597, %v2524_v23   ;;  %v5105_v22 = vld [vmem:[%s10803_s9 + $0x8] sm:$0xff]  ;;  %v5104_v23 = vld [vmem:[%s10803_s9] sm:$0xff] }
  0x5f   :  { %8279 = vmatpush3.bf16.msra.mxu0 %v9919_v57  ;;  %8249 = vmatprep.subr.bf16.mxu1 %v9929_v62 }
  0x60   :  { %8281 = vmatprep.subr.bf16.mxu0 %v9929_v62  ;;  %v420_v2 = vstv %s5590_s29  ;;  %s5658_s29 = sld [smem:[#allocation2 + $0x19]] }
  0x61   :  { %8251 = vmatpush3.bf16.msra.mxu1 %v9929_v62 }
  0x62   :  { %2456 = vperm.xlu1 %9598, %v2438_v24   ;;  %2451 = vperm.xlu0 %9597, %v2437_v25   ;;  %v5079_v24 = vld [vmem:[%s10802_s5 + $0x18] sm:$0xff]  ;;  %v5078_v25 = vld [vmem:[%s10802_s5 + $0x10] sm:$0xff]  ;;  %s10809_s5 = sld [smem:[#allocation8_spill]] }
  0x63   :  { %8283 = vmatpush3.bf16.msra.mxu0 %v9929_v62  ;;  %8253 = vmatprep.subr.bf16.mxu1 %v9939_v3 }
  0x64   :  { %8285 = vmatprep.subr.bf16.mxu0 %v9939_v3 }
  0x65   :  { %8255 = vmatpush3.bf16.msra.mxu1 %v9939_v3 }
  0x66   :  { %2563 = vperm.xlu1 %9598, %v2553_v26   ;;  %2558 = vperm.xlu0 %9597, %v2552_v27   ;;  %v5107_v26 = vld [vmem:[%s10803_s9 + $0x18] sm:$0xff]  ;;  %v5106_v27 = vld [vmem:[%s10803_s9 + $0x10] sm:$0xff]  ;;  %s10810_s9 = sld [smem:[#allocation9_spill]] }
  0x67   :  { %8287 = vmatpush3.bf16.msra.mxu0 %v9939_v3  ;;  %8257 = vmatprep.subr.bf16.mxu1 %v9949_v8 }
  0x68   :  { %8289 = vmatprep.subr.bf16.mxu0 %v9949_v8 }
  0x69   :  { %8259 = vmatpush3.bf16.msra.mxu1 %v9949_v8 }
  0x6a   :  { %2545 = vperm.xlu1 %9598, %v2527_v28   ;;  %2540 = vperm.xlu0 %9597, %v2526_v29   ;;  %v5143_v28 = vld [vmem:[%s10804_s21 + $0x8] sm:$0xff]  ;;  %v5142_v29 = vld [vmem:[%s10804_s21] sm:$0xff] }
  0x6b   :  { %8291 = vmatpush3.bf16.msra.mxu0 %v9949_v8  ;;  %8261 = vmatprep.subr.bf16.mxu1 %v9959_v13 }
  0x6c   :  { %8293 = vmatprep.subr.bf16.mxu0 %v9959_v13 }
  0x6d   :  { %8263 = vmatpush3.bf16.msra.mxu1 %v9959_v13 }
  0x6e   :  { %2573 = vperm.xlu1 %9598, %v2555_v30   ;;  %2568 = vperm.xlu0 %9597, %v2554_v31   ;;  %v5232_v30 = vld [vmem:[%s10805_s25 + $0x8] sm:$0xff]  ;;  %v5231_v31 = vld [vmem:[%s10805_s25] sm:$0xff] }
  0x6f   :  { %8295 = vmatpush3.bf16.msra.mxu0 %v9959_v13  ;;  %8297 = vmatprep.subr.bf16.mxu1 %v9889_v42 }
  0x70   :  { %8329 = vmatprep.subr.bf16.mxu0 %v9889_v42 }
  0x72   :  { %2601 = vperm.xlu1 %9598, %v2591_v32   ;;  %2596 = vperm.xlu0 %9597, %v2590_v33   ;;  %v5259_v32 = vld [vmem:[%s10806_s3] sm:$0xff]  ;;  %v5144_v33 = vld [vmem:[%s10804_s21 + $0x10] sm:$0xff] }
  0x76   :  { %2690 = vperm.xlu1 %9598, %v2680_v34   ;;  %2685 = vperm.xlu0 %9597, %v2679_v35   ;;  %v5260_v34 = vld [vmem:[%s10806_s3 + $0x8] sm:$0xff]  ;;  %v5145_v35 = vld [vmem:[%s10804_s21 + $0x18] sm:$0xff]  ;;  %s5656_s21 = sld [smem:[#allocation2 + $0x17]] }
  0x7a   :  { %2611 = vperm.xlu1 %9598, %v2593_v36   ;;  %2606 = vperm.xlu0 %9597, %v2592_v37   ;;  %v5234_v36 = vld [vmem:[%s10805_s25 + $0x18] sm:$0xff]  ;;  %v5233_v37 = vld [vmem:[%s10805_s25 + $0x10] sm:$0xff]  ;;  %s5655_s25 = sld [smem:[#allocation2 + $0x16]] }
  0x7e   :  { %2718 = vperm.xlu1 %9598, %v2708_v38   ;;  %2713 = vperm.xlu0 %9597, %v2707_v39   ;;  %v5262_v38 = vld [vmem:[%s10806_s3 + $0x18] sm:$0xff]  ;;  %v5261_v39 = vld [vmem:[%s10806_s3 + $0x10] sm:$0xff]  ;;  %s5657_s3 = sld [smem:[#allocation2 + $0x18]] }
  0x82   :  { %2700 = vperm.xlu1 %9598, %v2682_v43   ;;  %2695 = vperm.xlu0 %9597, %v2681_v44   ;;  %v5401_v43 = vld [vmem:[%s9828_s8 + $0x18] sm:$0xff]  ;;  %v5400_v44 = vld [vmem:[%s9828_s8 + $0x10] sm:$0xff]  ;;  %s312_s8 = sld [smem:[#allocation2]] }
  0x86   :  { %2728 = vperm.xlu1 %9598, %v2710_v48   ;;  %2723 = vperm.xlu0 %9597, %v2709_v49  }
  0x8a   :  { %2764 = vperm.xlu1 %9598, %v2750_v53   ;;  %2759 = vperm.xlu0 %9597, %v2749_v54  }
  0x8e   :  { %2774 = vperm.xlu1 %9598, %v2752_v58   ;;  %2769 = vperm.xlu0 %9597, %v2751_v59  }
  0x92   :  { %2784 = vperm.xlu1 %9598, %v2754_v63   ;;  %2779 = vperm.xlu0 %9597, %v2753_v0  }
  0x96   :  { %2794 = vperm.xlu1 %9598, %v2756_v4   ;;  %2789 = vperm.xlu0 %9597, %v2755_v5   ;;  %v313_v4 = vstv %s312_s8  ;;  %s5659_s8 = sld [smem:[#allocation2 + $0x1a]] }
  0x9a   :  { %3932 = vperm.xlu1 %9598, %v2895_v9   ;;  %3927 = vperm.xlu0 %9597, %v2894_v10  }
  0x9e   :  { %3942 = vperm.xlu1 %9598, %v2897_v14   ;;  %3937 = vperm.xlu0 %9597, %v2896_v15  }
  0xa2   :  { %4998 = vperm.xlu1 %9598, %v4988_v16   ;;  %4993 = vperm.xlu0 %9597, %v4987_v17  }
  0xa6   :  { %5087 = vperm.xlu1 %9598, %v5077_v18   ;;  %5082 = vperm.xlu0 %9597, %v5076_v19  }
  0xaa   :  { %5008 = vperm.xlu1 %9598, %v4990_v20   ;;  %5003 = vperm.xlu0 %9597, %v4989_v21  }
  0xae   :  { %5115 = vperm.xlu1 %9598, %v5105_v22   ;;  %5110 = vperm.xlu0 %9597, %v5104_v23   ;;  %v515_v23 = vstv %s5591_s14  ;;  %s5660_s14 = sld [smem:[#allocation2 + $0x1b]] }
  0xb2   :  { %5097 = vperm.xlu1 %9598, %v5079_v24   ;;  %5092 = vperm.xlu0 %9597, %v5078_v25  }
  0xb6   :  { %5125 = vperm.xlu1 %9598, %v5107_v26   ;;  %5120 = vperm.xlu0 %9597, %v5106_v27  }
  0xba   :  { %5153 = vperm.xlu1 %9598, %v5143_v28   ;;  %5148 = vperm.xlu0 %9597, %v5142_v29  }
  0xbe   :  { %5242 = vperm.xlu1 %9598, %v5232_v30   ;;  %5237 = vperm.xlu0 %9597, %v5231_v31  }
  0xc1   :  { %v169_v46 = vpop.permute.xlu0 %168  ;;  %v179_v50 = vpop.permute.xlu1 %178 }
  0xc2   :  { %5265 = vperm.xlu1 %9598, %v5259_v32   ;;  %5158 = vperm.xlu0 %9597, %v5144_v33  }
  0xc5   :  { %v174_v54 = vpop.permute.xlu0 %173  ;;  %v184_v59 = vpop.permute.xlu1 %183 }
  0xc6   :  { %5270 = vperm.xlu1 %9598, %v5260_v34   ;;  %5163 = vperm.xlu0 %9597, %v5145_v35  }
  0xca   :  { %5252 = vperm.xlu1 %9598, %v5234_v36   ;;  %5247 = vperm.xlu0 %9597, %v5233_v37   ;;  %v610_v36 = vstv %s5592_s19  ;;  %s5661_s19 = sld [smem:[#allocation2 + $0x1c]] }
  0xce   :  { %5280 = vperm.xlu1 %9598, %v5262_v38   ;;  %5275 = vperm.xlu0 %9597, %v5261_v39  }
  0xd2   :  { %5409 = vperm.xlu1 %9598, %v5399_v40   ;;  %5404 = vperm.xlu0 %9597, %v5398_v41  }
  0xd6   :  { %5419 = vperm.xlu1 %9598, %v5401_v43   ;;  %5414 = vperm.xlu0 %9597, %v5400_v44  }
  0xda   :  { %5497 = vperm.xlu0 %9597, %v5494_v45  }
 0x11b   :  { %v6576_v48 = vpop.f32.mrb[0].mxu1 }
 0x11c   :  { %v277_v49 = vpop.f32.mrb[1].mxu1  ;;  %v286_v58 = vadd.f32 %v6576_v48, %v179_v50 }
 0x11d   :  { %v278_v51 = vadd.f32 %v277_v49, %v169_v46  ;;  %v6577_v53 = vpop.f32.mrb[2].mxu1 }
 0x11e   :  { %v280_v55 = vpop.f32.mrb[3].mxu1  ;;  %v289_v61 = vadd.f32 %v6577_v53, %v184_v59  ;;  %v316_v19 = vmul.f32 %v313_v4, %v286_v58 }
 0x11f   :  { %6614 = vmatprep.mubr.f32.mxu1 %v278_v51  ;;  %v281_v56 = vadd.f32 %v280_v55, %v174_v54  ;;  %v314_v10 = vmul.f32 %v313_v4, %v278_v51  ;;  %v705_v51 = vstv %s5593_s24  ;;  %s5662_s24 = sld [smem:[#allocation2 + $0x1d]] }
 0x120   :  { %v317_v16 = vmul.f32 %v313_v4, %v289_v61 }
 0x121   :  { %6615 = vmatmul.mubr.f32.vlgmr.msra.gmra.mrb[8].mxu1 %v281_v56  ;;  %v315_v6 = vmul.f32 %v313_v4, %v281_v56 }
 0x122   :  { %6617 = vmatprep.mubr.f32.mxu1 %v286_v58  ;;  %8299 = vmatpush3.bf16.msra.mxu1 %v9889_v42 }
 0x123   :  { %v9998_v60 = vpop.f32.mrb[4].mxu1  ;;  %8301 = vmatprep.subr.bf16.mxu1 %v9899_v47 }
 0x124   :  { %v10001_v63 = vpop.f32.mrb[5].mxu1 }
 0x125   :  { %v10004_v0 = vpop.f32.mrb[6].mxu1  ;;  %6618 = vmatmul.mubr.f32.gmra.mrb[10].mxu1 %v289_v61 }
 0x126   :  { %v10006_v1 = vpop.f32.mrb[7].mxu1  ;;  %8303 = vmatpush3.bf16.msra.mxu1 %v9899_v47 }
 0x127   :  { %8305 = vmatprep.subr.bf16.mxu1 %v9909_v52 }
 0x12a   :  { %8307 = vmatpush3.bf16.msra.mxu1 %v9909_v52 }
 0x12b   :  { %8309 = vmatprep.subr.bf16.mxu1 %v9919_v57 }
 0x12e   :  { %8311 = vmatpush3.bf16.msra.mxu1 %v9919_v57 }
 0x12f   :  { %8313 = vmatprep.subr.bf16.mxu1 %v9929_v62 }
 0x132   :  { %8315 = vmatpush3.bf16.msra.mxu1 %v9929_v62 }
 0x133   :  { %8317 = vmatprep.subr.bf16.mxu1 %v9939_v3 }
 0x136   :  { %8319 = vmatpush3.bf16.msra.mxu1 %v9939_v3 }
 0x137   :  { %8321 = vmatprep.subr.bf16.mxu1 %v9949_v8 }
 0x13a   :  { %8323 = vmatpush3.bf16.msra.mxu1 %v9949_v8 }
 0x13b   :  { %8325 = vmatprep.subr.bf16.mxu1 %v9959_v13 }
 0x13e   :  { %8327 = vmatpush3.bf16.msra.mxu1 %v9959_v13 }
 0x13f   :  { %8361 = vmatprep.subr.bf16.mxu1 %v9889_v42 }
 0x1f4   :  { %v6616_v5 = vpop.f32.mrb[8].mxu1 }
 0x1f5   :  { %v422_v7 = vmul.f32 %v6616_v5, %v420_v2  ;;  %v400_v9 = vpop.f32.mrb[9].mxu1 }
 0x1f6   :  { %v421_v11 = vmul.f32 %v420_v2, %v400_v9  ;;  %6652 = vmatprep.mubr.f32.mxu0 %v400_v9  ;;  %v800_v9 = vstv %s5594_s30  ;;  %s5663_s30 = sld [smem:[#allocation2 + $0x1e]] }
 0x1f7   :  { %v426_v12 = vadd.f32 %v422_v7, %v315_v6  ;;  %6653 = vmatmul.mubr.f32.vlgmr.msra.gmra.mrb[0].mxu0 %v6616_v5 }
 0x1f8   :  { %v425_v14 = vadd.f32 %v421_v11, %v314_v10  ;;  %v6619_v15 = vpop.f32.mrb[10].mxu1  ;;  %8331 = vmatpush3.bf16.msra.mxu0 %v9889_v42 }
 0x1f9   :  { %v424_v17 = vmul.f32 %v6619_v15, %v420_v2  ;;  %v410_v18 = vpop.f32.mrb[11].mxu1  ;;  %8333 = vmatprep.subr.bf16.mxu0 %v9899_v47 }
 0x1fa   :  { %v423_v20 = vmul.f32 %v420_v2, %v410_v18  ;;  %6655 = vmatprep.mubr.f32.mxu0 %v410_v18 }
 0x1fb   :  { %v428_v21 = vadd.f32 %v424_v17, %v317_v16  ;;  %6656 = vmatmul.mubr.f32.gmra.mrb[2].mxu0 %v6619_v15 }
 0x1fc   :  { %v427_v22 = vadd.f32 %v423_v20, %v316_v19  ;;  %8335 = vmatpush3.bf16.msra.mxu0 %v9899_v47 }
 0x1fd   :  { %8337 = vmatprep.subr.bf16.mxu0 %v9909_v52 }
 0x200   :  { %8339 = vmatpush3.bf16.msra.mxu0 %v9909_v52 }
 0x201   :  { %8341 = vmatprep.subr.bf16.mxu0 %v9919_v57 }
 0x204   :  { %8343 = vmatpush3.bf16.msra.mxu0 %v9919_v57 }
 0x205   :  { %8345 = vmatprep.subr.bf16.mxu0 %v9929_v62 }
 0x208   :  { %8347 = vmatpush3.bf16.msra.mxu0 %v9929_v62 }
 0x209   :  { %8349 = vmatprep.subr.bf16.mxu0 %v9939_v3 }
 0x20c   :  { %8351 = vmatpush3.bf16.msra.mxu0 %v9939_v3 }
 0x20d   :  { %8353 = vmatprep.subr.bf16.mxu0 %v9949_v8 }
 0x210   :  { %8355 = vmatpush3.bf16.msra.mxu0 %v9949_v8 }
 0x211   :  { %8357 = vmatprep.subr.bf16.mxu0 %v9959_v13 }
 0x214   :  { %8359 = vmatpush3.bf16.msra.mxu0 %v9959_v13 }
 0x215   :  { %8393 = vmatprep.subr.bf16.mxu0 %v9889_v42 }
 0x2ca   :  { %v6654_v24 = vpop.f32.mrb[0].mxu0 }
 0x2cb   :  { %v517_v25 = vmul.f32 %v6654_v24, %v515_v23  ;;  %v495_v26 = vpop.f32.mrb[1].mxu0 }
 0x2cc   :  { %v516_v27 = vmul.f32 %v515_v23, %v495_v26  ;;  %6690 = vmatprep.mubr.f32.mxu1 %v495_v26 }
 0x2cd   :  { %v521_v28 = vadd.f32 %v517_v25, %v426_v12  ;;  %6691 = vmatmul.mubr.f32.vlgmr.msra.gmra.mrb[12].mxu1 %v6654_v24 }
 0x2ce   :  { %v520_v29 = vadd.f32 %v516_v27, %v425_v14  ;;  %v6657_v30 = vpop.f32.mrb[2].mxu0  ;;  %8363 = vmatpush3.bf16.msra.mxu1 %v9889_v42 }
 0x2cf   :  { %v519_v31 = vmul.f32 %v6657_v30, %v515_v23  ;;  %v505_v32 = vpop.f32.mrb[3].mxu0  ;;  %8365 = vmatprep.subr.bf16.mxu1 %v9899_v47 }
 0x2d0   :  { %v518_v33 = vmul.f32 %v515_v23, %v505_v32  ;;  %6693 = vmatprep.mubr.f32.mxu1 %v505_v32  ;;  %v895_v23 = vstv %s5595_s6  ;;  %s5664_s6 = sld [smem:[#allocation2 + $0x1f]] }
 0x2d1   :  { %v523_v34 = vadd.f32 %v519_v31, %v428_v21  ;;  %6694 = vmatmul.mubr.f32.gmra.mrb[14].mxu1 %v6657_v30 }
 0x2d2   :  { %v522_v35 = vadd.f32 %v518_v33, %v427_v22  ;;  %8367 = vmatpush3.bf16.msra.mxu1 %v9899_v47 }
 0x2d3   :  { %8369 = vmatprep.subr.bf16.mxu1 %v9909_v52 }
 0x2d6   :  { %8371 = vmatpush3.bf16.msra.mxu1 %v9909_v52 }
 0x2d7   :  { %8373 = vmatprep.subr.bf16.mxu1 %v9919_v57 }
 0x2da   :  { %8375 = vmatpush3.bf16.msra.mxu1 %v9919_v57 }
 0x2db   :  { %8377 = vmatprep.subr.bf16.mxu1 %v9929_v62 }
 0x2de   :  { %8379 = vmatpush3.bf16.msra.mxu1 %v9929_v62 }
 0x2df   :  { %8381 = vmatprep.subr.bf16.mxu1 %v9939_v3 }
 0x2e2   :  { %8383 = vmatpush3.bf16.msra.mxu1 %v9939_v3 }
 0x2e3   :  { %8385 = vmatprep.subr.bf16.mxu1 %v9949_v8 }
 0x2e6   :  { %8387 = vmatpush3.bf16.msra.mxu1 %v9949_v8 }
 0x2e7   :  { %8389 = vmatprep.subr.bf16.mxu1 %v9959_v13 }
 0x2ea   :  { %8391 = vmatpush3.bf16.msra.mxu1 %v9959_v13 }
 0x2eb   :  { %8425 = vmatprep.subr.bf16.mxu1 %v9889_v42 }
 0x3a0   :  { %v6692_v37 = vpop.f32.mrb[12].mxu1 }
 0x3a1   :  { %v612_v38 = vmul.f32 %v6692_v37, %v610_v36  ;;  %v590_v39 = vpop.f32.mrb[13].mxu1 }
 0x3a2   :  { %v611_v40 = vmul.f32 %v610_v36, %v590_v39  ;;  %6728 = vmatprep.mubr.f32.mxu0 %v590_v39 }
 0x3a3   :  { %v616_v41 = vadd.f32 %v612_v38, %v521_v28  ;;  %6729 = vmatmul.mubr.f32.vlgmr.msra.gmra.mrb[4].mxu0 %v6692_v37 }
 0x3a4   :  { %v615_v43 = vadd.f32 %v611_v40, %v520_v29  ;;  %v6695_v44 = vpop.f32.mrb[14].mxu1  ;;  %8395 = vmatpush3.bf16.msra.mxu0 %v9889_v42 }
 0x3a5   :  { %v614_v45 = vmul.f32 %v6695_v44, %v610_v36  ;;  %v600_v46 = vpop.f32.mrb[15].mxu1  ;;  %8397 = vmatprep.subr.bf16.mxu0 %v9899_v47 }
 0x3a6   :  { %v613_v48 = vmul.f32 %v610_v36, %v600_v46  ;;  %6731 = vmatprep.mubr.f32.mxu0 %v600_v46  ;;  %v990_v36 = vstv %s5596_s12  ;;  %s10811_s12 = sld [smem:[#allocation10_spill]] }
 0x3a7   :  { %v618_v49 = vadd.f32 %v614_v45, %v523_v34  ;;  %6732 = vmatmul.mubr.f32.gmra.mrb[6].mxu0 %v6695_v44 }
 0x3a8   :  { %v617_v50 = vadd.f32 %v613_v48, %v522_v35  ;;  %8399 = vmatpush3.bf16.msra.mxu0 %v9899_v47 }
 0x3a9   :  { %8401 = vmatprep.subr.bf16.mxu0 %v9909_v52 }
 0x3ac   :  { %8403 = vmatpush3.bf16.msra.mxu0 %v9909_v52 }
 0x3ad   :  { %8405 = vmatprep.subr.bf16.mxu0 %v9919_v57 }
 0x3b0   :  { %8407 = vmatpush3.bf16.msra.mxu0 %v9919_v57 }
 0x3b1   :  { %8409 = vmatprep.subr.bf16.mxu0 %v9929_v62 }
 0x3b4   :  { %8411 = vmatpush3.bf16.msra.mxu0 %v9929_v62 }
 0x3b5   :  { %8413 = vmatprep.subr.bf16.mxu0 %v9939_v3 }
 0x3b8   :  { %8415 = vmatpush3.bf16.msra.mxu0 %v9939_v3 }
 0x3b9   :  { %8417 = vmatprep.subr.bf16.mxu0 %v9949_v8 }
 0x3bc   :  { %8419 = vmatpush3.bf16.msra.mxu0 %v9949_v8 }
 0x3bd   :  { %8421 = vmatprep.subr.bf16.mxu0 %v9959_v13 }
 0x3c0   :  { %8423 = vmatpush3.bf16.msra.mxu0 %v9959_v13 }
 0x3c1   :  { %8457 = vmatprep.subr.bf16.mxu0 %v9889_v42 }
 0x476   :  { %v6730_v53 = vpop.f32.mrb[4].mxu0 }
 0x477   :  { %v707_v54 = vmul.f32 %v6730_v53, %v705_v51  ;;  %v685_v55 = vpop.f32.mrb[5].mxu0 }
 0x478   :  { %v706_v56 = vmul.f32 %v705_v51, %v685_v55  ;;  %6766 = vmatprep.mubr.f32.mxu1 %v685_v55 }
 0x479   :  { %v711_v58 = vadd.f32 %v707_v54, %v616_v41  ;;  %6767 = vmatmul.mubr.f32.vlgmr.msra.gmra.mrb[16].mxu1 %v6730_v53 }
 0x47a   :  { %v710_v59 = vadd.f32 %v706_v56, %v615_v43  ;;  %v6733_v61 = vpop.f32.mrb[6].mxu0  ;;  %8427 = vmatpush3.bf16.msra.mxu1 %v9889_v42 }
 0x47b   :  { %v709_v2 = vmul.f32 %v6733_v61, %v705_v51  ;;  %v695_v4 = vpop.f32.mrb[7].mxu0  ;;  %8429 = vmatprep.subr.bf16.mxu1 %v9899_v47 }
 0x47c   :  { %v708_v5 = vmul.f32 %v705_v51, %v695_v4  ;;  %6769 = vmatprep.mubr.f32.mxu1 %v695_v4  ;;  %v1085_v51 = vstv %s5597_s20  ;;  %s5665_s20 = sld [smem:[#allocation2 + $0x20]] }
 0x47d   :  { %v713_v6 = vadd.f32 %v709_v2, %v618_v49  ;;  %6770 = vmatmul.mubr.f32.gmra.mrb[18].mxu1 %v6733_v61 }
 0x47e   :  { %v712_v7 = vadd.f32 %v708_v5, %v617_v50  ;;  %8431 = vmatpush3.bf16.msra.mxu1 %v9899_v47 }
 0x47f   :  { %8433 = vmatprep.subr.bf16.mxu1 %v9909_v52 }
 0x482   :  { %8435 = vmatpush3.bf16.msra.mxu1 %v9909_v52 }
 0x483   :  { %8437 = vmatprep.subr.bf16.mxu1 %v9919_v57 }
 0x486   :  { %8439 = vmatpush3.bf16.msra.mxu1 %v9919_v57 }
 0x487   :  { %8441 = vmatprep.subr.bf16.mxu1 %v9929_v62 }
 0x48a   :  { %8443 = vmatpush3.bf16.msra.mxu1 %v9929_v62 }
 0x48b   :  { %8445 = vmatprep.subr.bf16.mxu1 %v9939_v3 }
 0x48e   :  { %8447 = vmatpush3.bf16.msra.mxu1 %v9939_v3 }
 0x48f   :  { %8449 = vmatprep.subr.bf16.mxu1 %v9949_v8 }
 0x492   :  { %8451 = vmatpush3.bf16.msra.mxu1 %v9949_v8 }
 0x493   :  { %8453 = vmatprep.subr.bf16.mxu1 %v9959_v13 }
 0x496   :  { %8455 = vmatpush3.bf16.msra.mxu1 %v9959_v13 }
 0x497   :  { %8489 = vmatprep.subr.bf16.mxu1 %v9889_v42 }
 0x54c   :  { %v6768_v10 = vpop.f32.mrb[16].mxu1 }
 0x54d   :  { %v802_v11 = vmul.f32 %v6768_v10, %v800_v9  ;;  %v780_v12 = vpop.f32.mrb[17].mxu1 }
 0x54e   :  { %v801_v14 = vmul.f32 %v800_v9, %v780_v12  ;;  %6804 = vmatprep.mubr.f32.mxu0 %v780_v12  ;;  %v1180_v12 = vstv %s5598_s4  ;;  %s5671_s4 = sld [smem:[#allocation2 + $0x22]] }
 0x54f   :  { %v806_v15 = vadd.f32 %v802_v11, %v711_v58  ;;  %6805 = vmatmul.mubr.f32.vlgmr.msra.gmra.mrb[8].mxu0 %v6768_v10  ;;  %v5606_v10 = vld [vmem:[%s9693_s13 + $0x88] sm:$0xff] }
 0x550   :  { %v805_v16 = vadd.f32 %v801_v14, %v710_v59  ;;  %v6771_v17 = vpop.f32.mrb[18].mxu1  ;;  %8459 = vmatpush3.bf16.msra.mxu0 %v9889_v42  ;;  %v5607_v14 = vld [vmem:[%s9693_s13 + $0x90] sm:$0xff] }
 0x551   :  { %v804_v18 = vmul.f32 %v6771_v17, %v800_v9  ;;  %v790_v19 = vpop.f32.mrb[19].mxu1  ;;  %8461 = vmatprep.subr.bf16.mxu0 %v9899_v47 }
 0x552   :  { %v803_v20 = vmul.f32 %v800_v9, %v790_v19  ;;  %6807 = vmatprep.mubr.f32.mxu0 %v790_v19  ;;  %v5605_v9 = vld [vmem:[%s9693_s13 + $0x80] sm:$0xff] }
 0x553   :  { %v808_v21 = vadd.f32 %v804_v18, %v713_v6  ;;  %6808 = vmatmul.mubr.f32.gmra.mrb[10].mxu0 %v6771_v17  ;;  %v10134_v11 = vpack.c.bf16 %v5606_v10, %v5605_v9 }
 0x554   :  { %v807_v22 = vadd.f32 %v803_v20, %v712_v7  ;;  %8463 = vmatpush3.bf16.msra.mxu0 %v9899_v47 }
 0x555   :  { %8465 = vmatprep.subr.bf16.mxu0 %v9909_v52 }
 0x558   :  { %8467 = vmatpush3.bf16.msra.mxu0 %v9909_v52 }
 0x559   :  { %8469 = vmatprep.subr.bf16.mxu0 %v9919_v57 }
 0x55c   :  { %8471 = vmatpush3.bf16.msra.mxu0 %v9919_v57 }
 0x55d   :  { %8473 = vmatprep.subr.bf16.mxu0 %v9929_v62 }
 0x560   :  { %8475 = vmatpush3.bf16.msra.mxu0 %v9929_v62 }
 0x561   :  { %8477 = vmatprep.subr.bf16.mxu0 %v9939_v3 }
 0x564   :  { %8479 = vmatpush3.bf16.msra.mxu0 %v9939_v3 }
 0x565   :  { %8481 = vmatprep.subr.bf16.mxu0 %v9949_v8 }
 0x568   :  { %8483 = vmatpush3.bf16.msra.mxu0 %v9949_v8 }
 0x569   :  { %8485 = vmatprep.subr.bf16.mxu0 %v9959_v13 }
 0x56c   :  { %8487 = vmatpush3.bf16.msra.mxu0 %v9959_v13 }
 0x56d   :  { %8521 = vmatprep.subr.bf16.mxu0 %v9889_v42 }
 0x622   :  { %v6806_v24 = vpop.f32.mrb[8].mxu0 }
 0x623   :  { %v897_v25 = vmul.f32 %v6806_v24, %v895_v23  ;;  %v875_v26 = vpop.f32.mrb[9].mxu0 }
 0x624   :  { %v896_v27 = vmul.f32 %v895_v23, %v875_v26  ;;  %6842 = vmatprep.mubr.f32.mxu1 %v875_v26  ;;  %v189_v26 = vpop.permute.xlu0 %188 }
 0x625   :  { %v901_v28 = vadd.f32 %v897_v25, %v806_v15  ;;  %6843 = vmatmul.mubr.f32.vlgmr.msra.gmra.mrb[20].mxu1 %v6806_v24  ;;  %v5608_v15 = vld [vmem:[%s9693_s13 + $0x98] sm:$0xff] }
 0x626   :  { %v900_v29 = vadd.f32 %v896_v27, %v805_v16  ;;  %v6809_v30 = vpop.f32.mrb[10].mxu0  ;;  %8491 = vmatpush3.bf16.msra.mxu1 %v9889_v42  ;;  %v10139_v19 = vpack.c.bf16 %v5608_v15, %v5607_v14 }
 0x627   :  { %v899_v31 = vmul.f32 %v6809_v30, %v895_v23  ;;  %v885_v32 = vpop.f32.mrb[11].mxu0  ;;  %8493 = vmatprep.subr.bf16.mxu1 %v9899_v47 }
 0x628   :  { %v898_v33 = vmul.f32 %v895_v23, %v885_v32  ;;  %6845 = vmatprep.mubr.f32.mxu1 %v885_v32  ;;  %v5611_v32 = vld [vmem:[%s9693_s13 + $0xb0] sm:$0xff] }
 0x629   :  { %v903_v34 = vadd.f32 %v899_v31, %v808_v21  ;;  %6846 = vmatmul.mubr.f32.gmra.mrb[22].mxu1 %v6809_v30  ;;  %v5609_v21 = vld [vmem:[%s9693_s13 + $0xa0] sm:$0xff]  ;;  %v10152_v30 = vadd.f32 %v10001_v63, %v189_v26  ;;  %v1584_v26 = vstv %s5622_s15  ;;  %s5675_s15 = sld [smem:[#allocation2 + $0x26]] }
 0x62a   :  { %v902_v35 = vadd.f32 %v898_v33, %v807_v22  ;;  %8495 = vmatpush3.bf16.msra.mxu1 %v9899_v47  ;;  %v5610_v22 = vld [vmem:[%s9693_s13 + $0xa8] sm:$0xff]  ;;  %v5612_v33 = vld [vmem:[%s9693_s13 + $0xb8] sm:$0xff] }
 0x62b   :  { %8497 = vmatprep.subr.bf16.mxu1 %v9909_v52  ;;  %v10163_v63 = vpack.c.bf16 %v5612_v33, %v5611_v32 }
 0x62e   :  { %8499 = vmatpush3.bf16.msra.mxu1 %v9909_v52 }
 0x62f   :  { %8501 = vmatprep.subr.bf16.mxu1 %v9919_v57 }
 0x632   :  { %8503 = vmatpush3.bf16.msra.mxu1 %v9919_v57 }
 0x633   :  { %8505 = vmatprep.subr.bf16.mxu1 %v9929_v62 }
 0x636   :  { %8507 = vmatpush3.bf16.msra.mxu1 %v9929_v62 }
 0x637   :  { %8509 = vmatprep.subr.bf16.mxu1 %v9939_v3 }
 0x63a   :  { %8511 = vmatpush3.bf16.msra.mxu1 %v9939_v3 }
 0x63b   :  { %8513 = vmatprep.subr.bf16.mxu1 %v9949_v8 }
 0x63e   :  { %8515 = vmatpush3.bf16.msra.mxu1 %v9949_v8 }
 0x63f   :  { %8517 = vmatprep.subr.bf16.mxu1 %v9959_v13 }
 0x642   :  { %8519 = vmatpush3.bf16.msra.mxu1 %v9959_v13 }
 0x6f8   :  { %v6844_v37 = vpop.f32.mrb[20].mxu1 }
 0x6f9   :  { %v992_v38 = vmul.f32 %v6844_v37, %v990_v36  ;;  %v970_v39 = vpop.f32.mrb[21].mxu1 }
 0x6fa   :  { %v991_v40 = vmul.f32 %v990_v36, %v970_v39  ;;  %6880 = vmatprep.mubr.f32.mxu0 %v970_v39  ;;  %v5615_v39 = vld [vmem:[%s9693_s13 + $0xd0] sm:$0xff] }
 0x6fb   :  { %v996_v41 = vadd.f32 %v992_v38, %v901_v28  ;;  %6881 = vmatmul.mubr.f32.vlgmr.msra.gmra.mrb[12].mxu0 %v6844_v37  ;;  %v5614_v37 = vld [vmem:[%s9693_s13 + $0xc8] sm:$0xff] }
 0x6fc   :  { %v995_v43 = vadd.f32 %v991_v40, %v900_v29  ;;  %v6847_v44 = vpop.f32.mrb[22].mxu1  ;;  %8523 = vmatpush3.bf16.msra.mxu0 %v9889_v42  ;;  %v10149_v29 = vpack.c.bf16 %v5610_v22, %v5609_v21  ;;  %v5616_v40 = vld [vmem:[%s9693_s13 + $0xd8] sm:$0xff]  ;;  %v1489_v22 = vstv %s5621_s10  ;;  %s5673_s10 = sld [smem:[#allocation2 + $0x24]] }
 0x6fd   :  { %v994_v45 = vmul.f32 %v6847_v44, %v990_v36  ;;  %v980_v46 = vpop.f32.mrb[23].mxu1  ;;  %8525 = vmatprep.subr.bf16.mxu0 %v9899_v47 }
 0x6fe   :  { %v993_v48 = vmul.f32 %v990_v36, %v980_v46  ;;  %6883 = vmatprep.mubr.f32.mxu0 %v980_v46  ;;  %v5613_v36 = vld [vmem:[%s9693_s13 + $0xc0] sm:$0xff]  ;;  %v5619_v46 = vld [vmem:[%s9693_s13 + $0xf0] sm:$0xff] }
 0x6ff   :  { %v998_v49 = vadd.f32 %v994_v45, %v903_v34  ;;  %6884 = vmatmul.mubr.f32.gmra.mrb[14].mxu0 %v6847_v44  ;;  %v10169_v38 = vpack.c.bf16 %v5614_v37, %v5613_v36  ;;  %v5618_v44 = vld [vmem:[%s9693_s13 + $0xe8] sm:$0xff] }
 0x700   :  { %v997_v50 = vadd.f32 %v993_v48, %v902_v35  ;;  %8527 = vmatpush3.bf16.msra.mxu0 %v9899_v47  ;;  %v5620_v48 = vld [vmem:[%s9693_s13 + $0xf8] sm:$0xff] }
 0x701   :  { %8529 = vmatprep.subr.bf16.mxu0 %v9909_v52 }
 0x704   :  { %8531 = vmatpush3.bf16.msra.mxu0 %v9909_v52 }
 0x705   :  { %8533 = vmatprep.subr.bf16.mxu0 %v9919_v57 }
 0x708   :  { %8535 = vmatpush3.bf16.msra.mxu0 %v9919_v57 }
 0x709   :  { %8537 = vmatprep.subr.bf16.mxu0 %v9929_v62 }
 0x70c   :  { %8539 = vmatpush3.bf16.msra.mxu0 %v9929_v62 }
 0x70d   :  { %8541 = vmatprep.subr.bf16.mxu0 %v9939_v3 }
 0x710   :  { %8543 = vmatpush3.bf16.msra.mxu0 %v9939_v3 }
 0x711   :  { %8545 = vmatprep.subr.bf16.mxu0 %v9949_v8 }
 0x714   :  { %8547 = vmatpush3.bf16.msra.mxu0 %v9949_v8 }
 0x715   :  { %8549 = vmatprep.subr.bf16.mxu0 %v9959_v13 }
 0x718   :  { %8551 = vmatpush3.bf16.msra.mxu0 %v9959_v13 }
 0x719   :  { %8553 = vmatprep.subr.bf16.mxu0 %v10134_v11 }
 0x7ce   :  { %v6882_v53 = vpop.f32.mrb[12].mxu0 }
 0x7cf   :  { %v1087_v54 = vmul.f32 %v6882_v53, %v1085_v51  ;;  %v1065_v55 = vpop.f32.mrb[13].mxu0 }
 0x7d0   :  { %v1086_v56 = vmul.f32 %v1085_v51, %v1065_v55  ;;  %6918 = vmatprep.mubr.f32.mxu1 %v1065_v55 }
 0x7d1   :  { %v1091_v58 = vadd.f32 %v1087_v54, %v996_v41  ;;  %6919 = vmatmul.mubr.f32.vlgmr.msra.gmra.mrb[24].mxu1 %v6882_v53  ;;  %v10175_v41 = vpack.c.bf16 %v5616_v40, %v5615_v39 }
 0x7d2   :  { %v1090_v59 = vadd.f32 %v1086_v56, %v995_v43  ;;  %v6885_v61 = vpop.f32.mrb[14].mxu0  ;;  %v5617_v43 = vld [vmem:[%s9693_s13 + $0xe0] sm:$0xff]  ;;  %s10807_s13 = sld [smem:[#allocation6_spill]] }
 0x7d3   :  { %v1089_v2 = vmul.f32 %v6885_v61, %v1085_v51  ;;  %v1075_v4 = vpop.f32.mrb[15].mxu0  ;;  %v10181_v45 = vpack.c.bf16 %v5618_v44, %v5617_v43 }
 0x7d4   :  { %v1088_v5 = vmul.f32 %v1085_v51, %v1075_v4  ;;  %6921 = vmatprep.mubr.f32.mxu1 %v1075_v4  ;;  %v199_v51 = vpop.permute.xlu0 %198 }
 0x7d5   :  { %v1093_v6 = vadd.f32 %v1089_v2, %v998_v49  ;;  %6922 = vmatmul.mubr.f32.gmra.mrb[26].mxu1 %v6885_v61  ;;  %v10187_v49 = vpack.c.bf16 %v5620_v48, %v5619_v46  ;;  %v10197_v54 = vadd.f32 %v9998_v60, %v199_v51 }
 0x7d6   :  { %v1092_v7 = vadd.f32 %v1088_v5, %v997_v50  ;;  %v194_v50 = vpop.permute.xlu1 %193 }
 0x7d7   :  { %v10193_v53 = vadd.f32 %v10006_v1, %v194_v50 }
 0x7d8   :  { %v9603_v60 = vld [vmem:[%s10807_s13] sm:$0xff]  }
 0x7d9   :  { %6966 = vmatprep.mubr.msk.bf16.mxu1 %vm1300_vm2, %v9603_v60 }
 0x7da   :  { %v204_v55 = vpop.permute.xlu1 %203 }
 0x7db   :  { %v10203_v56 = vadd.f32 %v10004_v0, %v204_v55  ;;  %v1275_v0 = vstv %s5599_s7  ;;  %s5672_s7 = sld [smem:[#allocation2 + $0x23]] }
 0x8a4   :  { %v6920_v16 = vpop.f32.mrb[24].mxu1 }
 0x8a5   :  { %v1182_v17 = vmul.f32 %v6920_v16, %v1180_v12  ;;  %v1160_v18 = vpop.f32.mrb[25].mxu1 }
 0x8a6   :  { %v1181_v20 = vmul.f32 %v1180_v12, %v1160_v18  ;;  %6956 = vmatprep.mubr.f32.mxu0 %v1160_v18 }
 0x8a7   :  { %v10143_v23 = vadd.f32 %v1182_v17, %v1091_v58  ;;  %6957 = vmatmul.mubr.f32.vlgmr.msra.gmra.mrb[16].mxu0 %v6920_v16  ;;  %v9604_v16 = vld [vmem:[%s10807_s13 + $0x8] sm:$0xff]  }
 0x8a8   :  { %v10145_v24 = vadd.f32 %v1181_v20, %v1090_v59  ;;  %8555 = vmatpush3.bf16.msra.mxu0 %v10134_v11  ;;  %v6923_v25 = vpop.f32.mrb[26].mxu1 }
 0x8a9   :  { %v1184_v27 = vmul.f32 %v6923_v25, %v1180_v12  ;;  %v1170_v28 = vpop.f32.mrb[27].mxu1  ;;  %8557 = vmatprep.subr.bf16.mxu0 %v10139_v19 }
 0x8aa   :  { %v1183_v31 = vmul.f32 %v1180_v12, %v1170_v28  ;;  %6959 = vmatprep.mubr.f32.mxu0 %v1170_v28 }
 0x8ab   :  { %v10156_v34 = vadd.f32 %v1184_v27, %v1093_v6  ;;  %6960 = vmatmul.mubr.f32.gmra.mrb[18].mxu0 %v6923_v25 }
 0x8ac   :  { %v10158_v35 = vadd.f32 %v1183_v31, %v1092_v7  ;;  %8559 = vmatpush3.bf16.msra.mxu0 %v10139_v19  ;;  %7002 = vmatprep.mubr.f32.mxu0 %v10152_v30 }
 0x8ad   :  { %8561 = vmatprep.subr.bf16.mxu0 %v10149_v29 }
 0x8b0   :  { %8563 = vmatpush3.bf16.msra.mxu0 %v10149_v29 }
 0x8b1   :  { %8565 = vmatprep.subr.bf16.mxu0 %v10163_v63 }
 0x8b4   :  { %8567 = vmatpush3.bf16.msra.mxu0 %v10163_v63 }
 0x8b5   :  { %8569 = vmatprep.subr.bf16.mxu0 %v10169_v38 }
 0x8b8   :  { %8571 = vmatpush3.bf16.msra.mxu0 %v10169_v38 }
 0x8b9   :  { %8573 = vmatprep.subr.bf16.mxu0 %v10175_v41 }
 0x8bc   :  { %8575 = vmatpush3.bf16.msra.mxu0 %v10175_v41 }
 0x8bd   :  { %8577 = vmatprep.subr.bf16.mxu0 %v10181_v45 }
 0x8c0   :  { %8579 = vmatpush3.bf16.msra.mxu0 %v10181_v45 }
 0x8c1   :  { %8581 = vmatprep.subr.bf16.mxu0 %v10187_v49 }
 0x8c4   :  { %8583 = vmatpush3.bf16.msra.mxu0 %v10187_v49 }
 0x8c5   :  { %8617 = vmatprep.subr.bf16.mxu0 %v10134_v11 }
 0x8c7   :  { %7003 = vmatmul.mubr.f32.vlgmr.msra.gmra.mrb[20].mxu0 %v10193_v53 }
 0x8c8   :  { %7005 = vmatprep.mubr.f32.mxu0 %v10197_v54  ;;  %8619 = vmatpush3.bf16.msra.mxu0 %v10134_v11 }
 0x8c9   :  { %8621 = vmatprep.subr.bf16.mxu0 %v10139_v19 }
 0x8cb   :  { %7006 = vmatmul.mubr.f32.gmra.mrb[22].mxu0 %v10203_v56 }
 0x8cc   :  { %8623 = vmatpush3.bf16.msra.mxu0 %v10139_v19 }
 0x8cd   :  { %8625 = vmatprep.subr.bf16.mxu0 %v10149_v29 }
 0x8d0   :  { %8627 = vmatpush3.bf16.msra.mxu0 %v10149_v29 }
 0x8d1   :  { %8629 = vmatprep.subr.bf16.mxu0 %v10163_v63 }
 0x8d4   :  { %8631 = vmatpush3.bf16.msra.mxu0 %v10163_v63 }
 0x8d5   :  { %8633 = vmatprep.subr.bf16.mxu0 %v10169_v38 }
 0x8d8   :  { %8635 = vmatpush3.bf16.msra.mxu0 %v10169_v38 }
 0x8d9   :  { %8637 = vmatprep.subr.bf16.mxu0 %v10175_v41 }
 0x8dc   :  { %8639 = vmatpush3.bf16.msra.mxu0 %v10175_v41 }
 0x8dd   :  { %8641 = vmatprep.subr.bf16.mxu0 %v10181_v45 }
 0x8e0   :  { %8643 = vmatpush3.bf16.msra.mxu0 %v10181_v45 }
 0x8e1   :  { %8645 = vmatprep.subr.bf16.mxu0 %v10187_v49 }
 0x8e4   :  { %8647 = vmatpush3.bf16.msra.mxu0 %v10187_v49 }
 0x8e5   :  { %8681 = vmatprep.subr.bf16.mxu0 %v10134_v11 }
 0x97a   :  { %v6958_v1 = vpop.f32.mrb[16].mxu0 }
 0x97b   :  { %v1277_v58 = vmul.f32 %v6958_v1, %v1275_v0  ;;  %v1255_v59 = vpop.f32.mrb[17].mxu0 }
 0x97c   :  { %v1276_v61 = vmul.f32 %v1275_v0, %v1255_v59 }
 0x97d   :  { %v1281_v2 = vadd.f32 %v1277_v58, %v10143_v23  ;;  %v1381_v23 = vstv %s5604_s11  ;;  %s5674_s11 = sld [smem:[#allocation2 + $0x25]] }
 0x97e   :  { %v1280_v4 = vadd.f32 %v1276_v61, %v10145_v24  ;;  %v6961_v5 = vpop.f32.mrb[18].mxu0  ;;  %v1383_v27 = vmul.f32 %v1381_v23, %v10193_v53  ;;  %v1382_v28 = vmul.f32 %v1381_v23, %v10152_v30  ;;  %v1385_v40 = vmul.f32 %v1381_v23, %v10203_v56 }
 0x97f   :  { %v1279_v6 = vmul.f32 %v6961_v5, %v1275_v0  ;;  %v1265_v7 = vpop.f32.mrb[19].mxu0  ;;  %v1384_v44 = vmul.f32 %v1381_v23, %v10197_v54  ;;  %v1679_v54 = vstv %s5623_s16  ;;  %s5676_s16 = sld [smem:[#allocation2 + $0x27]] }
 0x980   :  { %v1278_v9 = vmul.f32 %v1275_v0, %v1265_v7  ;;  %v1288_v10 = vpack.c.bf16 %v1281_v2, %v1280_v4 }
 0x981   :  { %v1283_v12 = vadd.f32 %v1279_v6, %v10156_v34 }
 0x982   :  { %v1282_v14 = vadd.f32 %v1278_v9, %v10158_v35  ;;  %6962 = vmatprep.subr.bf16.mxu1 %v1288_v10 }
 0x983   :  { %6963 = vmatpush3.bf16.msra.mxu1 %v1288_v10 }
 0x984   :  { %v1289_v15 = vpack.c.bf16 %v1283_v12, %v1282_v14  ;;  %v1774_v12 = vstv %s5624_s18  ;;  %s5677_s18 = sld [smem:[#allocation2 + $0x28]] }
 0x986   :  { %6964 = vmatprep.subr.bf16.mxu1 %v1289_v15 }
 0x987   :  { %6965 = vmatpush3.bf16.msra.mxu1 %v1289_v15 }
 0x988   :  { %8585 = vmatprep.subr.bf16.mxu1 %v10134_v11 }
 0x98a   :  { %6967 = vmatmul.mubr.msk.bf16.vlgmr.msra.gmra.mrb[28].mxu1 %vm1300_vm2, %v9604_v16 }
 0x98b   :  { %8587 = vmatpush3.bf16.msra.mxu1 %v10134_v11 }
 0x98c   :  { %8589 = vmatprep.subr.bf16.mxu1 %v10139_v19 }
 0x98f   :  { %8591 = vmatpush3.bf16.msra.mxu1 %v10139_v19 }
 0x990   :  { %8593 = vmatprep.subr.bf16.mxu1 %v10149_v29 }
 0x993   :  { %8595 = vmatpush3.bf16.msra.mxu1 %v10149_v29 }
 0x994   :  { %8597 = vmatprep.subr.bf16.mxu1 %v10163_v63 }
 0x997   :  { %8599 = vmatpush3.bf16.msra.mxu1 %v10163_v63 }
 0x998   :  { %8601 = vmatprep.subr.bf16.mxu1 %v10169_v38 }
 0x99a   :  { %v7004_v17 = vpop.f32.mrb[20].mxu0 }
 0x99b   :  { %v1469_v18 = vpop.f32.mrb[21].mxu0  ;;  %8603 = vmatpush3.bf16.msra.mxu1 %v10169_v38  ;;  %v1491_v24 = vmul.f32 %v7004_v17, %v1489_v22 }
 0x99c   :  { %7040 = vmatprep.mubr.f32.mxu1 %v1469_v18  ;;  %8605 = vmatprep.subr.bf16.mxu1 %v10175_v41  ;;  %v1490_v25 = vmul.f32 %v1489_v22, %v1469_v18 }
 0x99d   :  { %v1495_v32 = vadd.f32 %v1491_v24, %v1383_v27  ;;  %v1869_v27 = vstv %s5625_s22  ;;  %s5678_s22 = sld [smem:[#allocation2 + $0x29]] }
 0x99e   :  { %v7007_v20 = vpop.f32.mrb[22].mxu0  ;;  %v1494_v36 = vadd.f32 %v1490_v25, %v1382_v28 }
 0x99f   :  { %v1479_v21 = vpop.f32.mrb[23].mxu0  ;;  %8607 = vmatpush3.bf16.msra.mxu1 %v10175_v41  ;;  %v1493_v33 = vmul.f32 %v7007_v20, %v1489_v22 }
 0x9a0   :  { %8609 = vmatprep.subr.bf16.mxu1 %v10181_v45  ;;  %v1492_v37 = vmul.f32 %v1489_v22, %v1479_v21 }
 0x9a1   :  { %v1497_v30 = vadd.f32 %v1493_v33, %v1385_v40 }
 0x9a2   :  { %v1496_v53 = vadd.f32 %v1492_v37, %v1384_v44 }
 0x9a3   :  { %8611 = vmatpush3.bf16.msra.mxu1 %v10181_v45 }
 0x9a4   :  { %8613 = vmatprep.subr.bf16.mxu1 %v10187_v49 }
 0x9a7   :  { %8615 = vmatpush3.bf16.msra.mxu1 %v10187_v49 }
 0x9a8   :  { %8649 = vmatprep.subr.bf16.mxu1 %v10134_v11 }
 0x9aa   :  { %7041 = vmatmul.mubr.f32.vlgmr.msra.gmra.mrb[32].mxu1 %v7004_v17 }
 0x9ab   :  { %7043 = vmatprep.mubr.f32.mxu1 %v1479_v21  ;;  %8651 = vmatpush3.bf16.msra.mxu1 %v10134_v11 }
 0x9ac   :  { %8653 = vmatprep.subr.bf16.mxu1 %v10139_v19 }
 0x9ae   :  { %7044 = vmatmul.mubr.f32.gmra.mrb[34].mxu1 %v7007_v20 }
 0x9af   :  { %8655 = vmatpush3.bf16.msra.mxu1 %v10139_v19 }
 0x9b0   :  { %8657 = vmatprep.subr.bf16.mxu1 %v10149_v29 }
 0x9b3   :  { %8659 = vmatpush3.bf16.msra.mxu1 %v10149_v29 }
 0x9b4   :  { %8661 = vmatprep.subr.bf16.mxu1 %v10163_v63 }
 0x9b7   :  { %8663 = vmatpush3.bf16.msra.mxu1 %v10163_v63 }
 0x9b8   :  { %8665 = vmatprep.subr.bf16.mxu1 %v10169_v38 }
 0x9bb   :  { %8667 = vmatpush3.bf16.msra.mxu1 %v10169_v38 }
 0x9bc   :  { %8669 = vmatprep.subr.bf16.mxu1 %v10175_v41 }
 0x9bf   :  { %8671 = vmatpush3.bf16.msra.mxu1 %v10175_v41 }
 0x9c0   :  { %8673 = vmatprep.subr.bf16.mxu1 %v10181_v45 }
 0x9c3   :  { %8675 = vmatpush3.bf16.msra.mxu1 %v10181_v45 }
 0x9c4   :  { %8677 = vmatprep.subr.bf16.mxu1 %v10187_v49 }
 0x9c7   :  { %8679 = vmatpush3.bf16.msra.mxu1 %v10187_v49 }
 0x9c8   :  { %8713 = vmatprep.subr.bf16.mxu1 %v10134_v11 }
 0xa7d   :  { %v7042_v31 = vpop.f32.mrb[32].mxu1 }
 0xa7e   :  { %v1586_v34 = vmul.f32 %v7042_v31, %v1584_v26  ;;  %v1564_v35 = vpop.f32.mrb[33].mxu1 }
 0xa7f   :  { %v1585_v39 = vmul.f32 %v1584_v26, %v1564_v35  ;;  %7078 = vmatprep.mubr.f32.mxu0 %v1564_v35 }
 0xa80   :  { %v1590_v43 = vadd.f32 %v1586_v34, %v1495_v32  ;;  %7079 = vmatmul.mubr.f32.vlgmr.msra.gmra.mrb[24].mxu0 %v7042_v31 }
 0xa81   :  { %v1589_v46 = vadd.f32 %v1585_v39, %v1494_v36  ;;  %v7045_v48 = vpop.f32.mrb[34].mxu1  ;;  %8683 = vmatpush3.bf16.msra.mxu0 %v10134_v11 }
 0xa82   :  { %v1588_v50 = vmul.f32 %v7045_v48, %v1584_v26  ;;  %v1574_v51 = vpop.f32.mrb[35].mxu1  ;;  %8685 = vmatprep.subr.bf16.mxu0 %v10139_v19 }
 0xa83   :  { %v1587_v55 = vmul.f32 %v1584_v26, %v1574_v51  ;;  %7081 = vmatprep.mubr.f32.mxu0 %v1574_v51 }
 0xa84   :  { %v1592_v60 = vadd.f32 %v1588_v50, %v1497_v30  ;;  %7082 = vmatmul.mubr.f32.gmra.mrb[26].mxu0 %v7045_v48 }
 0xa85   :  { %v1591_v0 = vadd.f32 %v1587_v55, %v1496_v53  ;;  %8687 = vmatpush3.bf16.msra.mxu0 %v10139_v19 }
 0xa86   :  { %8689 = vmatprep.subr.bf16.mxu0 %v10149_v29 }
 0xa89   :  { %8691 = vmatpush3.bf16.msra.mxu0 %v10149_v29 }
 0xa8a   :  { %8693 = vmatprep.subr.bf16.mxu0 %v10163_v63 }
 0xa8d   :  { %8695 = vmatpush3.bf16.msra.mxu0 %v10163_v63 }
 0xa8e   :  { %8697 = vmatprep.subr.bf16.mxu0 %v10169_v38 }
 0xa91   :  { %8699 = vmatpush3.bf16.msra.mxu0 %v10169_v38 }
 0xa92   :  { %8701 = vmatprep.subr.bf16.mxu0 %v10175_v41 }
 0xa95   :  { %8703 = vmatpush3.bf16.msra.mxu0 %v10175_v41 }
 0xa96   :  { %8705 = vmatprep.subr.bf16.mxu0 %v10181_v45 }
 0xa99   :  { %8707 = vmatpush3.bf16.msra.mxu0 %v10181_v45 }
 0xa9a   :  { %8709 = vmatprep.subr.bf16.mxu0 %v10187_v49 }
 0xa9d   :  { %8711 = vmatpush3.bf16.msra.mxu0 %v10187_v49 }
 0xa9e   :  { %8745 = vmatprep.subr.bf16.mxu0 %v10134_v11 }
 0xb53   :  { %v7080_v56 = vpop.f32.mrb[24].mxu0 }
 0xb54   :  { %v1681_v1 = vmul.f32 %v7080_v56, %v1679_v54  ;;  %v1659_v58 = vpop.f32.mrb[25].mxu0 }
 0xb55   :  { %v1680_v59 = vmul.f32 %v1679_v54, %v1659_v58  ;;  %7116 = vmatprep.mubr.f32.mxu1 %v1659_v58 }
 0xb56   :  { %v1685_v61 = vadd.f32 %v1681_v1, %v1590_v43  ;;  %7117 = vmatmul.mubr.f32.vlgmr.msra.gmra.mrb[36].mxu1 %v7080_v56 }
 0xb57   :  { %v1684_v2 = vadd.f32 %v1680_v59, %v1589_v46  ;;  %v7083_v4 = vpop.f32.mrb[26].mxu0  ;;  %8715 = vmatpush3.bf16.msra.mxu1 %v10134_v11  ;;  %v1964_v46 = vstv %s5626_s23  ;;  %v2059_v59 = vstv %s5627_s26  ;;  %s5679_s23 = sld [smem:[#allocation2 + $0x2a]]  ;;  %s5680_s26 = sld [smem:[#allocation2 + $0x2b]] }
 0xb58   :  { %v1683_v5 = vmul.f32 %v7083_v4, %v1679_v54  ;;  %v1669_v6 = vpop.f32.mrb[27].mxu0  ;;  %8717 = vmatprep.subr.bf16.mxu1 %v10139_v19 }
 0xb59   :  { %v1682_v7 = vmul.f32 %v1679_v54, %v1669_v6  ;;  %7119 = vmatprep.mubr.f32.mxu1 %v1669_v6 }
 0xb5a   :  { %v1687_v9 = vadd.f32 %v1683_v5, %v1592_v60  ;;  %7120 = vmatmul.mubr.f32.gmra.mrb[38].mxu1 %v7083_v4 }
 0xb5b   :  { %v1686_v10 = vadd.f32 %v1682_v7, %v1591_v0  ;;  %8719 = vmatpush3.bf16.msra.mxu1 %v10139_v19 }
 0xb5c   :  { %8721 = vmatprep.subr.bf16.mxu1 %v10149_v29 }
 0xb5f   :  { %8723 = vmatpush3.bf16.msra.mxu1 %v10149_v29 }
 0xb60   :  { %8725 = vmatprep.subr.bf16.mxu1 %v10163_v63 }
 0xb63   :  { %8727 = vmatpush3.bf16.msra.mxu1 %v10163_v63 }
 0xb64   :  { %8729 = vmatprep.subr.bf16.mxu1 %v10169_v38 }
 0xb67   :  { %8731 = vmatpush3.bf16.msra.mxu1 %v10169_v38 }
 0xb68   :  { %8733 = vmatprep.subr.bf16.mxu1 %v10175_v41 }
 0xb6b   :  { %8735 = vmatpush3.bf16.msra.mxu1 %v10175_v41 }
 0xb6c   :  { %8737 = vmatprep.subr.bf16.mxu1 %v10181_v45 }
 0xb6f   :  { %8739 = vmatpush3.bf16.msra.mxu1 %v10181_v45 }
 0xb70   :  { %8741 = vmatprep.subr.bf16.mxu1 %v10187_v49 }
 0xb73   :  { %8743 = vmatpush3.bf16.msra.mxu1 %v10187_v49 }
 0xb74   :  { %8777 = vmatprep.subr.bf16.mxu1 %v10134_v11 }
 0xc29   :  { %v7118_v14 = vpop.f32.mrb[36].mxu1 }
 0xc2a   :  { %v1776_v15 = vmul.f32 %v7118_v14, %v1774_v12  ;;  %v1754_v16 = vpop.f32.mrb[37].mxu1 }
 0xc2b   :  { %v1775_v17 = vmul.f32 %v1774_v12, %v1754_v16  ;;  %7154 = vmatprep.mubr.f32.mxu0 %v1754_v16 }
 0xc2c   :  { %v1780_v18 = vadd.f32 %v1776_v15, %v1685_v61  ;;  %7155 = vmatmul.mubr.f32.vlgmr.msra.gmra.mrb[28].mxu0 %v7118_v14 }
 0xc2d   :  { %v1779_v20 = vadd.f32 %v1775_v17, %v1684_v2  ;;  %v7121_v21 = vpop.f32.mrb[38].mxu1  ;;  %8747 = vmatpush3.bf16.msra.mxu0 %v10134_v11  ;;  %v2154_v17 = vstv %s5628_s28  ;;  %s10812_s28 = sld [smem:[#allocation11_spill]] }
 0xc2e   :  { %v1778_v22 = vmul.f32 %v7121_v21, %v1774_v12  ;;  %v1764_v23 = vpop.f32.mrb[39].mxu1  ;;  %8749 = vmatprep.subr.bf16.mxu0 %v10139_v19 }
 0xc2f   :  { %v1777_v24 = vmul.f32 %v1774_v12, %v1764_v23  ;;  %7157 = vmatprep.mubr.f32.mxu0 %v1764_v23 }
 0xc30   :  { %v1782_v25 = vadd.f32 %v1778_v22, %v1687_v9  ;;  %7158 = vmatmul.mubr.f32.gmra.mrb[30].mxu0 %v7121_v21 }
 0xc31   :  { %v1781_v26 = vadd.f32 %v1777_v24, %v1686_v10  ;;  %8751 = vmatpush3.bf16.msra.mxu0 %v10139_v19 }
 0xc32   :  { %8753 = vmatprep.subr.bf16.mxu0 %v10149_v29 }
 0xc35   :  { %8755 = vmatpush3.bf16.msra.mxu0 %v10149_v29 }
 0xc36   :  { %8757 = vmatprep.subr.bf16.mxu0 %v10163_v63 }
 0xc39   :  { %8759 = vmatpush3.bf16.msra.mxu0 %v10163_v63 }
 0xc3a   :  { %8761 = vmatprep.subr.bf16.mxu0 %v10169_v38 }
 0xc3d   :  { %8763 = vmatpush3.bf16.msra.mxu0 %v10169_v38 }
 0xc3e   :  { %8765 = vmatprep.subr.bf16.mxu0 %v10175_v41 }
 0xc41   :  { %8767 = vmatpush3.bf16.msra.mxu0 %v10175_v41 }
 0xc42   :  { %8769 = vmatprep.subr.bf16.mxu0 %v10181_v45 }
 0xc45   :  { %8771 = vmatpush3.bf16.msra.mxu0 %v10181_v45 }
 0xc46   :  { %8773 = vmatprep.subr.bf16.mxu0 %v10187_v49 }
 0xc49   :  { %8775 = vmatpush3.bf16.msra.mxu0 %v10187_v49 }
 0xc4a   :  { %8809 = vmatprep.subr.bf16.mxu0 %v10134_v11 }
 0xcff   :  { %v7156_v28 = vpop.f32.mrb[28].mxu0 }
 0xd00   :  { %v1871_v31 = vmul.f32 %v7156_v28, %v1869_v27  ;;  %v1849_v32 = vpop.f32.mrb[29].mxu0 }
 0xd01   :  { %v1870_v33 = vmul.f32 %v1869_v27, %v1849_v32  ;;  %7192 = vmatprep.mubr.f32.mxu1 %v1849_v32 }
 0xd02   :  { %v1875_v34 = vadd.f32 %v1871_v31, %v1780_v18  ;;  %7193 = vmatmul.mubr.f32.vlgmr.msra.gmra.mrb[40].mxu1 %v7156_v28 }
 0xd03   :  { %v1874_v35 = vadd.f32 %v1870_v33, %v1779_v20  ;;  %v7159_v36 = vpop.f32.mrb[30].mxu0  ;;  %8779 = vmatpush3.bf16.msra.mxu1 %v10134_v11  ;;  %v2249_v33 = vstv %s5629_s1  ;;  %s10813_s1 = sld [smem:[#allocation15_spill]] }
 0xd04   :  { %v1873_v37 = vmul.f32 %v7159_v36, %v1869_v27  ;;  %v1859_v39 = vpop.f32.mrb[31].mxu0  ;;  %8781 = vmatprep.subr.bf16.mxu1 %v10139_v19 }
 0xd05   :  { %v1872_v40 = vmul.f32 %v1869_v27, %v1859_v39  ;;  %7195 = vmatprep.mubr.f32.mxu1 %v1859_v39 }
 0xd06   :  { %v1877_v43 = vadd.f32 %v1873_v37, %v1782_v25  ;;  %7196 = vmatmul.mubr.f32.gmra.mrb[42].mxu1 %v7159_v36 }
 0xd07   :  { %v1876_v44 = vadd.f32 %v1872_v40, %v1781_v26  ;;  %8783 = vmatpush3.bf16.msra.mxu1 %v10139_v19 }
 0xd08   :  { %8785 = vmatprep.subr.bf16.mxu1 %v10149_v29 }
 0xd0b   :  { %8787 = vmatpush3.bf16.msra.mxu1 %v10149_v29 }
 0xd0c   :  { %8789 = vmatprep.subr.bf16.mxu1 %v10163_v63 }
 0xd0f   :  { %8791 = vmatpush3.bf16.msra.mxu1 %v10163_v63 }
 0xd10   :  { %8793 = vmatprep.subr.bf16.mxu1 %v10169_v38 }
 0xd13   :  { %8795 = vmatpush3.bf16.msra.mxu1 %v10169_v38 }
 0xd14   :  { %8797 = vmatprep.subr.bf16.mxu1 %v10175_v41 }
 0xd17   :  { %8799 = vmatpush3.bf16.msra.mxu1 %v10175_v41 }
 0xd18   :  { %8801 = vmatprep.subr.bf16.mxu1 %v10181_v45 }
 0xd1b   :  { %8803 = vmatpush3.bf16.msra.mxu1 %v10181_v45 }
 0xd1c   :  { %8805 = vmatprep.subr.bf16.mxu1 %v10187_v49 }
 0xd1f   :  { %8807 = vmatpush3.bf16.msra.mxu1 %v10187_v49 }
 0xd20   :  { %8841 = vmatprep.subr.bf16.mxu1 %v10134_v11 }
 0xdd5   :  { %v7194_v48 = vpop.f32.mrb[40].mxu1 }
 0xdd6   :  { %v1966_v30 = vmul.f32 %v7194_v48, %v1964_v46  ;;  %v1944_v50 = vpop.f32.mrb[41].mxu1 }
 0xdd7   :  { %v1965_v51 = vmul.f32 %v1964_v46, %v1944_v50  ;;  %7230 = vmatprep.mubr.f32.mxu0 %v1944_v50 }
 0xdd8   :  { %v1970_v53 = vadd.f32 %v1966_v30, %v1875_v34  ;;  %7231 = vmatmul.mubr.f32.vlgmr.msra.gmra.mrb[32].mxu0 %v7194_v48 }
 0xdd9   :  { %v1969_v55 = vadd.f32 %v1965_v51, %v1874_v35  ;;  %v7197_v60 = vpop.f32.mrb[42].mxu1  ;;  %8811 = vmatpush3.bf16.msra.mxu0 %v10134_v11  ;;  %v9605_v51 = vld [vmem:[%s10807_s13 + $0x10] sm:$0xff]  }
 0xdda   :  { %v1968_v0 = vmul.f32 %v7197_v60, %v1964_v46  ;;  %v1954_v54 = vpop.f32.mrb[43].mxu1  ;;  %8813 = vmatprep.subr.bf16.mxu0 %v10139_v19 }
 0xddb   :  { %v1967_v56 = vmul.f32 %v1964_v46, %v1954_v54  ;;  %7233 = vmatprep.mubr.f32.mxu0 %v1954_v54 }
 0xddc   :  { %v1972_v1 = vadd.f32 %v1968_v0, %v1877_v43  ;;  %7234 = vmatmul.mubr.f32.gmra.mrb[34].mxu0 %v7197_v60 }
 0xddd   :  { %v1971_v58 = vadd.f32 %v1967_v56, %v1876_v44  ;;  %8815 = vmatpush3.bf16.msra.mxu0 %v10139_v19 }
 0xdde   :  { %8817 = vmatprep.subr.bf16.mxu0 %v10149_v29 }
 0xde1   :  { %8819 = vmatpush3.bf16.msra.mxu0 %v10149_v29 }
 0xde2   :  { %8821 = vmatprep.subr.bf16.mxu0 %v10163_v63 }
 0xde5   :  { %8823 = vmatpush3.bf16.msra.mxu0 %v10163_v63 }
 0xde6   :  { %8825 = vmatprep.subr.bf16.mxu0 %v10169_v38 }
 0xde9   :  { %8827 = vmatpush3.bf16.msra.mxu0 %v10169_v38 }
 0xdea   :  { %8829 = vmatprep.subr.bf16.mxu0 %v10175_v41 }
 0xded   :  { %8831 = vmatpush3.bf16.msra.mxu0 %v10175_v41 }
 0xdee   :  { %8833 = vmatprep.subr.bf16.mxu0 %v10181_v45 }
 0xdf1   :  { %8835 = vmatpush3.bf16.msra.mxu0 %v10181_v45 }
 0xdf2   :  { %8837 = vmatprep.subr.bf16.mxu0 %v10187_v49 }
 0xdf5   :  { %8839 = vmatpush3.bf16.msra.mxu0 %v10187_v49 }
 0xeab   :  { %v7232_v61 = vpop.f32.mrb[32].mxu0 }
 0xeac   :  { %v2061_v2 = vmul.f32 %v7232_v61, %v2059_v59  ;;  %v2039_v4 = vpop.f32.mrb[33].mxu0 }
 0xead   :  { %v2060_v5 = vmul.f32 %v2059_v59, %v2039_v4  ;;  %7268 = vmatprep.mubr.f32.mxu1 %v2039_v4 }
 0xeae   :  { %v2065_v6 = vadd.f32 %v2061_v2, %v1970_v53  ;;  %7269 = vmatmul.mubr.f32.vlgmr.msra.gmra.mrb[44].mxu1 %v7232_v61  ;;  %v2344_v53 = vstv %s5630_s2  ;;  %s10814_s2 = sld [smem:[#allocation5_spill]] }
 0xeaf   :  { %v2064_v7 = vadd.f32 %v2060_v5, %v1969_v55  ;;  %v7235_v9 = vpop.f32.mrb[34].mxu0  ;;  %8843 = vmatpush3.bf16.msra.mxu1 %v10134_v11 }
 0xeb0   :  { %v2063_v10 = vmul.f32 %v7235_v9, %v2059_v59  ;;  %v2049_v12 = vpop.f32.mrb[35].mxu0  ;;  %8845 = vmatprep.subr.bf16.mxu1 %v10139_v19 }
 0xeb1   :  { %v2062_v14 = vmul.f32 %v2059_v59, %v2049_v12  ;;  %7271 = vmatprep.mubr.f32.mxu1 %v2049_v12  ;;  %v1364_v12 = vpop.permute.xlu1 %1363 }
 0xeb2   :  { %v2067_v15 = vadd.f32 %v2063_v10, %v1972_v1  ;;  %7272 = vmatmul.mubr.f32.gmra.mrb[46].mxu1 %v7235_v9  ;;  %v9606_v9 = vld [vmem:[%s10807_s13 + $0x18] sm:$0xff]   ;;  %v9607_v10 = vld [vmem:[%s10808_s0] sm:$0xff]   ;;  %s5670_s13 = sld [smem:[#allocation2 + $0x21]] }
 0xeb3   :  { %v2066_v16 = vadd.f32 %v2062_v14, %v1971_v58  ;;  %8847 = vmatpush3.bf16.msra.mxu1 %v10139_v19  ;;  %v1359_v14 = vpop.permute.xlu0 %1358 }
 0xeb4   :  { %8849 = vmatprep.subr.bf16.mxu1 %v10149_v29 }
 0xeb7   :  { %8851 = vmatpush3.bf16.msra.mxu1 %v10149_v29 }
 0xeb8   :  { %8853 = vmatprep.subr.bf16.mxu1 %v10163_v63 }
 0xebb   :  { %8855 = vmatpush3.bf16.msra.mxu1 %v10163_v63 }
 0xebc   :  { %8857 = vmatprep.subr.bf16.mxu1 %v10169_v38 }
 0xebf   :  { %8859 = vmatpush3.bf16.msra.mxu1 %v10169_v38 }
 0xec0   :  { %8861 = vmatprep.subr.bf16.mxu1 %v10175_v41 }
 0xec3   :  { %8863 = vmatpush3.bf16.msra.mxu1 %v10175_v41 }
 0xec4   :  { %8865 = vmatprep.subr.bf16.mxu1 %v10181_v45 }
 0xec7   :  { %8867 = vmatpush3.bf16.msra.mxu1 %v10181_v45 }
 0xec8   :  { %8869 = vmatprep.subr.bf16.mxu1 %v10187_v49 }
 0xecb   :  { %8871 = vmatpush3.bf16.msra.mxu1 %v10187_v49 }
 0xf81   :  { %v7270_v18 = vpop.f32.mrb[44].mxu1 }
 0xf82   :  { %v2156_v20 = vmul.f32 %v7270_v18, %v2154_v17  ;;  %v2134_v21 = vpop.f32.mrb[45].mxu1 }
 0xf83   :  { %v2155_v22 = vmul.f32 %v2154_v17, %v2134_v21  ;;  %7306 = vmatprep.mubr.f32.mxu0 %v2134_v21 }
 0xf84   :  { %v2160_v23 = vadd.f32 %v2156_v20, %v2065_v6  ;;  %7307 = vmatmul.mubr.f32.vlgmr.msra.gmra.mrb[36].mxu0 %v7270_v18  ;;  %v1369_v18 = vpop.permute.xlu0 %1368 }
 0xf85   :  { %v2159_v24 = vadd.f32 %v2155_v22, %v2064_v7  ;;  %v7273_v25 = vpop.f32.mrb[46].mxu1 }
 0xf86   :  { %v2158_v26 = vmul.f32 %v7273_v25, %v2154_v17  ;;  %v2144_v27 = vpop.f32.mrb[47].mxu1 }
 0xf87   :  { %v2157_v28 = vmul.f32 %v2154_v17, %v2144_v27  ;;  %7309 = vmatprep.mubr.f32.mxu0 %v2144_v27 }
 0xf88   :  { %v2162_v31 = vadd.f32 %v2158_v26, %v2067_v15  ;;  %7310 = vmatmul.mubr.f32.gmra.mrb[38].mxu0 %v7273_v25 }
 0xf89   :  { %v2161_v32 = vadd.f32 %v2157_v28, %v2066_v16  ;;  %7362 = vmatprep.mubr.msk.bf16.mxu0 %vm1300_vm2, %v9607_v10  ;;  %v1374_v16 = vpop.permute.xlu1 %1373  ;;  %v9608_v28 = vld [vmem:[%s10808_s0 + $0x8] sm:$0xff]   ;;  %s10815_s0 = sld [smem:[#allocation19_spill]] }
0x1057   :  { %v7308_v34 = vpop.f32.mrb[36].mxu0 }
0x1058   :  { %v2251_v35 = vmul.f32 %v7308_v34, %v2249_v33  ;;  %v2229_v36 = vpop.f32.mrb[37].mxu0 }
0x1059   :  { %v2250_v37 = vmul.f32 %v2249_v33, %v2229_v36  ;;  %7344 = vmatprep.mubr.f32.mxu1 %v2229_v36 }
0x105a   :  { %v2255_v39 = vadd.f32 %v2251_v35, %v2160_v23  ;;  %7345 = vmatmul.mubr.f32.vlgmr.msra.gmra.mrb[48].mxu1 %v7308_v34 }
0x105b   :  { %v2254_v40 = vadd.f32 %v2250_v37, %v2159_v24  ;;  %v7311_v43 = vpop.f32.mrb[38].mxu0 }
0x105c   :  { %v2253_v44 = vmul.f32 %v7311_v43, %v2249_v33  ;;  %v2239_v46 = vpop.f32.mrb[39].mxu0 }
0x105d   :  { %v2252_v48 = vmul.f32 %v2249_v33, %v2239_v46  ;;  %7347 = vmatprep.mubr.f32.mxu1 %v2239_v46  ;;  %v2447_v33 = vpop.permute.xlu1 %2446 }
0x105e   :  { %v2257_v30 = vadd.f32 %v2253_v44, %v2162_v31  ;;  %7348 = vmatmul.mubr.f32.gmra.mrb[50].mxu1 %v7311_v43  ;;  %v9609_v31 = vld [vmem:[%s10809_s5] sm:$0xff]  }
0x105f   :  { %v2256_v50 = vadd.f32 %v2252_v48, %v2161_v32  ;;  %7354 = vmatprep.mubr.msk.bf16.mxu1 %vm1300_vm2, %v9605_v51  ;;  %v2442_v32 = vpop.permute.xlu0 %2441 }
0x1061   :  { %v2536_v35 = vpop.permute.xlu1 %2535 }
0x1063   :  { %v2531_v34 = vpop.permute.xlu0 %2530 }
0x1065   :  { %v2457_v37 = vpop.permute.xlu1 %2456 }
0x1067   :  { %v2452_v36 = vpop.permute.xlu0 %2451 }
0x112d   :  { %v7346_v55 = vpop.f32.mrb[48].mxu1 }
0x112e   :  { %v2346_v60 = vmul.f32 %v7346_v55, %v2344_v53  ;;  %v2324_v0 = vpop.f32.mrb[49].mxu1 }
0x112f   :  { %v2345_v54 = vmul.f32 %v2344_v53, %v2324_v0 }
0x1130   :  { %v2350_v56 = vadd.f32 %v2346_v60, %v2255_v39  ;;  %v2559_v39 = vpop.permute.xlu0 %2558 }
0x1131   :  { %v2349_v1 = vadd.f32 %v2345_v54, %v2254_v40  ;;  %v7349_v58 = vpop.f32.mrb[50].mxu1  ;;  %v2564_v40 = vpop.permute.xlu1 %2563 }
0x1132   :  { %v2348_v59 = vmul.f32 %v7349_v58, %v2344_v53  ;;  %v2334_v61 = vpop.f32.mrb[51].mxu1 }
0x1133   :  { %v2347_v2 = vmul.f32 %v2344_v53, %v2334_v61  ;;  %v2358_v4 = vpack.c.bf16 %v2350_v56, %v2349_v1 }
0x1134   :  { %v2352_v5 = vadd.f32 %v2348_v59, %v2257_v30  ;;  %v2541_v43 = vpop.permute.xlu0 %2540 }
0x1135   :  { %v2351_v6 = vadd.f32 %v2347_v2, %v2256_v50  ;;  %7350 = vmatprep.subr.bf16.mxu1 %v2358_v4  ;;  %v2546_v44 = vpop.permute.xlu1 %2545 }
0x1136   :  { %7351 = vmatpush3.bf16.msra.mxu1 %v2358_v4 }
0x1137   :  { %v2359_v7 = vpack.c.bf16 %v2352_v5, %v2351_v6 }
0x1138   :  { %v2569_v0 = vpop.permute.xlu0 %2568 }
0x1139   :  { %7352 = vmatprep.subr.bf16.mxu1 %v2359_v7  ;;  %v2574_v59 = vpop.permute.xlu1 %2573 }
0x113a   :  { %7353 = vmatpush3.bf16.msra.mxu1 %v2359_v7 }
0x113d   :  { %7355 = vmatmul.mubr.msk.bf16.vlgmr.msra.gmra.mrb[28].mxu1 %vm1300_vm2, %v9606_v9 }
0x1210   :  { %v7356_v15 = vpop.f32.mrb[28].mxu1 }
0x1211   :  { %v2410_v17 = vpop.f32.mrb[29].mxu1  ;;  %v9544_v21 = vadd.f32 %v7356_v15, %v1369_v18  ;;  %v9610_v15 = vld [vmem:[%s10809_s5 + $0x8] sm:$0xff]   ;;  %v2602_v18 = vpop.permute.xlu1 %2601 }
0x1212   :  { %v7357_v20 = vpop.f32.mrb[30].mxu1  ;;  %v9545_v24 = vadd.f32 %v2410_v17, %v1359_v14  ;;  %v2597_v17 = vpop.permute.xlu0 %2596 }
0x1213   :  { %v9546_v22 = vadd.f32 %v7357_v20, %v1374_v16  ;;  %v2413_v23 = vpop.f32.mrb[31].mxu1  ;;  %v9611_v16 = vld [vmem:[%s10810_s9] sm:$0xff]  }
0x1214   :  { %v9547_v25 = vadd.f32 %v2413_v23, %v1364_v12  ;;  %7378 = vmatprep.mubr.msk.bf16.mxu1 %vm1300_vm2, %v9611_v16 }
0x1215   :  { %v2434_v26 = vpack.c.bf16 %v9546_v22, %v9544_v21  ;;  %v2691_v21 = vpop.permute.xlu1 %2690 }
0x1216   :  { %v2433_v27 = vpack.c.bf16 %v9547_v25, %v9545_v24  ;;  %v2686_v20 = vpop.permute.xlu0 %2685 }
0x1218   :  { %7358 = vmatprep.subr.bf16.mxu0 %v2433_v27 }
0x1219   :  { %7359 = vmatpush3.bf16.msra.mxu0 %v2433_v27  ;;  %v2612_v23 = vpop.permute.xlu1 %2611 }
0x121a   :  { %7360 = vmatprep.subr.bf16.mxu0 %v2434_v26  ;;  %v2607_v22 = vpop.permute.xlu0 %2606 }
0x121d   :  { %7361 = vmatpush3.bf16.msra.mxu0 %v2434_v26  ;;  %v2719_v25 = vpop.permute.xlu1 %2718 }
0x121e   :  { %v2714_v24 = vpop.permute.xlu0 %2713 }
0x1220   :  { %7363 = vmatmul.mubr.msk.bf16.vlgmr.msra.gmra.mrb[40].mxu0 %vm1300_vm2, %v9608_v28 }
0x1221   :  { %7370 = vmatprep.mubr.msk.bf16.mxu0 %vm1300_vm2, %v9609_v31  ;;  %v2701_v27 = vpop.permute.xlu1 %2700 }
0x1222   :  { %v2696_v26 = vpop.permute.xlu0 %2695 }
0x12f3   :  { %v7364_v46 = vpop.f32.mrb[40].mxu0 }
0x12f4   :  { %v2518_v48 = vadd.f32 %v7364_v46, %v2452_v36  ;;  %v2509_v30 = vpop.f32.mrb[41].mxu0 }
0x12f5   :  { %v2510_v50 = vadd.f32 %v2509_v30, %v2442_v32  ;;  %v7365_v51 = vpop.f32.mrb[42].mxu0 }
0x12f6   :  { %v2550_v53 = vmul.f32 %v2541_v43, %v2518_v48  ;;  %v2521_v55 = vadd.f32 %v7365_v51, %v2457_v37  ;;  %v2512_v60 = vpop.f32.mrb[43].mxu0  ;;  %v2729_v48 = vpop.permute.xlu1 %2728 }
0x12f7   :  { %v2548_v54 = vmul.f32 %v2531_v34, %v2510_v50  ;;  %v2513_v56 = vadd.f32 %v2512_v60, %v2447_v33 }
0x12f8   :  { %v2578_v1 = vadd.f32 %v2569_v0, %v2550_v53  ;;  %v2551_v58 = vmul.f32 %v2546_v44, %v2521_v55 }
0x12f9   :  { %v2576_v61 = vadd.f32 %v2559_v39, %v2548_v54  ;;  %v2549_v2 = vmul.f32 %v2536_v35, %v2513_v56  ;;  %v2724_v39 = vpop.permute.xlu0 %2723 }
0x12fa   :  { %v2579_v4 = vadd.f32 %v2574_v59, %v2551_v58  ;;  %v2582_v6 = vmax.f32 %v2578_v1, 0.0  ;;  %v9612_v58 = vld [vmem:[%s10810_s9 + $0x8] sm:$0xff]   ;;  %v9613_v59 = vld [vmem:[%s10810_s9 + $0x10] sm:$0xff]  }
0x12fb   :  { %v2577_v5 = vadd.f32 %v2564_v40, %v2549_v2  ;;  %v2580_v9 = vmax.f32 %v2576_v61, 0.0  ;;  %v9614_v61 = vld [vmem:[%s10810_s9 + $0x18] sm:$0xff]  }
0x12fc   :  { %v2583_v7 = vmax.f32 %v2579_v4, 0.0 }
0x12fd   :  { %v2581_v10 = vmax.f32 %v2577_v5, 0.0  ;;  %v2760_v2 = vpop.permute.xlu0 %2759  ;;  %v2765_v5 = vpop.permute.xlu1 %2764 }
0x12fe   :  { %v2589_v12 = vpack.c.bf16 %v2583_v7, %v2582_v6 }
0x12ff   :  { %v2588_v14 = vpack.c.bf16 %v2581_v10, %v2580_v9 }
0x1301   :  { %7366 = vmatprep.subr.bf16.mxu0 %v2588_v14  ;;  %v2775_v16 = vpop.permute.xlu1 %2774 }
0x1302   :  { %7367 = vmatpush3.bf16.msra.mxu0 %v2588_v14 }
0x1303   :  { %7368 = vmatprep.subr.bf16.mxu0 %v2589_v12 }
0x1306   :  { %7369 = vmatpush3.bf16.msra.mxu0 %v2589_v12  ;;  %v2770_v12 = vpop.permute.xlu0 %2769 }
0x1307   :  { %8873 = vmatprep.subr.bf16.mxu0 %v9889_v42 }
0x1309   :  { %7371 = vmatmul.mubr.msk.bf16.vlgmr.msra.gmra.mrb[44].mxu0 %vm1300_vm2, %v9610_v15 }
0x130a   :  { %8875 = vmatpush3.bf16.msra.mxu0 %v9889_v42 }
0x130b   :  { %8877 = vmatprep.subr.bf16.mxu0 %v9899_v47 }
0x130e   :  { %8879 = vmatpush3.bf16.msra.mxu0 %v9899_v47 }
0x130f   :  { %8881 = vmatprep.subr.bf16.mxu0 %v9909_v52 }
0x1312   :  { %8883 = vmatpush3.bf16.msra.mxu0 %v9909_v52 }
0x1313   :  { %8885 = vmatprep.subr.bf16.mxu0 %v9919_v57 }
0x1316   :  { %8887 = vmatpush3.bf16.msra.mxu0 %v9919_v57 }
0x1317   :  { %8889 = vmatprep.subr.bf16.mxu0 %v9929_v62 }
0x131a   :  { %8891 = vmatpush3.bf16.msra.mxu0 %v9929_v62 }
0x131b   :  { %8893 = vmatprep.subr.bf16.mxu0 %v9939_v3 }
0x131e   :  { %8895 = vmatpush3.bf16.msra.mxu0 %v9939_v3 }
0x131f   :  { %8897 = vmatprep.subr.bf16.mxu0 %v9949_v8 }
0x1322   :  { %8899 = vmatpush3.bf16.msra.mxu0 %v9949_v8 }
0x1323   :  { %8901 = vmatprep.subr.bf16.mxu0 %v9959_v13 }
0x1326   :  { %8903 = vmatpush3.bf16.msra.mxu0 %v9959_v13 }
0x1327   :  { %8937 = vmatprep.subr.bf16.mxu0 %v9889_v42 }
0x13dc   :  { %v7372_v28 = vpop.f32.mrb[44].mxu0 }
0x13dd   :  { %v2673_v31 = vadd.f32 %v7372_v28, %v2607_v22  ;;  %v2664_v32 = vpop.f32.mrb[45].mxu0 }
0x13de   :  { %v2665_v33 = vadd.f32 %v2664_v32, %v2597_v17  ;;  %v7373_v34 = vpop.f32.mrb[46].mxu0 }
0x13df   :  { %v2705_v35 = vmul.f32 %v2696_v26, %v2673_v31  ;;  %v2676_v36 = vadd.f32 %v7373_v34, %v2612_v23  ;;  %v2667_v37 = vpop.f32.mrb[47].mxu0  ;;  %v2990_v23 = vstv %s5656_s21 }
0x13e0   :  { %v2703_v40 = vmul.f32 %v2686_v20, %v2665_v33  ;;  %v2668_v43 = vadd.f32 %v2667_v37, %v2602_v18 }
0x13e1   :  { %v2733_v44 = vadd.f32 %v2724_v39, %v2705_v35  ;;  %v2706_v46 = vmul.f32 %v2701_v27, %v2676_v36 }
0x13e2   :  { %v2731_v30 = vadd.f32 %v2714_v24, %v2703_v40  ;;  %v2704_v50 = vmul.f32 %v2691_v21, %v2668_v43  ;;  %v2899_v24 = vstv %s5655_s25 }
0x13e3   :  { %v2734_v51 = vadd.f32 %v2729_v48, %v2706_v46  ;;  %v2737_v55 = vmax.f32 %v2733_v44, 0.0  ;;  %v3085_v48 = vstv %s5657_s3 }
0x13e4   :  { %v2732_v53 = vadd.f32 %v2719_v25, %v2704_v50  ;;  %v2735_v0 = vmax.f32 %v2731_v30, 0.0 }
0x13e5   :  { %v2738_v60 = vmax.f32 %v2734_v51, 0.0 }
0x13e6   :  { %v2736_v54 = vmax.f32 %v2732_v53, 0.0 }
0x13e7   :  { %v2748_v56 = vpack.c.bf16 %v2738_v60, %v2737_v55 }
0x13e8   :  { %v2747_v1 = vpack.c.bf16 %v2736_v54, %v2735_v0 }
0x13ea   :  { %7374 = vmatprep.subr.bf16.mxu1 %v2747_v1 }
0x13eb   :  { %7375 = vmatpush3.bf16.msra.mxu1 %v2747_v1 }
0x13ec   :  { %7376 = vmatprep.subr.bf16.mxu1 %v2748_v56 }
0x13ef   :  { %7377 = vmatpush3.bf16.msra.mxu1 %v2748_v56 }
0x13f0   :  { %8905 = vmatprep.subr.bf16.mxu1 %v9889_v42 }
0x13f2   :  { %7379 = vmatmul.mubr.msk.bf16.vlgmr.msra.gmra.mrb[52].mxu1 %vm1300_vm2, %v9612_v58 }
0x13f3   :  { %7382 = vmatprep.mubr.msk.bf16.mxu1 %vm1300_vm2, %v9613_v59  ;;  %8907 = vmatpush3.bf16.msra.mxu1 %v9889_v42 }
0x13f4   :  { %8909 = vmatprep.subr.bf16.mxu1 %v9899_v47 }
0x13f7   :  { %8911 = vmatpush3.bf16.msra.mxu1 %v9899_v47 }
0x13f8   :  { %8913 = vmatprep.subr.bf16.mxu1 %v9909_v52 }
0x13fa   :  { %7383 = vmatmul.mubr.msk.bf16.gmra.mrb[56].mxu1 %vm1300_vm2, %v9614_v61  ;;  %v3180_v61 = vstv %s5658_s29 }
0x13fb   :  { %8915 = vmatpush3.bf16.msra.mxu1 %v9909_v52 }
0x13fc   :  { %8917 = vmatprep.subr.bf16.mxu1 %v9919_v57 }
0x13ff   :  { %8919 = vmatpush3.bf16.msra.mxu1 %v9919_v57 }
0x1400   :  { %8921 = vmatprep.subr.bf16.mxu1 %v9929_v62 }
0x1403   :  { %8923 = vmatpush3.bf16.msra.mxu1 %v9929_v62 }
0x1404   :  { %8925 = vmatprep.subr.bf16.mxu1 %v9939_v3 }
0x1407   :  { %8927 = vmatpush3.bf16.msra.mxu1 %v9939_v3 }
0x1408   :  { %8929 = vmatprep.subr.bf16.mxu1 %v9949_v8 }
0x140b   :  { %8931 = vmatpush3.bf16.msra.mxu1 %v9949_v8 }
0x140c   :  { %8933 = vmatprep.subr.bf16.mxu1 %v9959_v13 }
0x140f   :  { %8935 = vmatpush3.bf16.msra.mxu1 %v9959_v13 }
0x1410   :  { %8969 = vmatprep.subr.bf16.mxu1 %v9889_v42 }
0x14c5   :  { %v7380_v4 = vpop.f32.mrb[52].mxu1 }
0x14c6   :  { %v2863_v6 = vpop.f32.mrb[53].mxu1  ;;  %v2872_v15 = vadd.f32 %v7380_v4, %v2770_v12 }
0x14c7   :  { %v2864_v7 = vadd.f32 %v2863_v6, %v2760_v2  ;;  %v7381_v9 = vpop.f32.mrb[54].mxu1 }
0x14c8   :  { %v2866_v10 = vpop.f32.mrb[55].mxu1  ;;  %v2875_v17 = vadd.f32 %v7381_v9, %v2775_v16  ;;  %v2902_v40 = vmul.f32 %v2899_v24, %v2872_v15 }
0x14c9   :  { %v2867_v14 = vadd.f32 %v2866_v10, %v2765_v5  ;;  %7418 = vmatprep.mubr.f32.mxu0 %v2864_v7  ;;  %v2900_v31 = vmul.f32 %v2899_v24, %v2864_v7 }
0x14ca   :  { %v2903_v36 = vmul.f32 %v2899_v24, %v2875_v17 }
0x14cb   :  { %7419 = vmatmul.mubr.f32.vlgmr.msra.gmra.mrb[48].mxu0 %v2867_v14  ;;  %v2901_v26 = vmul.f32 %v2899_v24, %v2867_v14 }
0x14cc   :  { %7421 = vmatprep.mubr.f32.mxu0 %v2872_v15  ;;  %8939 = vmatpush3.bf16.msra.mxu0 %v9889_v42 }
0x14cd   :  { %v10415_v18 = vpop.f32.mrb[56].mxu1  ;;  %8941 = vmatprep.subr.bf16.mxu0 %v9899_v47 }
0x14ce   :  { %v10418_v20 = vpop.f32.mrb[57].mxu1 }
0x14cf   :  { %v10420_v21 = vpop.f32.mrb[58].mxu1  ;;  %7422 = vmatmul.mubr.f32.gmra.mrb[50].mxu0 %v2875_v17 }
0x14d0   :  { %v10422_v22 = vpop.f32.mrb[59].mxu1  ;;  %8943 = vmatpush3.bf16.msra.mxu0 %v9899_v47 }
0x14d1   :  { %8945 = vmatprep.subr.bf16.mxu0 %v9909_v52 }
0x14d4   :  { %8947 = vmatpush3.bf16.msra.mxu0 %v9909_v52 }
0x14d5   :  { %8949 = vmatprep.subr.bf16.mxu0 %v9919_v57 }
0x14d8   :  { %8951 = vmatpush3.bf16.msra.mxu0 %v9919_v57 }
0x14d9   :  { %8953 = vmatprep.subr.bf16.mxu0 %v9929_v62 }
0x14dc   :  { %8955 = vmatpush3.bf16.msra.mxu0 %v9929_v62 }
0x14dd   :  { %8957 = vmatprep.subr.bf16.mxu0 %v9939_v3 }
0x14e0   :  { %8959 = vmatpush3.bf16.msra.mxu0 %v9939_v3 }
0x14e1   :  { %8961 = vmatprep.subr.bf16.mxu0 %v9949_v8 }
0x14e4   :  { %8963 = vmatpush3.bf16.msra.mxu0 %v9949_v8 }
0x14e5   :  { %8965 = vmatprep.subr.bf16.mxu0 %v9959_v13 }
0x14e8   :  { %8967 = vmatpush3.bf16.msra.mxu0 %v9959_v13 }
0x14e9   :  { %9001 = vmatprep.subr.bf16.mxu0 %v9889_v42 }
0x159e   :  { %v7420_v25 = vpop.f32.mrb[48].mxu0 }
0x159f   :  { %v2992_v27 = vmul.f32 %v7420_v25, %v2990_v23  ;;  %v2970_v28 = vpop.f32.mrb[49].mxu0 }
0x15a0   :  { %v2991_v32 = vmul.f32 %v2990_v23, %v2970_v28  ;;  %7456 = vmatprep.mubr.f32.mxu1 %v2970_v28 }
0x15a1   :  { %v2996_v33 = vadd.f32 %v2992_v27, %v2901_v26  ;;  %7457 = vmatmul.mubr.f32.vlgmr.msra.gmra.mrb[60].mxu1 %v7420_v25 }
0x15a2   :  { %v2995_v34 = vadd.f32 %v2991_v32, %v2900_v31  ;;  %v7423_v35 = vpop.f32.mrb[50].mxu0  ;;  %8971 = vmatpush3.bf16.msra.mxu1 %v9889_v42 }
0x15a3   :  { %v2994_v37 = vmul.f32 %v7423_v35, %v2990_v23  ;;  %v2980_v39 = vpop.f32.mrb[51].mxu0  ;;  %8973 = vmatprep.subr.bf16.mxu1 %v9899_v47 }
0x15a4   :  { %v2993_v43 = vmul.f32 %v2990_v23, %v2980_v39  ;;  %7459 = vmatprep.mubr.f32.mxu1 %v2980_v39  ;;  %v3275_v23 = vstv %s5659_s8  ;;  %v3370_v39 = vstv %s5660_s14 }
0x15a5   :  { %v2998_v44 = vadd.f32 %v2994_v37, %v2903_v36  ;;  %7460 = vmatmul.mubr.f32.gmra.mrb[62].mxu1 %v7423_v35 }
0x15a6   :  { %v2997_v46 = vadd.f32 %v2993_v43, %v2902_v40  ;;  %8975 = vmatpush3.bf16.msra.mxu1 %v9899_v47 }
0x15a7   :  { %8977 = vmatprep.subr.bf16.mxu1 %v9909_v52 }
0x15aa   :  { %8979 = vmatpush3.bf16.msra.mxu1 %v9909_v52 }
0x15ab   :  { %8981 = vmatprep.subr.bf16.mxu1 %v9919_v57 }
0x15ae   :  { %8983 = vmatpush3.bf16.msra.mxu1 %v9919_v57 }
0x15af   :  { %8985 = vmatprep.subr.bf16.mxu1 %v9929_v62 }
0x15b2   :  { %8987 = vmatpush3.bf16.msra.mxu1 %v9929_v62 }
0x15b3   :  { %8989 = vmatprep.subr.bf16.mxu1 %v9939_v3 }
0x15b6   :  { %8991 = vmatpush3.bf16.msra.mxu1 %v9939_v3 }
0x15b7   :  { %8993 = vmatprep.subr.bf16.mxu1 %v9949_v8 }
0x15ba   :  { %8995 = vmatpush3.bf16.msra.mxu1 %v9949_v8 }
0x15bb   :  { %8997 = vmatprep.subr.bf16.mxu1 %v9959_v13 }
0x15be   :  { %8999 = vmatpush3.bf16.msra.mxu1 %v9959_v13 }
0x15bf   :  { %9033 = vmatprep.subr.bf16.mxu1 %v9889_v42 }
0x1674   :  { %v7458_v30 = vpop.f32.mrb[60].mxu1 }
0x1675   :  { %v3087_v50 = vmul.f32 %v7458_v30, %v3085_v48  ;;  %v3065_v51 = vpop.f32.mrb[61].mxu1 }
0x1676   :  { %v3086_v53 = vmul.f32 %v3085_v48, %v3065_v51  ;;  %7494 = vmatprep.mubr.f32.mxu0 %v3065_v51 }
0x1677   :  { %v3091_v55 = vadd.f32 %v3087_v50, %v2996_v33  ;;  %7495 = vmatmul.mubr.f32.vlgmr.msra.gmra.mrb[52].mxu0 %v7458_v30 }
0x1678   :  { %v3090_v60 = vadd.f32 %v3086_v53, %v2995_v34  ;;  %v7461_v0 = vpop.f32.mrb[62].mxu1  ;;  %9003 = vmatpush3.bf16.msra.mxu0 %v9889_v42 }
0x1679   :  { %v3089_v54 = vmul.f32 %v7461_v0, %v3085_v48  ;;  %v3075_v56 = vpop.f32.mrb[63].mxu1  ;;  %9005 = vmatprep.subr.bf16.mxu0 %v9899_v47 }
0x167a   :  { %v3088_v1 = vmul.f32 %v3085_v48, %v3075_v56  ;;  %7497 = vmatprep.mubr.f32.mxu0 %v3075_v56 }
0x167b   :  { %v3093_v58 = vadd.f32 %v3089_v54, %v2998_v44  ;;  %7498 = vmatmul.mubr.f32.gmra.mrb[54].mxu0 %v7461_v0  ;;  %v3465_v54 = vstv %s5661_s19 }
0x167c   :  { %v3092_v59 = vadd.f32 %v3088_v1, %v2997_v46  ;;  %9007 = vmatpush3.bf16.msra.mxu0 %v9899_v47 }
0x167d   :  { %9009 = vmatprep.subr.bf16.mxu0 %v9909_v52 }
0x1680   :  { %9011 = vmatpush3.bf16.msra.mxu0 %v9909_v52 }
0x1681   :  { %9013 = vmatprep.subr.bf16.mxu0 %v9919_v57 }
0x1684   :  { %9015 = vmatpush3.bf16.msra.mxu0 %v9919_v57 }
0x1685   :  { %9017 = vmatprep.subr.bf16.mxu0 %v9929_v62 }
0x1688   :  { %9019 = vmatpush3.bf16.msra.mxu0 %v9929_v62 }
0x1689   :  { %9021 = vmatprep.subr.bf16.mxu0 %v9939_v3 }
0x168c   :  { %9023 = vmatpush3.bf16.msra.mxu0 %v9939_v3 }
0x168d   :  { %9025 = vmatprep.subr.bf16.mxu0 %v9949_v8 }
0x1690   :  { %9027 = vmatpush3.bf16.msra.mxu0 %v9949_v8 }
0x1691   :  { %9029 = vmatprep.subr.bf16.mxu0 %v9959_v13 }
0x1694   :  { %9031 = vmatpush3.bf16.msra.mxu0 %v9959_v13 }
0x1695   :  { %9065 = vmatprep.subr.bf16.mxu0 %v9889_v42 }
0x174a   :  { %v7496_v2 = vpop.f32.mrb[52].mxu0 }
0x174b   :  { %v3182_v4 = vmul.f32 %v7496_v2, %v3180_v61  ;;  %v3160_v5 = vpop.f32.mrb[53].mxu0 }
0x174c   :  { %v3181_v6 = vmul.f32 %v3180_v61, %v3160_v5  ;;  %7532 = vmatprep.mubr.f32.mxu1 %v3160_v5 }
0x174d   :  { %v3186_v7 = vadd.f32 %v3182_v4, %v3091_v55  ;;  %7533 = vmatmul.mubr.f32.vlgmr.msra.gmra.mrb[64].mxu1 %v7496_v2 }
0x174e   :  { %v3185_v9 = vadd.f32 %v3181_v6, %v3090_v60  ;;  %v7499_v10 = vpop.f32.mrb[54].mxu0  ;;  %9035 = vmatpush3.bf16.msra.mxu1 %v9889_v42 }
0x174f   :  { %v3184_v12 = vmul.f32 %v7499_v10, %v3180_v61  ;;  %v3170_v14 = vpop.f32.mrb[55].mxu0  ;;  %9037 = vmatprep.subr.bf16.mxu1 %v9899_v47 }
0x1750   :  { %v3183_v15 = vmul.f32 %v3180_v61, %v3170_v14  ;;  %7535 = vmatprep.mubr.f32.mxu1 %v3170_v14 }
0x1751   :  { %v3188_v16 = vadd.f32 %v3184_v12, %v3093_v58  ;;  %7536 = vmatmul.mubr.f32.gmra.mrb[66].mxu1 %v7499_v10  ;;  %v3560_v12 = vstv %s5662_s24 }
0x1752   :  { %v3187_v17 = vadd.f32 %v3183_v15, %v3092_v59  ;;  %9039 = vmatpush3.bf16.msra.mxu1 %v9899_v47 }
0x1753   :  { %9041 = vmatprep.subr.bf16.mxu1 %v9909_v52 }
0x1756   :  { %9043 = vmatpush3.bf16.msra.mxu1 %v9909_v52 }
0x1757   :  { %9045 = vmatprep.subr.bf16.mxu1 %v9919_v57 }
0x175a   :  { %9047 = vmatpush3.bf16.msra.mxu1 %v9919_v57 }
0x175b   :  { %9049 = vmatprep.subr.bf16.mxu1 %v9929_v62 }
0x175e   :  { %9051 = vmatpush3.bf16.msra.mxu1 %v9929_v62 }
0x175f   :  { %9053 = vmatprep.subr.bf16.mxu1 %v9939_v3 }
0x1762   :  { %9055 = vmatpush3.bf16.msra.mxu1 %v9939_v3 }
0x1763   :  { %9057 = vmatprep.subr.bf16.mxu1 %v9949_v8 }
0x1766   :  { %9059 = vmatpush3.bf16.msra.mxu1 %v9949_v8 }
0x1767   :  { %9061 = vmatprep.subr.bf16.mxu1 %v9959_v13 }
0x176a   :  { %9063 = vmatpush3.bf16.msra.mxu1 %v9959_v13 }
0x176b   :  { %9097 = vmatprep.subr.bf16.mxu1 %v9889_v42 }
0x1820   :  { %v7534_v24 = vpop.f32.mrb[64].mxu1 }
0x1821   :  { %v3277_v25 = vmul.f32 %v7534_v24, %v3275_v23  ;;  %v3255_v26 = vpop.f32.mrb[65].mxu1 }
0x1822   :  { %v3276_v27 = vmul.f32 %v3275_v23, %v3255_v26  ;;  %7570 = vmatprep.mubr.f32.mxu0 %v3255_v26 }
0x1823   :  { %v3281_v28 = vadd.f32 %v3277_v25, %v3186_v7  ;;  %7571 = vmatmul.mubr.f32.vlgmr.msra.gmra.mrb[56].mxu0 %v7534_v24 }
0x1824   :  { %v3280_v31 = vadd.f32 %v3276_v27, %v3185_v9  ;;  %v7537_v32 = vpop.f32.mrb[66].mxu1  ;;  %9067 = vmatpush3.bf16.msra.mxu0 %v9889_v42 }
0x1825   :  { %v3279_v33 = vmul.f32 %v7537_v32, %v3275_v23  ;;  %v3265_v34 = vpop.f32.mrb[67].mxu1  ;;  %9069 = vmatprep.subr.bf16.mxu0 %v9899_v47 }
0x1826   :  { %v3278_v35 = vmul.f32 %v3275_v23, %v3265_v34  ;;  %7573 = vmatprep.mubr.f32.mxu0 %v3265_v34 }
0x1827   :  { %v3283_v36 = vadd.f32 %v3279_v33, %v3188_v16  ;;  %7574 = vmatmul.mubr.f32.gmra.mrb[58].mxu0 %v7537_v32 }
0x1828   :  { %v3282_v37 = vadd.f32 %v3278_v35, %v3187_v17  ;;  %9071 = vmatpush3.bf16.msra.mxu0 %v9899_v47 }
0x1829   :  { %9073 = vmatprep.subr.bf16.mxu0 %v9909_v52 }
0x182c   :  { %9075 = vmatpush3.bf16.msra.mxu0 %v9909_v52 }
0x182d   :  { %9077 = vmatprep.subr.bf16.mxu0 %v9919_v57 }
0x1830   :  { %9079 = vmatpush3.bf16.msra.mxu0 %v9919_v57 }
0x1831   :  { %9081 = vmatprep.subr.bf16.mxu0 %v9929_v62 }
0x1834   :  { %9083 = vmatpush3.bf16.msra.mxu0 %v9929_v62 }
0x1835   :  { %9085 = vmatprep.subr.bf16.mxu0 %v9939_v3 }
0x1838   :  { %9087 = vmatpush3.bf16.msra.mxu0 %v9939_v3 }
0x1839   :  { %9089 = vmatprep.subr.bf16.mxu0 %v9949_v8 }
0x183c   :  { %9091 = vmatpush3.bf16.msra.mxu0 %v9949_v8 }
0x183d   :  { %9093 = vmatprep.subr.bf16.mxu0 %v9959_v13 }
0x1840   :  { %9095 = vmatpush3.bf16.msra.mxu0 %v9959_v13 }
0x1841   :  { %9129 = vmatprep.subr.bf16.mxu0 %v9889_v42 }
0x18f6   :  { %v7572_v40 = vpop.f32.mrb[56].mxu0 }
0x18f7   :  { %v3372_v43 = vmul.f32 %v7572_v40, %v3370_v39  ;;  %v3350_v44 = vpop.f32.mrb[57].mxu0 }
0x18f8   :  { %v3371_v46 = vmul.f32 %v3370_v39, %v3350_v44  ;;  %7608 = vmatprep.mubr.f32.mxu1 %v3350_v44 }
0x18f9   :  { %v3376_v48 = vadd.f32 %v3372_v43, %v3281_v28  ;;  %7609 = vmatmul.mubr.f32.vlgmr.msra.gmra.mrb[68].mxu1 %v7572_v40 }
0x18fa   :  { %v3375_v30 = vadd.f32 %v3371_v46, %v3280_v31  ;;  %v7575_v50 = vpop.f32.mrb[58].mxu0  ;;  %9099 = vmatpush3.bf16.msra.mxu1 %v9889_v42 }
0x18fb   :  { %v3374_v51 = vmul.f32 %v7575_v50, %v3370_v39  ;;  %v3360_v53 = vpop.f32.mrb[59].mxu0  ;;  %9101 = vmatprep.subr.bf16.mxu1 %v9899_v47 }
0x18fc   :  { %v3373_v55 = vmul.f32 %v3370_v39, %v3360_v53  ;;  %7611 = vmatprep.mubr.f32.mxu1 %v3360_v53  ;;  %v3750_v39 = vstv %s5664_s6 }
0x18fd   :  { %v3378_v60 = vadd.f32 %v3374_v51, %v3283_v36  ;;  %7612 = vmatmul.mubr.f32.gmra.mrb[70].mxu1 %v7575_v50  ;;  %v2780_v51 = vpop.permute.xlu0 %2779 }
0x18fe   :  { %v3377_v0 = vadd.f32 %v3373_v55, %v3282_v37  ;;  %9103 = vmatpush3.bf16.msra.mxu1 %v9899_v47 }
0x18ff   :  { %9105 = vmatprep.subr.bf16.mxu1 %v9909_v52 }
0x1902   :  { %9107 = vmatpush3.bf16.msra.mxu1 %v9909_v52 }
0x1903   :  { %9109 = vmatprep.subr.bf16.mxu1 %v9919_v57 }
0x1906   :  { %9111 = vmatpush3.bf16.msra.mxu1 %v9919_v57 }
0x1907   :  { %9113 = vmatprep.subr.bf16.mxu1 %v9929_v62 }
0x190a   :  { %9115 = vmatpush3.bf16.msra.mxu1 %v9929_v62 }
0x190b   :  { %9117 = vmatprep.subr.bf16.mxu1 %v9939_v3 }
0x190e   :  { %9119 = vmatpush3.bf16.msra.mxu1 %v9939_v3 }
0x190f   :  { %9121 = vmatprep.subr.bf16.mxu1 %v9949_v8 }
0x1912   :  { %9123 = vmatpush3.bf16.msra.mxu1 %v9949_v8 }
0x1913   :  { %9125 = vmatprep.subr.bf16.mxu1 %v9959_v13 }
0x1916   :  { %9127 = vmatpush3.bf16.msra.mxu1 %v9959_v13 }
0x1917   :  { %9161 = vmatprep.subr.bf16.mxu1 %v9889_v42 }
0x19cc   :  { %v7610_v56 = vpop.f32.mrb[68].mxu1 }
0x19cd   :  { %v3467_v1 = vmul.f32 %v7610_v56, %v3465_v54  ;;  %v3445_v58 = vpop.f32.mrb[69].mxu1 }
0x19ce   :  { %v3466_v59 = vmul.f32 %v3465_v54, %v3445_v58  ;;  %7646 = vmatprep.mubr.f32.mxu0 %v3445_v58 }
0x19cf   :  { %v3471_v61 = vadd.f32 %v3467_v1, %v3376_v48  ;;  %7647 = vmatmul.mubr.f32.vlgmr.msra.gmra.mrb[60].mxu0 %v7610_v56  ;;  %v2790_v1 = vpop.permute.xlu0 %2789 }
0x19d0   :  { %v3470_v2 = vadd.f32 %v3466_v59, %v3375_v30  ;;  %v7613_v4 = vpop.f32.mrb[70].mxu1  ;;  %9131 = vmatpush3.bf16.msra.mxu0 %v9889_v42  ;;  %v10575_v59 = vadd.f32 %v10415_v18, %v2790_v1  ;;  %v9615_v18 = vld [vmem:[%s10811_s12] sm:$0xff]  }
0x19d1   :  { %v3469_v5 = vmul.f32 %v7613_v4, %v3465_v54  ;;  %v3455_v6 = vpop.f32.mrb[71].mxu1  ;;  %9133 = vmatprep.subr.bf16.mxu0 %v9899_v47 }
0x19d2   :  { %v3468_v7 = vmul.f32 %v3465_v54, %v3455_v6  ;;  %7649 = vmatprep.mubr.f32.mxu0 %v3455_v6 }
0x19d3   :  { %v3473_v9 = vadd.f32 %v3469_v5, %v3378_v60  ;;  %7650 = vmatmul.mubr.f32.gmra.mrb[62].mxu0 %v7613_v4  ;;  %v10554_v60 = vadd.f32 %v10418_v20, %v2780_v51  ;;  %v2785_v20 = vpop.permute.xlu1 %2784 }
0x19d4   :  { %v3472_v10 = vadd.f32 %v3468_v7, %v3377_v0  ;;  %9135 = vmatpush3.bf16.msra.mxu0 %v9899_v47  ;;  %v10571_v58 = vadd.f32 %v10422_v22, %v2785_v20 }
0x19d5   :  { %9137 = vmatprep.subr.bf16.mxu0 %v9909_v52 }
0x19d8   :  { %9139 = vmatpush3.bf16.msra.mxu0 %v9909_v52 }
0x19d9   :  { %9141 = vmatprep.subr.bf16.mxu0 %v9919_v57 }
0x19dc   :  { %9143 = vmatpush3.bf16.msra.mxu0 %v9919_v57 }
0x19dd   :  { %9145 = vmatprep.subr.bf16.mxu0 %v9929_v62 }
0x19e0   :  { %9147 = vmatpush3.bf16.msra.mxu0 %v9929_v62 }
0x19e1   :  { %9149 = vmatprep.subr.bf16.mxu0 %v9939_v3 }
0x19e4   :  { %9151 = vmatpush3.bf16.msra.mxu0 %v9939_v3 }
0x19e5   :  { %9153 = vmatprep.subr.bf16.mxu0 %v9949_v8 }
0x19e8   :  { %9155 = vmatpush3.bf16.msra.mxu0 %v9949_v8 }
0x19e9   :  { %9157 = vmatprep.subr.bf16.mxu0 %v9959_v13 }
0x19ec   :  { %9159 = vmatpush3.bf16.msra.mxu0 %v9959_v13 }
0x1aa2   :  { %v7648_v14 = vpop.f32.mrb[60].mxu0 }
0x1aa3   :  { %v3562_v15 = vmul.f32 %v7648_v14, %v3560_v12  ;;  %v3540_v16 = vpop.f32.mrb[61].mxu0 }
0x1aa4   :  { %v3561_v17 = vmul.f32 %v3560_v12, %v3540_v16  ;;  %7684 = vmatprep.mubr.f32.mxu1 %v3540_v16 }
0x1aa5   :  { %v3566_v23 = vadd.f32 %v3562_v15, %v3471_v61  ;;  %7685 = vmatmul.mubr.f32.vlgmr.msra.gmra.mrb[72].mxu1 %v7648_v14  ;;  %v2795_v61 = vpop.permute.xlu1 %2794 }
0x1aa6   :  { %v3565_v24 = vadd.f32 %v3561_v17, %v3470_v2  ;;  %v7651_v25 = vpop.f32.mrb[62].mxu0  ;;  %9163 = vmatpush3.bf16.msra.mxu1 %v9889_v42  ;;  %v3655_v42 = vstv %s5663_s30  ;;  %v10581_v2 = vadd.f32 %v10420_v21, %v2795_v61  ;;  %v3845_v21 = vstv %s5665_s20 }
0x1aa7   :  { %v3564_v26 = vmul.f32 %v7651_v25, %v3560_v12  ;;  %v3550_v27 = vpop.f32.mrb[63].mxu0  ;;  %9165 = vmatprep.subr.bf16.mxu1 %v9899_v47 }
0x1aa8   :  { %v3563_v28 = vmul.f32 %v3560_v12, %v3550_v27  ;;  %7687 = vmatprep.mubr.f32.mxu1 %v3550_v27 }
0x1aa9   :  { %v3568_v31 = vadd.f32 %v3564_v26, %v3473_v9  ;;  %7688 = vmatmul.mubr.f32.gmra.mrb[74].mxu1 %v7651_v25  ;;  %v9616_v25 = vld [vmem:[%s10811_s12 + $0x8] sm:$0xff]  }
0x1aaa   :  { %v3567_v32 = vadd.f32 %v3563_v28, %v3472_v10  ;;  %9167 = vmatpush3.bf16.msra.mxu1 %v9899_v47 }
0x1aab   :  { %9169 = vmatprep.subr.bf16.mxu1 %v9909_v52 }
0x1aae   :  { %9171 = vmatpush3.bf16.msra.mxu1 %v9909_v52 }
0x1aaf   :  { %9173 = vmatprep.subr.bf16.mxu1 %v9919_v57 }
0x1ab2   :  { %9175 = vmatpush3.bf16.msra.mxu1 %v9919_v57 }
0x1ab3   :  { %9177 = vmatprep.subr.bf16.mxu1 %v9929_v62 }
0x1ab6   :  { %9179 = vmatpush3.bf16.msra.mxu1 %v9929_v62 }
0x1ab7   :  { %9181 = vmatprep.subr.bf16.mxu1 %v9939_v3 }
0x1aba   :  { %9183 = vmatpush3.bf16.msra.mxu1 %v9939_v3 }
0x1abb   :  { %9185 = vmatprep.subr.bf16.mxu1 %v9949_v8 }
0x1abe   :  { %9187 = vmatpush3.bf16.msra.mxu1 %v9949_v8 }
0x1abf   :  { %9189 = vmatprep.subr.bf16.mxu1 %v9959_v13 }
0x1ac2   :  { %9191 = vmatpush3.bf16.msra.mxu1 %v9959_v13 }
0x1ac3   :  { %9193 = vmatprep.subr.bf16.mxu1 %v10134_v11 }
0x1b78   :  { %v7686_v47 = vpop.f32.mrb[72].mxu1 }
0x1b79   :  { %v3657_v52 = vmul.f32 %v7686_v47, %v3655_v42  ;;  %v3635_v57 = vpop.f32.mrb[73].mxu1 }
0x1b7a   :  { %v3656_v62 = vmul.f32 %v3655_v42, %v3635_v57  ;;  %7722 = vmatprep.mubr.f32.mxu0 %v3635_v57  ;;  %v4136_v57 = vstv %s5672_s7 }
0x1b7b   :  { %v3661_v33 = vadd.f32 %v3657_v52, %v3566_v23  ;;  %7723 = vmatmul.mubr.f32.vlgmr.msra.gmra.mrb[64].mxu0 %v7686_v47 }
0x1b7c   :  { %v3660_v3 = vadd.f32 %v3656_v62, %v3565_v24  ;;  %v7689_v34 = vpop.f32.mrb[74].mxu1 }
0x1b7d   :  { %v3659_v35 = vmul.f32 %v7689_v34, %v3655_v42  ;;  %v3645_v36 = vpop.f32.mrb[75].mxu1 }
0x1b7e   :  { %v3658_v8 = vmul.f32 %v3655_v42, %v3645_v36  ;;  %7725 = vmatprep.mubr.f32.mxu0 %v3645_v36  ;;  %v3950_v42 = vstv %s5670_s13 }
0x1b7f   :  { %v3663_v37 = vadd.f32 %v3659_v35, %v3568_v31  ;;  %7726 = vmatmul.mubr.f32.gmra.mrb[66].mxu0 %v7689_v34  ;;  %v3952_v62 = vmul.f32 %v3950_v42, %v10571_v58 }
0x1b80   :  { %v3662_v13 = vadd.f32 %v3658_v8, %v3567_v32  ;;  %7770 = vmatprep.mubr.msk.bf16.mxu0 %vm1300_vm2, %v9615_v18  ;;  %v4041_v32 = vstv %s5671_s4 }
0x1c4e   :  { %v7724_v40 = vpop.f32.mrb[64].mxu0 }
0x1c4f   :  { %v3752_v43 = vmul.f32 %v7724_v40, %v3750_v39  ;;  %v3730_v44 = vpop.f32.mrb[65].mxu0 }
0x1c50   :  { %v3751_v46 = vmul.f32 %v3750_v39, %v3730_v44  ;;  %7760 = vmatprep.mubr.f32.mxu1 %v3730_v44  ;;  %v3953_v44 = vmul.f32 %v3950_v42, %v10575_v59 }
0x1c51   :  { %v10549_v48 = vadd.f32 %v3752_v43, %v3661_v33  ;;  %7761 = vmatmul.mubr.f32.vlgmr.msra.gmra.mrb[76].mxu1 %v7724_v40  ;;  %v3951_v33 = vmul.f32 %v3950_v42, %v10554_v60  ;;  %v3954_v40 = vmul.f32 %v3950_v42, %v10581_v2 }
0x1c52   :  { %v3755_v30 = vadd.f32 %v3751_v46, %v3660_v3  ;;  %9195 = vmatpush3.bf16.msra.mxu1 %v10134_v11  ;;  %v7727_v50 = vpop.f32.mrb[66].mxu0 }
0x1c53   :  { %v3754_v53 = vmul.f32 %v7727_v50, %v3750_v39  ;;  %v3740_v55 = vpop.f32.mrb[67].mxu0  ;;  %9197 = vmatprep.subr.bf16.mxu1 %v10139_v19 }
0x1c54   :  { %v3753_v0 = vmul.f32 %v3750_v39, %v3740_v55  ;;  %7763 = vmatprep.mubr.f32.mxu1 %v3740_v55 }
0x1c55   :  { %v3758_v54 = vadd.f32 %v3754_v53, %v3663_v37  ;;  %7764 = vmatmul.mubr.f32.gmra.mrb[78].mxu1 %v7727_v50 }
0x1c56   :  { %v3757_v56 = vadd.f32 %v3753_v0, %v3662_v13  ;;  %9199 = vmatpush3.bf16.msra.mxu1 %v10139_v19  ;;  %7806 = vmatprep.mubr.f32.mxu1 %v10554_v60 }
0x1c57   :  { %9201 = vmatprep.subr.bf16.mxu1 %v10149_v29 }
0x1c5a   :  { %9203 = vmatpush3.bf16.msra.mxu1 %v10149_v29 }
0x1c5b   :  { %9205 = vmatprep.subr.bf16.mxu1 %v10163_v63 }
0x1c5e   :  { %9207 = vmatpush3.bf16.msra.mxu1 %v10163_v63 }
0x1c5f   :  { %9209 = vmatprep.subr.bf16.mxu1 %v10169_v38 }
0x1c62   :  { %9211 = vmatpush3.bf16.msra.mxu1 %v10169_v38 }
0x1c63   :  { %9213 = vmatprep.subr.bf16.mxu1 %v10175_v41 }
0x1c66   :  { %9215 = vmatpush3.bf16.msra.mxu1 %v10175_v41 }
0x1c67   :  { %9217 = vmatprep.subr.bf16.mxu1 %v10181_v45 }
0x1c6a   :  { %9219 = vmatpush3.bf16.msra.mxu1 %v10181_v45 }
0x1c6b   :  { %9221 = vmatprep.subr.bf16.mxu1 %v10187_v49 }
0x1c6e   :  { %9223 = vmatpush3.bf16.msra.mxu1 %v10187_v49 }
0x1c6f   :  { %9257 = vmatprep.subr.bf16.mxu1 %v10134_v11 }
0x1c71   :  { %7807 = vmatmul.mubr.f32.vlgmr.msra.gmra.mrb[80].mxu1 %v10571_v58 }
0x1c72   :  { %7809 = vmatprep.mubr.f32.mxu1 %v10575_v59  ;;  %9259 = vmatpush3.bf16.msra.mxu1 %v10134_v11 }
0x1c73   :  { %9261 = vmatprep.subr.bf16.mxu1 %v10139_v19 }
0x1c75   :  { %7810 = vmatmul.mubr.f32.gmra.mrb[82].mxu1 %v10581_v2 }
0x1c76   :  { %9263 = vmatpush3.bf16.msra.mxu1 %v10139_v19 }
0x1c77   :  { %9265 = vmatprep.subr.bf16.mxu1 %v10149_v29 }
0x1c7a   :  { %9267 = vmatpush3.bf16.msra.mxu1 %v10149_v29 }
0x1c7b   :  { %9269 = vmatprep.subr.bf16.mxu1 %v10163_v63 }
0x1c7e   :  { %9271 = vmatpush3.bf16.msra.mxu1 %v10163_v63 }
0x1c7f   :  { %9273 = vmatprep.subr.bf16.mxu1 %v10169_v38 }
0x1c82   :  { %9275 = vmatpush3.bf16.msra.mxu1 %v10169_v38 }
0x1c83   :  { %9277 = vmatprep.subr.bf16.mxu1 %v10175_v41 }
0x1c86   :  { %9279 = vmatpush3.bf16.msra.mxu1 %v10175_v41 }
0x1c87   :  { %9281 = vmatprep.subr.bf16.mxu1 %v10181_v45 }
0x1c8a   :  { %9283 = vmatpush3.bf16.msra.mxu1 %v10181_v45 }
0x1c8b   :  { %9285 = vmatprep.subr.bf16.mxu1 %v10187_v49 }
0x1c8e   :  { %9287 = vmatpush3.bf16.msra.mxu1 %v10187_v49 }
0x1c8f   :  { %9321 = vmatprep.subr.bf16.mxu1 %v10134_v11 }
0x1d24   :  { %v7762_v22 = vpop.f32.mrb[76].mxu1 }
0x1d25   :  { %v3847_v4 = vmul.f32 %v7762_v22, %v3845_v21  ;;  %v3825_v5 = vpop.f32.mrb[77].mxu1 }
0x1d26   :  { %v3846_v6 = vmul.f32 %v3845_v21, %v3825_v5 }
0x1d27   :  { %v3851_v7 = vadd.f32 %v3847_v4, %v10549_v48 }
0x1d28   :  { %v3850_v9 = vadd.f32 %v3846_v6, %v3755_v30  ;;  %v7765_v10 = vpop.f32.mrb[78].mxu1  ;;  %v4326_v6 = vstv %s5674_s11 }
0x1d29   :  { %v3849_v12 = vmul.f32 %v7765_v10, %v3845_v21  ;;  %v3835_v14 = vpop.f32.mrb[79].mxu1 }
0x1d2a   :  { %v3848_v15 = vmul.f32 %v3845_v21, %v3835_v14  ;;  %v3858_v16 = vpack.c.bf16 %v3851_v7, %v3850_v9 }
0x1d2b   :  { %v3853_v17 = vadd.f32 %v3849_v12, %v3758_v54  ;;  %v4231_v54 = vstv %s5673_s10 }
0x1d2c   :  { %v3852_v23 = vadd.f32 %v3848_v15, %v3757_v56  ;;  %7766 = vmatprep.subr.bf16.mxu0 %v3858_v16 }
0x1d2d   :  { %7767 = vmatpush3.bf16.msra.mxu0 %v3858_v16 }
0x1d2e   :  { %v3859_v24 = vpack.c.bf16 %v3853_v17, %v3852_v23 }
0x1d30   :  { %7768 = vmatprep.subr.bf16.mxu0 %v3859_v24 }
0x1d31   :  { %7769 = vmatpush3.bf16.msra.mxu0 %v3859_v24 }
0x1d32   :  { %9225 = vmatprep.subr.bf16.mxu0 %v10134_v11 }
0x1d34   :  { %7771 = vmatmul.mubr.msk.bf16.vlgmr.msra.gmra.mrb[68].mxu0 %vm1300_vm2, %v9616_v25 }
0x1d35   :  { %9227 = vmatpush3.bf16.msra.mxu0 %v10134_v11 }
0x1d36   :  { %9229 = vmatprep.subr.bf16.mxu0 %v10139_v19 }
0x1d39   :  { %9231 = vmatpush3.bf16.msra.mxu0 %v10139_v19 }
0x1d3a   :  { %9233 = vmatprep.subr.bf16.mxu0 %v10149_v29 }
0x1d3d   :  { %9235 = vmatpush3.bf16.msra.mxu0 %v10149_v29 }
0x1d3e   :  { %9237 = vmatprep.subr.bf16.mxu0 %v10163_v63 }
0x1d41   :  { %9239 = vmatpush3.bf16.msra.mxu0 %v10163_v63 }
0x1d42   :  { %9241 = vmatprep.subr.bf16.mxu0 %v10169_v38 }
0x1d44   :  { %v7808_v26 = vpop.f32.mrb[80].mxu1 }
0x1d45   :  { %v4021_v27 = vpop.f32.mrb[81].mxu1  ;;  %9243 = vmatpush3.bf16.msra.mxu0 %v10169_v38  ;;  %v4043_v47 = vmul.f32 %v7808_v26, %v4041_v32 }
0x1d46   :  { %7844 = vmatprep.mubr.f32.mxu0 %v4021_v27  ;;  %9245 = vmatprep.subr.bf16.mxu0 %v10175_v41  ;;  %v4042_v52 = vmul.f32 %v4041_v32, %v4021_v27  ;;  %v4421_v27 = vstv %s5675_s15 }
0x1d47   :  { %v4047_v34 = vadd.f32 %v4043_v47, %v3952_v62 }
0x1d48   :  { %v7811_v28 = vpop.f32.mrb[82].mxu1  ;;  %v4046_v37 = vadd.f32 %v4042_v52, %v3951_v33 }
0x1d49   :  { %v4031_v31 = vpop.f32.mrb[83].mxu1  ;;  %9247 = vmatpush3.bf16.msra.mxu0 %v10175_v41  ;;  %v4045_v35 = vmul.f32 %v7811_v28, %v4041_v32 }
0x1d4a   :  { %9249 = vmatprep.subr.bf16.mxu0 %v10181_v45  ;;  %v4044_v13 = vmul.f32 %v4041_v32, %v4031_v31 }
0x1d4b   :  { %v4049_v30 = vadd.f32 %v4045_v35, %v3954_v40 }
0x1d4c   :  { %v4048_v53 = vadd.f32 %v4044_v13, %v3953_v44 }
0x1d4d   :  { %9251 = vmatpush3.bf16.msra.mxu0 %v10181_v45 }
0x1d4e   :  { %9253 = vmatprep.subr.bf16.mxu0 %v10187_v49 }
0x1d51   :  { %9255 = vmatpush3.bf16.msra.mxu0 %v10187_v49 }
0x1d52   :  { %9289 = vmatprep.subr.bf16.mxu0 %v10134_v11 }
0x1d54   :  { %7845 = vmatmul.mubr.f32.vlgmr.msra.gmra.mrb[72].mxu0 %v7808_v26 }
0x1d55   :  { %7847 = vmatprep.mubr.f32.mxu0 %v4031_v31  ;;  %9291 = vmatpush3.bf16.msra.mxu0 %v10134_v11 }
0x1d56   :  { %9293 = vmatprep.subr.bf16.mxu0 %v10139_v19 }
0x1d58   :  { %7848 = vmatmul.mubr.f32.gmra.mrb[74].mxu0 %v7811_v28 }
0x1d59   :  { %9295 = vmatpush3.bf16.msra.mxu0 %v10139_v19 }
0x1d5a   :  { %9297 = vmatprep.subr.bf16.mxu0 %v10149_v29 }
0x1d5d   :  { %9299 = vmatpush3.bf16.msra.mxu0 %v10149_v29 }
0x1d5e   :  { %9301 = vmatprep.subr.bf16.mxu0 %v10163_v63 }
0x1d61   :  { %9303 = vmatpush3.bf16.msra.mxu0 %v10163_v63 }
0x1d62   :  { %9305 = vmatprep.subr.bf16.mxu0 %v10169_v38 }
0x1d65   :  { %9307 = vmatpush3.bf16.msra.mxu0 %v10169_v38 }
0x1d66   :  { %9309 = vmatprep.subr.bf16.mxu0 %v10175_v41 }
0x1d69   :  { %9311 = vmatpush3.bf16.msra.mxu0 %v10175_v41 }
0x1d6a   :  { %9313 = vmatprep.subr.bf16.mxu0 %v10181_v45 }
0x1d6d   :  { %9315 = vmatpush3.bf16.msra.mxu0 %v10181_v45 }
0x1d6e   :  { %9317 = vmatprep.subr.bf16.mxu0 %v10187_v49 }
0x1d71   :  { %9319 = vmatpush3.bf16.msra.mxu0 %v10187_v49 }
0x1d72   :  { %9353 = vmatprep.subr.bf16.mxu0 %v10134_v11 }
0x1e27   :  { %v7846_v3 = vpop.f32.mrb[72].mxu0 }
0x1e28   :  { %v4138_v36 = vmul.f32 %v7846_v3, %v4136_v57  ;;  %v4116_v8 = vpop.f32.mrb[73].mxu0 }
0x1e29   :  { %v4137_v39 = vmul.f32 %v4136_v57, %v4116_v8  ;;  %7882 = vmatprep.mubr.f32.mxu1 %v4116_v8 }
0x1e2a   :  { %v4142_v43 = vadd.f32 %v4138_v36, %v4047_v34  ;;  %7883 = vmatmul.mubr.f32.vlgmr.msra.gmra.mrb[84].mxu1 %v7846_v3  ;;  %v4516_v36 = vstv %s5676_s16 }
0x1e2b   :  { %v4141_v46 = vadd.f32 %v4137_v39, %v4046_v37  ;;  %v7849_v48 = vpop.f32.mrb[74].mxu0  ;;  %9323 = vmatpush3.bf16.msra.mxu1 %v10134_v11 }
0x1e2c   :  { %v4140_v50 = vmul.f32 %v7849_v48, %v4136_v57  ;;  %v4126_v51 = vpop.f32.mrb[75].mxu0  ;;  %9325 = vmatprep.subr.bf16.mxu1 %v10139_v19 }
0x1e2d   :  { %v4139_v55 = vmul.f32 %v4136_v57, %v4126_v51  ;;  %7885 = vmatprep.mubr.f32.mxu1 %v4126_v51 }
0x1e2e   :  { %v4144_v60 = vadd.f32 %v4140_v50, %v4049_v30  ;;  %7886 = vmatmul.mubr.f32.gmra.mrb[86].mxu1 %v7849_v48 }
0x1e2f   :  { %v4143_v0 = vadd.f32 %v4139_v55, %v4048_v53  ;;  %9327 = vmatpush3.bf16.msra.mxu1 %v10139_v19  ;;  %v4611_v53 = vstv %s5677_s18 }
0x1e30   :  { %9329 = vmatprep.subr.bf16.mxu1 %v10149_v29 }
0x1e33   :  { %9331 = vmatpush3.bf16.msra.mxu1 %v10149_v29 }
0x1e34   :  { %9333 = vmatprep.subr.bf16.mxu1 %v10163_v63 }
0x1e37   :  { %9335 = vmatpush3.bf16.msra.mxu1 %v10163_v63 }
0x1e38   :  { %9337 = vmatprep.subr.bf16.mxu1 %v10169_v38 }
0x1e3b   :  { %9339 = vmatpush3.bf16.msra.mxu1 %v10169_v38 }
0x1e3c   :  { %9341 = vmatprep.subr.bf16.mxu1 %v10175_v41 }
0x1e3f   :  { %9343 = vmatpush3.bf16.msra.mxu1 %v10175_v41 }
0x1e40   :  { %9345 = vmatprep.subr.bf16.mxu1 %v10181_v45 }
0x1e43   :  { %9347 = vmatpush3.bf16.msra.mxu1 %v10181_v45 }
0x1e44   :  { %9349 = vmatprep.subr.bf16.mxu1 %v10187_v49 }
0x1e47   :  { %9351 = vmatpush3.bf16.msra.mxu1 %v10187_v49 }
0x1e48   :  { %9385 = vmatprep.subr.bf16.mxu1 %v10134_v11 }
0x1efd   :  { %v7884_v56 = vpop.f32.mrb[84].mxu1 }
0x1efe   :  { %v4233_v20 = vmul.f32 %v7884_v56, %v4231_v54  ;;  %v4211_v1 = vpop.f32.mrb[85].mxu1 }
0x1eff   :  { %v4232_v58 = vmul.f32 %v4231_v54, %v4211_v1  ;;  %7920 = vmatprep.mubr.f32.mxu0 %v4211_v1 }
0x1f00   :  { %v4237_v59 = vadd.f32 %v4233_v20, %v4142_v43  ;;  %7921 = vmatmul.mubr.f32.vlgmr.msra.gmra.mrb[76].mxu0 %v7884_v56 }
0x1f01   :  { %v4236_v61 = vadd.f32 %v4232_v58, %v4141_v46  ;;  %v7887_v2 = vpop.f32.mrb[86].mxu1  ;;  %9355 = vmatpush3.bf16.msra.mxu0 %v10134_v11 }
0x1f02   :  { %v4235_v18 = vmul.f32 %v7887_v2, %v4231_v54  ;;  %v4221_v21 = vpop.f32.mrb[87].mxu1  ;;  %9357 = vmatprep.subr.bf16.mxu0 %v10139_v19 }
0x1f03   :  { %v4234_v22 = vmul.f32 %v4231_v54, %v4221_v21  ;;  %7923 = vmatprep.mubr.f32.mxu0 %v4221_v21 }
0x1f04   :  { %v4239_v4 = vadd.f32 %v4235_v18, %v4144_v60  ;;  %7924 = vmatmul.mubr.f32.gmra.mrb[78].mxu0 %v7887_v2 }
0x1f05   :  { %v4238_v5 = vadd.f32 %v4234_v22, %v4143_v0  ;;  %9359 = vmatpush3.bf16.msra.mxu0 %v10139_v19 }
0x1f06   :  { %9361 = vmatprep.subr.bf16.mxu0 %v10149_v29 }
0x1f09   :  { %9363 = vmatpush3.bf16.msra.mxu0 %v10149_v29 }
0x1f0a   :  { %9365 = vmatprep.subr.bf16.mxu0 %v10163_v63 }
0x1f0d   :  { %9367 = vmatpush3.bf16.msra.mxu0 %v10163_v63 }
0x1f0e   :  { %9369 = vmatprep.subr.bf16.mxu0 %v10169_v38 }
0x1f11   :  { %9371 = vmatpush3.bf16.msra.mxu0 %v10169_v38 }
0x1f12   :  { %9373 = vmatprep.subr.bf16.mxu0 %v10175_v41 }
0x1f15   :  { %9375 = vmatpush3.bf16.msra.mxu0 %v10175_v41 }
0x1f16   :  { %9377 = vmatprep.subr.bf16.mxu0 %v10181_v45 }
0x1f19   :  { %9379 = vmatpush3.bf16.msra.mxu0 %v10181_v45 }
0x1f1a   :  { %9381 = vmatprep.subr.bf16.mxu0 %v10187_v49 }
0x1f1d   :  { %9383 = vmatpush3.bf16.msra.mxu0 %v10187_v49 }
0x1f1e   :  { %9417 = vmatprep.subr.bf16.mxu0 %v10134_v11 }
0x1fd3   :  { %v7922_v7 = vpop.f32.mrb[76].mxu0 }
0x1fd4   :  { %v4328_v9 = vmul.f32 %v7922_v7, %v4326_v6  ;;  %v4306_v10 = vpop.f32.mrb[77].mxu0 }
0x1fd5   :  { %v4327_v12 = vmul.f32 %v4326_v6, %v4306_v10  ;;  %7958 = vmatprep.mubr.f32.mxu1 %v4306_v10 }
0x1fd6   :  { %v4332_v14 = vadd.f32 %v4328_v9, %v4237_v59  ;;  %7959 = vmatmul.mubr.f32.vlgmr.msra.gmra.mrb[88].mxu1 %v7922_v7 }
0x1fd7   :  { %v4331_v15 = vadd.f32 %v4327_v12, %v4236_v61  ;;  %v7925_v16 = vpop.f32.mrb[78].mxu0  ;;  %9387 = vmatpush3.bf16.msra.mxu1 %v10134_v11 }
0x1fd8   :  { %v4330_v17 = vmul.f32 %v7925_v16, %v4326_v6  ;;  %v4316_v23 = vpop.f32.mrb[79].mxu0  ;;  %9389 = vmatprep.subr.bf16.mxu1 %v10139_v19 }
0x1fd9   :  { %v4329_v24 = vmul.f32 %v4326_v6, %v4316_v23  ;;  %7961 = vmatprep.mubr.f32.mxu1 %v4316_v23 }
0x1fda   :  { %v4334_v25 = vadd.f32 %v4330_v17, %v4239_v4  ;;  %7962 = vmatmul.mubr.f32.gmra.mrb[90].mxu1 %v7925_v16 }
0x1fdb   :  { %v4333_v26 = vadd.f32 %v4329_v24, %v4238_v5  ;;  %9391 = vmatpush3.bf16.msra.mxu1 %v10139_v19 }
0x1fdc   :  { %9393 = vmatprep.subr.bf16.mxu1 %v10149_v29 }
0x1fdf   :  { %9395 = vmatpush3.bf16.msra.mxu1 %v10149_v29 }
0x1fe0   :  { %9397 = vmatprep.subr.bf16.mxu1 %v10163_v63 }
0x1fe3   :  { %9399 = vmatpush3.bf16.msra.mxu1 %v10163_v63 }
0x1fe4   :  { %9401 = vmatprep.subr.bf16.mxu1 %v10169_v38 }
0x1fe7   :  { %9403 = vmatpush3.bf16.msra.mxu1 %v10169_v38 }
0x1fe8   :  { %9405 = vmatprep.subr.bf16.mxu1 %v10175_v41 }
0x1feb   :  { %9407 = vmatpush3.bf16.msra.mxu1 %v10175_v41 }
0x1fec   :  { %9409 = vmatprep.subr.bf16.mxu1 %v10181_v45 }
0x1fef   :  { %9411 = vmatpush3.bf16.msra.mxu1 %v10181_v45 }
0x1ff0   :  { %9413 = vmatprep.subr.bf16.mxu1 %v10187_v49 }
0x1ff3   :  { %9415 = vmatpush3.bf16.msra.mxu1 %v10187_v49 }
0x1ff4   :  { %9449 = vmatprep.subr.bf16.mxu1 %v10134_v11 }
0x20a9   :  { %v7960_v28 = vpop.f32.mrb[88].mxu1 }
0x20aa   :  { %v4423_v31 = vmul.f32 %v7960_v28, %v4421_v27  ;;  %v4401_v32 = vpop.f32.mrb[89].mxu1 }
0x20ab   :  { %v4422_v42 = vmul.f32 %v4421_v27, %v4401_v32  ;;  %7996 = vmatprep.mubr.f32.mxu0 %v4401_v32 }
0x20ac   :  { %v4427_v47 = vadd.f32 %v4423_v31, %v4332_v14  ;;  %7997 = vmatmul.mubr.f32.vlgmr.msra.gmra.mrb[80].mxu0 %v7960_v28  ;;  %v9617_v28 = vld [vmem:[%s10811_s12 + $0x10] sm:$0xff]   ;;  %v4896_v31 = vstv %s5680_s26 }
0x20ad   :  { %v4426_v52 = vadd.f32 %v4422_v42, %v4331_v15  ;;  %v7963_v57 = vpop.f32.mrb[90].mxu1  ;;  %9419 = vmatpush3.bf16.msra.mxu0 %v10134_v11 }
0x20ae   :  { %v4425_v62 = vmul.f32 %v7963_v57, %v4421_v27  ;;  %v4411_v33 = vpop.f32.mrb[91].mxu1  ;;  %9421 = vmatprep.subr.bf16.mxu0 %v10139_v19 }
0x20af   :  { %v4424_v3 = vmul.f32 %v4421_v27, %v4411_v33  ;;  %7999 = vmatprep.mubr.f32.mxu0 %v4411_v33 }
0x20b0   :  { %v4429_v34 = vadd.f32 %v4425_v62, %v4334_v25  ;;  %8000 = vmatmul.mubr.f32.gmra.mrb[82].mxu0 %v7963_v57 }
0x20b1   :  { %v4428_v35 = vadd.f32 %v4424_v3, %v4333_v26  ;;  %9423 = vmatpush3.bf16.msra.mxu0 %v10139_v19 }
0x20b2   :  { %9425 = vmatprep.subr.bf16.mxu0 %v10149_v29 }
0x20b5   :  { %9427 = vmatpush3.bf16.msra.mxu0 %v10149_v29 }
0x20b6   :  { %9429 = vmatprep.subr.bf16.mxu0 %v10163_v63 }
0x20b9   :  { %9431 = vmatpush3.bf16.msra.mxu0 %v10163_v63 }
0x20ba   :  { %9433 = vmatprep.subr.bf16.mxu0 %v10169_v38 }
0x20bd   :  { %9435 = vmatpush3.bf16.msra.mxu0 %v10169_v38 }
0x20be   :  { %9437 = vmatprep.subr.bf16.mxu0 %v10175_v41 }
0x20c1   :  { %9439 = vmatpush3.bf16.msra.mxu0 %v10175_v41 }
0x20c2   :  { %9441 = vmatprep.subr.bf16.mxu0 %v10181_v45 }
0x20c5   :  { %9443 = vmatpush3.bf16.msra.mxu0 %v10181_v45 }
0x20c6   :  { %9445 = vmatprep.subr.bf16.mxu0 %v10187_v49 }
0x20c9   :  { %9447 = vmatpush3.bf16.msra.mxu0 %v10187_v49 }
0x20ca   :  { %9481 = vmatprep.subr.bf16.mxu0 %v10134_v11 }
0x217f   :  { %v7998_v8 = vpop.f32.mrb[80].mxu0 }
0x2180   :  { %v4518_v37 = vmul.f32 %v7998_v8, %v4516_v36  ;;  %v4496_v13 = vpop.f32.mrb[81].mxu0 }
0x2181   :  { %v4517_v39 = vmul.f32 %v4516_v36, %v4496_v13  ;;  %8034 = vmatprep.mubr.f32.mxu1 %v4496_v13 }
0x2182   :  { %v4522_v40 = vadd.f32 %v4518_v37, %v4427_v47  ;;  %8035 = vmatmul.mubr.f32.vlgmr.msra.gmra.mrb[92].mxu1 %v7998_v8 }
0x2183   :  { %v4521_v43 = vadd.f32 %v4517_v39, %v4426_v52  ;;  %v8001_v44 = vpop.f32.mrb[82].mxu0  ;;  %9451 = vmatpush3.bf16.msra.mxu1 %v10134_v11  ;;  %v9618_v39 = vld [vmem:[%s10811_s12 + $0x18] sm:$0xff]  }
0x2184   :  { %v4520_v46 = vmul.f32 %v8001_v44, %v4516_v36  ;;  %v4506_v48 = vpop.f32.mrb[83].mxu0  ;;  %9453 = vmatprep.subr.bf16.mxu1 %v10139_v19 }
0x2185   :  { %v4519_v30 = vmul.f32 %v4516_v36, %v4506_v48  ;;  %8037 = vmatprep.mubr.f32.mxu1 %v4506_v48 }
0x2186   :  { %v4524_v50 = vadd.f32 %v4520_v46, %v4429_v34  ;;  %8038 = vmatmul.mubr.f32.gmra.mrb[94].mxu1 %v8001_v44  ;;  %v3928_v44 = vpop.permute.xlu0 %3927 }
0x2187   :  { %v4523_v51 = vadd.f32 %v4519_v30, %v4428_v35  ;;  %9455 = vmatpush3.bf16.msra.mxu1 %v10139_v19 }
0x2188   :  { %9457 = vmatprep.subr.bf16.mxu1 %v10149_v29 }
0x218b   :  { %9459 = vmatpush3.bf16.msra.mxu1 %v10149_v29 }
0x218c   :  { %9461 = vmatprep.subr.bf16.mxu1 %v10163_v63 }
0x218f   :  { %9463 = vmatpush3.bf16.msra.mxu1 %v10163_v63 }
0x2190   :  { %9465 = vmatprep.subr.bf16.mxu1 %v10169_v38 }
0x2193   :  { %9467 = vmatpush3.bf16.msra.mxu1 %v10169_v38 }
0x2194   :  { %9469 = vmatprep.subr.bf16.mxu1 %v10175_v41 }
0x2197   :  { %9471 = vmatpush3.bf16.msra.mxu1 %v10175_v41 }
0x2198   :  { %9473 = vmatprep.subr.bf16.mxu1 %v10181_v45 }
0x219b   :  { %9475 = vmatpush3.bf16.msra.mxu1 %v10181_v45 }
0x219c   :  { %9477 = vmatprep.subr.bf16.mxu1 %v10187_v49 }
0x219f   :  { %9479 = vmatpush3.bf16.msra.mxu1 %v10187_v49 }
0x2255   :  { %v8036_v55 = vpop.f32.mrb[92].mxu1 }
0x2256   :  { %v4613_v60 = vmul.f32 %v8036_v55, %v4611_v53  ;;  %v4591_v0 = vpop.f32.mrb[93].mxu1 }
0x2257   :  { %v4612_v54 = vmul.f32 %v4611_v53, %v4591_v0  ;;  %8072 = vmatprep.mubr.f32.mxu0 %v4591_v0 }
0x2258   :  { %v4617_v56 = vadd.f32 %v4613_v60, %v4522_v40  ;;  %8073 = vmatmul.mubr.f32.vlgmr.msra.gmra.mrb[84].mxu0 %v8036_v55  ;;  %v9619_v40 = vld [vmem:[%s10812_s28] sm:$0xff]  }
0x2259   :  { %v4616_v20 = vadd.f32 %v4612_v54, %v4521_v43  ;;  %v8039_v1 = vpop.f32.mrb[94].mxu1  ;;  %9483 = vmatpush3.bf16.msra.mxu0 %v10134_v11  ;;  %v4706_v11 = vstv %s5678_s22  ;;  %v3933_v43 = vpop.permute.xlu1 %3932 }
0x225a   :  { %v4615_v58 = vmul.f32 %v8039_v1, %v4611_v53  ;;  %v4601_v59 = vpop.f32.mrb[95].mxu1  ;;  %9485 = vmatprep.subr.bf16.mxu0 %v10139_v19 }
0x225b   :  { %v4614_v61 = vmul.f32 %v4611_v53, %v4601_v59  ;;  %8075 = vmatprep.mubr.f32.mxu0 %v4601_v59  ;;  %v5291_v59 = vld [vmem:[%s10814_s2] sm:$0xff] }
0x225c   :  { %v4619_v2 = vadd.f32 %v4615_v58, %v4524_v50  ;;  %8076 = vmatmul.mubr.f32.gmra.mrb[86].mxu0 %v8039_v1  ;;  %v3938_v50 = vpop.permute.xlu0 %3937  ;;  %v9620_v1 = vld [vmem:[%s10812_s28 + $0x8] sm:$0xff]   ;;  %v9621_v58 = vld [vmem:[%s10813_s1] sm:$0xff]  }
0x225d   :  { %v4618_v18 = vadd.f32 %v4614_v61, %v4523_v51  ;;  %9487 = vmatpush3.bf16.msra.mxu0 %v10139_v19  ;;  %v3943_v48 = vpop.permute.xlu1 %3942  ;;  %v5292_v61 = vld [vmem:[%s10814_s2 + $0x8] sm:$0xff] }
0x225e   :  { %9489 = vmatprep.subr.bf16.mxu0 %v10149_v29 }
0x2261   :  { %9491 = vmatpush3.bf16.msra.mxu0 %v10149_v29 }
0x2262   :  { %9493 = vmatprep.subr.bf16.mxu0 %v10163_v63 }
0x2265   :  { %9495 = vmatpush3.bf16.msra.mxu0 %v10163_v63 }
0x2266   :  { %9497 = vmatprep.subr.bf16.mxu0 %v10169_v38 }
0x2269   :  { %9499 = vmatpush3.bf16.msra.mxu0 %v10169_v38 }
0x226a   :  { %9501 = vmatprep.subr.bf16.mxu0 %v10175_v41 }
0x226d   :  { %9503 = vmatpush3.bf16.msra.mxu0 %v10175_v41 }
0x226e   :  { %9505 = vmatprep.subr.bf16.mxu0 %v10181_v45 }
0x2271   :  { %9507 = vmatpush3.bf16.msra.mxu0 %v10181_v45 }
0x2272   :  { %9509 = vmatprep.subr.bf16.mxu0 %v10187_v49 }
0x2275   :  { %9511 = vmatpush3.bf16.msra.mxu0 %v10187_v49  ;;  %v4801_v49 = vstv %s5679_s23 }
0x232b   :  { %v8074_v19 = vpop.f32.mrb[84].mxu0 }
0x232c   :  { %v4708_v29 = vmul.f32 %v8074_v19, %v4706_v11  ;;  %v4686_v63 = vpop.f32.mrb[85].mxu0 }
0x232d   :  { %v4707_v21 = vmul.f32 %v4706_v11, %v4686_v63  ;;  %8110 = vmatprep.mubr.f32.mxu1 %v4686_v63  ;;  %v5296_v63 = vld [vmem:[%s10814_s2 + $0x28] sm:$0xff] }
0x232e   :  { %v4712_v38 = vadd.f32 %v4708_v29, %v4617_v56  ;;  %8111 = vmatmul.mubr.f32.vlgmr.msra.gmra.mrb[96].mxu1 %v8074_v19  ;;  %v5295_v29 = vld [vmem:[%s10814_s2 + $0x20] sm:$0xff] }
0x232f   :  { %v4711_v22 = vadd.f32 %v4707_v21, %v4616_v20  ;;  %v8077_v4 = vpop.f32.mrb[86].mxu0  ;;  %v9520_v21 = vpack.c.bf16 %v5296_v63, %v5295_v29 }
0x2330   :  { %v4710_v41 = vmul.f32 %v8077_v4, %v4706_v11  ;;  %v4696_v5 = vpop.f32.mrb[87].mxu0 }
0x2331   :  { %v4709_v6 = vmul.f32 %v4706_v11, %v4696_v5  ;;  %8113 = vmatprep.mubr.f32.mxu1 %v4696_v5  ;;  %v5294_v11 = vld [vmem:[%s10814_s2 + $0x18] sm:$0xff]  ;;  %v5300_v5 = vld [vmem:[%s10814_s2 + $0x48] sm:$0xff] }
0x2332   :  { %v4714_v45 = vadd.f32 %v4710_v41, %v4619_v2  ;;  %8114 = vmatmul.mubr.f32.gmra.mrb[98].mxu1 %v8077_v4  ;;  %v5293_v2 = vld [vmem:[%s10814_s2 + $0x10] sm:$0xff]  ;;  %v5299_v41 = vld [vmem:[%s10814_s2 + $0x40] sm:$0xff] }
0x2333   :  { %v4713_v7 = vadd.f32 %v4709_v6, %v4618_v18  ;;  %8166 = vmatprep.mubr.msk.bf16.mxu1 %vm1300_vm2, %v9619_v40  ;;  %v9512_v18 = vpack.c.bf16 %v5292_v61, %v5291_v59  ;;  %v9516_v19 = vpack.c.bf16 %v5294_v11, %v5293_v2  ;;  %v9528_v6 = vpack.c.bf16 %v5300_v5, %v5299_v41 }
0x2401   :  { %v8112_v9 = vpop.f32.mrb[96].mxu1 }
0x2402   :  { %v4803_v10 = vmul.f32 %v8112_v9, %v4801_v49  ;;  %v4781_v12 = vpop.f32.mrb[97].mxu1 }
0x2403   :  { %v4802_v14 = vmul.f32 %v4801_v49, %v4781_v12  ;;  %8148 = vmatprep.mubr.f32.mxu0 %v4781_v12 }
0x2404   :  { %v4807_v15 = vadd.f32 %v4803_v10, %v4712_v38  ;;  %8149 = vmatmul.mubr.f32.vlgmr.msra.gmra.mrb[88].mxu0 %v8112_v9  ;;  %v5297_v38 = vld [vmem:[%s10814_s2 + $0x30] sm:$0xff] }
0x2405   :  { %v4806_v16 = vadd.f32 %v4802_v14, %v4711_v22  ;;  %v8115_v17 = vpop.f32.mrb[98].mxu1  ;;  %v5298_v22 = vld [vmem:[%s10814_s2 + $0x38] sm:$0xff] }
0x2406   :  { %v4805_v23 = vmul.f32 %v8115_v17, %v4801_v49  ;;  %v4791_v24 = vpop.f32.mrb[99].mxu1  ;;  %v9524_v4 = vpack.c.bf16 %v5298_v22, %v5297_v38 }
0x2407   :  { %v4804_v25 = vmul.f32 %v4801_v49, %v4791_v24  ;;  %8151 = vmatprep.mubr.f32.mxu0 %v4791_v24 }
0x2408   :  { %v4809_v26 = vadd.f32 %v4805_v23, %v4714_v45  ;;  %8152 = vmatmul.mubr.f32.gmra.mrb[90].mxu0 %v8115_v17  ;;  %v4994_v45 = vpop.permute.xlu0 %4993 }
0x2409   :  { %v4808_v27 = vadd.f32 %v4804_v25, %v4713_v7  ;;  %8158 = vmatprep.mubr.msk.bf16.mxu0 %vm1300_vm2, %v9617_v28  ;;  %v4999_v7 = vpop.permute.xlu1 %4998 }
0x240c   :  { %v5083_v49 = vpop.permute.xlu0 %5082 }
0x240d   :  { %v5088_v9 = vpop.permute.xlu1 %5087 }
0x2410   :  { %v5004_v10 = vpop.permute.xlu0 %5003 }
0x2411   :  { %v5009_v12 = vpop.permute.xlu1 %5008 }
0x2414   :  { %v5111_v14 = vpop.permute.xlu0 %5110 }
0x24d7   :  { %v8150_v32 = vpop.f32.mrb[88].mxu0 }
0x24d8   :  { %v4898_v42 = vmul.f32 %v8150_v32, %v4896_v31  ;;  %v4876_v47 = vpop.f32.mrb[89].mxu0 }
0x24d9   :  { %v4897_v52 = vmul.f32 %v4896_v31, %v4876_v47 }
0x24da   :  { %v4902_v57 = vadd.f32 %v4898_v42, %v4807_v15  ;;  %v5116_v15 = vpop.permute.xlu1 %5115 }
0x24db   :  { %v4901_v62 = vadd.f32 %v4897_v52, %v4806_v16  ;;  %v8153_v33 = vpop.f32.mrb[90].mxu0  ;;  %v5093_v16 = vpop.permute.xlu0 %5092 }
0x24dc   :  { %v4900_v3 = vmul.f32 %v8153_v33, %v4896_v31  ;;  %v4886_v34 = vpop.f32.mrb[91].mxu0 }
0x24dd   :  { %v4899_v35 = vmul.f32 %v4896_v31, %v4886_v34  ;;  %v4910_v36 = vpack.c.bf16 %v4902_v57, %v4901_v62 }
0x24de   :  { %v4904_v8 = vadd.f32 %v4900_v3, %v4809_v26  ;;  %v5098_v17 = vpop.permute.xlu1 %5097 }
0x24df   :  { %v4903_v37 = vadd.f32 %v4899_v35, %v4808_v27  ;;  %8154 = vmatprep.subr.bf16.mxu0 %v4910_v36  ;;  %v5121_v42 = vpop.permute.xlu0 %5120 }
0x24e0   :  { %8155 = vmatpush3.bf16.msra.mxu0 %v4910_v36 }
0x24e1   :  { %v4911_v13 = vpack.c.bf16 %v4904_v8, %v4903_v37 }
0x24e2   :  { %v5126_v33 = vpop.permute.xlu1 %5125 }
0x24e3   :  { %8156 = vmatprep.subr.bf16.mxu0 %v4911_v13 }
0x24e4   :  { %8157 = vmatpush3.bf16.msra.mxu0 %v4911_v13 }
0x24e5   :  { %9513 = vmatprep.subr.bf16.mxu0 %v9512_v18 }
0x24e7   :  { %8159 = vmatmul.mubr.msk.bf16.vlgmr.msra.gmra.mrb[68].mxu0 %vm1300_vm2, %v9618_v39 }
0x24e8   :  { %9515 = vmatpush3.bf16.msra.mxu0 %v9512_v18 }
0x24e9   :  { %9517 = vmatprep.subr.bf16.mxu0 %v9516_v19 }
0x24ec   :  { %9519 = vmatpush3.bf16.msra.mxu0 %v9516_v19 }
0x24ed   :  { %9521 = vmatprep.subr.bf16.mxu0 %v9520_v21 }
0x24f0   :  { %9523 = vmatpush3.bf16.msra.mxu0 %v9520_v21 }
0x24f1   :  { %9525 = vmatprep.subr.bf16.mxu0 %v9524_v4 }
0x24f4   :  { %9527 = vmatpush3.bf16.msra.mxu0 %v9524_v4 }
0x24f5   :  { %9529 = vmatprep.subr.bf16.mxu0 %v9528_v6 }
0x24f8   :  { %9531 = vmatpush3.bf16.msra.mxu0 %v9528_v6 }
0x25ba   :  { %v8160_v46 = vpop.f32.mrb[68].mxu0 }
0x25bb   :  { %v4962_v30 = vpop.f32.mrb[69].mxu0  ;;  %v9548_v53 = vadd.f32 %v8160_v46, %v3938_v50  ;;  %v5301_v46 = vld [vmem:[%s10814_s2 + $0x50] sm:$0xff]  ;;  %v5303_v50 = vld [vmem:[%s10814_s2 + $0x60] sm:$0xff] }
0x25bc   :  { %v8161_v51 = vpop.f32.mrb[70].mxu0  ;;  %v9549_v0 = vadd.f32 %v4962_v30, %v3928_v44  ;;  %v9622_v44 = vld [vmem:[%s10813_s1 + $0x8] sm:$0xff]  }
0x25bd   :  { %v9550_v55 = vadd.f32 %v8161_v51, %v3943_v48  ;;  %v4965_v60 = vpop.f32.mrb[71].mxu0  ;;  %v5302_v48 = vld [vmem:[%s10814_s2 + $0x58] sm:$0xff]  ;;  %v5304_v51 = vld [vmem:[%s10814_s2 + $0x68] sm:$0xff] }
0x25be   :  { %v9551_v54 = vadd.f32 %v4965_v60, %v3933_v43  ;;  %v9532_v30 = vpack.c.bf16 %v5302_v48, %v5301_v46  ;;  %v5306_v60 = vld [vmem:[%s10814_s2 + $0x78] sm:$0xff] }
0x25bf   :  { %v4986_v56 = vpack.c.bf16 %v9550_v55, %v9548_v53  ;;  %v9536_v53 = vpack.c.bf16 %v5304_v51, %v5303_v50  ;;  %v5305_v55 = vld [vmem:[%s10814_s2 + $0x70] sm:$0xff]  ;;  %v5491_v51 = vld [vmem:[%s9833_s17] sm:$0x3] }
0x25c0   :  { %v4985_v20 = vpack.c.bf16 %v9551_v54, %v9549_v0  ;;  %9533 = vmatprep.subr.bf16.mxu0 %v9532_v30  ;;  %v9540_v0 = vpack.c.bf16 %v5306_v60, %v5305_v55  ;;  %v5149_v54 = vpop.permute.xlu0 %5148 }
0x25c1   :  { %9535 = vmatpush3.bf16.msra.mxu0 %v9532_v30 }
0x25c2   :  { %8162 = vmatprep.subr.bf16.mxu1 %v4985_v20  ;;  %9537 = vmatprep.subr.bf16.mxu0 %v9536_v53 }
0x25c3   :  { %8163 = vmatpush3.bf16.msra.mxu1 %v4985_v20 }
0x25c4   :  { %8164 = vmatprep.subr.bf16.mxu1 %v4986_v56  ;;  %v5238_v20 = vpop.permute.xlu0 %5237 }
0x25c5   :  { %9539 = vmatpush3.bf16.msra.mxu0 %v9536_v53 }
0x25c6   :  { %9541 = vmatprep.subr.bf16.mxu0 %v9540_v0 }
0x25c7   :  { %8165 = vmatpush3.bf16.msra.mxu1 %v4986_v56  ;;  %v5154_v56 = vpop.permute.xlu1 %5153 }
0x25c9   :  { %9543 = vmatpush3.bf16.msra.mxu0 %v9540_v0 }
0x25ca   :  { %8167 = vmatmul.mubr.msk.bf16.vlgmr.msra.gmra.mrb[100].mxu1 %vm1300_vm2, %v9620_v1 }
0x25cb   :  { %8174 = vmatprep.mubr.msk.bf16.mxu1 %vm1300_vm2, %v9621_v58  ;;  %v5243_v1 = vpop.permute.xlu1 %5242  ;;  %v5159_v58 = vpop.permute.xlu0 %5158 }
0x25cf   :  { %v5266_v59 = vpop.permute.xlu1 %5265  ;;  %v5164_v61 = vpop.permute.xlu0 %5163 }
0x25d3   :  { %v5271_v2 = vpop.permute.xlu1 %5270  ;;  %v5248_v18 = vpop.permute.xlu0 %5247 }
0x25d7   :  { %v5253_v38 = vpop.permute.xlu1 %5252 }
0x269d   :  { %v8168_v23 = vpop.f32.mrb[100].mxu1 }
0x269e   :  { %v5070_v24 = vadd.f32 %v8168_v23, %v5004_v10  ;;  %v5061_v25 = vpop.f32.mrb[101].mxu1 }
0x269f   :  { %v5062_v26 = vadd.f32 %v5061_v25, %v4994_v45  ;;  %v8169_v27 = vpop.f32.mrb[102].mxu1  ;;  %v5276_v45 = vpop.permute.xlu0 %5275  ;;  %v9623_v25 = vld [vmem:[%s10815_s0] sm:$0xff]  }
0x26a0   :  { %v5102_v28 = vmul.f32 %v5093_v16, %v5070_v24  ;;  %v5073_v31 = vadd.f32 %v8169_v27, %v5009_v12  ;;  %v5064_v32 = vpop.f32.mrb[103].mxu1 }
0x26a1   :  { %v5100_v47 = vmul.f32 %v5083_v49, %v5062_v26  ;;  %v5065_v52 = vadd.f32 %v5064_v32, %v4999_v7 }
0x26a2   :  { %v5130_v57 = vadd.f32 %v5121_v42, %v5102_v28  ;;  %v5103_v62 = vmul.f32 %v5098_v17, %v5073_v31 }
0x26a3   :  { %v5128_v3 = vadd.f32 %v5111_v14, %v5100_v47  ;;  %v5101_v34 = vmul.f32 %v5088_v9, %v5065_v52  ;;  %v9624_v47 = vld [vmem:[%s10815_s0 + $0x8] sm:$0xff]   ;;  %v9673_v52 = vmov 0.0  }
0x26a4   :  { %v5131_v35 = vadd.f32 %v5126_v33, %v5103_v62  ;;  %v5134_v8 = vmax.f32 %v5130_v57, 0.0  ;;  %v5405_v57 = vpop.permute.xlu0 %5404 }
0x26a5   :  { %v5129_v36 = vadd.f32 %v5116_v15, %v5101_v34  ;;  %v5132_v13 = vmax.f32 %v5128_v3, 0.0  ;;  %v5281_v15 = vpop.permute.xlu1 %5280 }
0x26a6   :  { %v5135_v37 = vmax.f32 %v5131_v35, 0.0 }
0x26a7   :  { %v5133_v39 = vmax.f32 %v5129_v36, 0.0 }
0x26a8   :  { %v5141_v40 = vpack.c.bf16 %v5135_v37, %v5134_v8  ;;  %v5415_v33 = vpop.permute.xlu0 %5414 }
0x26a9   :  { %v5140_v43 = vpack.c.bf16 %v5133_v39, %v5132_v13  ;;  %v5410_v62 = vpop.permute.xlu1 %5409 }
0x26ab   :  { %8170 = vmatprep.subr.bf16.mxu1 %v5140_v43 }
0x26ac   :  { %8171 = vmatpush3.bf16.msra.mxu1 %v5140_v43  ;;  %v5498_v53 = vpop.permute.xlu0 %5497 }
0x26ad   :  { %8172 = vmatprep.subr.bf16.mxu1 %v5141_v40  ;;  %v5420_v36 = vpop.permute.xlu1 %5419 }
0x26b0   :  { %8173 = vmatpush3.bf16.msra.mxu1 %v5141_v40 }
0x26b3   :  { %8175 = vmatmul.mubr.msk.bf16.vlgmr.msra.gmra.mrb[104].mxu1 %vm1300_vm2, %v9622_v44 }
0x26b4   :  { %8220 = vmatprep.mubr.msk.bf16.mxu1 %vm1300_vm2, %v9623_v25 }
0x2786   :  { %v8176_v11 = vpop.f32.mrb[104].mxu1 }
0x2787   :  { %v5225_v19 = vadd.f32 %v8176_v11, %v5159_v58  ;;  %v5216_v29 = vpop.f32.mrb[105].mxu1 }
0x2788   :  { %v5217_v63 = vadd.f32 %v5216_v29, %v5149_v54  ;;  %v8177_v21 = vpop.f32.mrb[106].mxu1 }
0x2789   :  { %v5257_v22 = vmul.f32 %v5248_v18, %v5225_v19  ;;  %v5228_v4 = vadd.f32 %v8177_v21, %v5164_v61  ;;  %v5219_v41 = vpop.f32.mrb[107].mxu1 }
0x278a   :  { %v5255_v5 = vmul.f32 %v5238_v20, %v5217_v63  ;;  %v5220_v6 = vadd.f32 %v5219_v41, %v5154_v56 }
0x278b   :  { %v5258_v7 = vmul.f32 %v5253_v38, %v5228_v4  ;;  %v5285_v10 = vadd.f32 %v5276_v45, %v5257_v22 }
0x278c   :  { %v5256_v49 = vmul.f32 %v5243_v1, %v5220_v6  ;;  %v5283_v9 = vadd.f32 %v5266_v59, %v5255_v5 }
0x278d   :  { %v5286_v17 = vadd.f32 %v5281_v15, %v5258_v7  ;;  %v5289_v23 = vmax.f32 %v5285_v10, 0.0 }
0x278e   :  { %v5284_v12 = vadd.f32 %v5271_v2, %v5256_v49  ;;  %v5287_v14 = vmax.f32 %v5283_v9, 0.0 }
0x278f   :  { %v5290_v24 = vmax.f32 %v5286_v17, 0.0 }
0x2790   :  { %v5288_v16 = vmax.f32 %v5284_v12, 0.0  ;;  %8210 = vmatprep.mubr.f32.mxu0 %v5287_v14 }
0x2792   :  { %8211 = vmatmul.mubr.f32.vlgmr.msra.gmra.mrb[92].mxu0 %v5288_v16 }
0x2793   :  { %8213 = vmatprep.mubr.f32.mxu0 %v5289_v23 }
0x2796   :  { %8214 = vmatmul.mubr.f32.gmra.mrb[94].mxu0 %v5290_v24 }
0x2865   :  { %v8212_v26 = vpop.f32.mrb[92].mxu0 }
0x2866   :  { %v5373_v27 = vpop.f32.mrb[93].mxu0 }
0x2867   :  { %v5396_v28 = vpack.c.bf16 %v8212_v26, %v5373_v27 }
0x2869   :  { %v8215_v31 = vpop.f32.mrb[94].mxu0  ;;  %8216 = vmatprep.subr.bf16.mxu1 %v5396_v28 }
0x286a   :  { %v5383_v32 = vpop.f32.mrb[95].mxu0  ;;  %8217 = vmatpush3.bf16.msra.mxu1 %v5396_v28 }
0x286b   :  { %v5397_v42 = vpack.c.bf16 %v8215_v31, %v5383_v32 }
0x286d   :  { %8218 = vmatprep.subr.bf16.mxu1 %v5397_v42 }
0x286e   :  { %8219 = vmatpush3.bf16.msra.mxu1 %v5397_v42 }
0x286f   :  { %8224 = vmatprep.subr.bf16.mxu1 %v9673_v52 }
0x2871   :  { %8221 = vmatmul.mubr.msk.bf16.vlgmr.msra.gmra.mrb[108].mxu1 %vm1300_vm2, %v9624_v47 }
0x2872   :  { %8228 = vmatprep.mubr.msk.bf16.mxu1 %vm9674_vm3, %v9673_v52 }
0x2944   :  { %v8222_v3 = vpop.f32.mrb[108].mxu1 }
0x2945   :  { %v5481_v34 = vadd.f32 %v8222_v3, %v5415_v33  ;;  %v5472_v35 = vpop.f32.mrb[109].mxu1 }
0x2946   :  { %v5473_v8 = vadd.f32 %v5472_v35, %v5405_v57  ;;  %v8223_v37 = vpop.f32.mrb[110].mxu1 }
0x2947   :  { %v5484_v13 = vadd.f32 %v8223_v37, %v5420_v36  ;;  %v5475_v39 = vpop.f32.mrb[111].mxu1  ;;  %v5489_v43 = vmax.f32 %v5481_v34, 0.0 }
0x2948   :  { %v5476_v40 = vadd.f32 %v5475_v39, %v5410_v62  ;;  %v5487_v46 = vmax.f32 %v5473_v8, 0.0 }
0x2949   :  { %v5490_v44 = vmax.f32 %v5484_v13, 0.0 }
0x294a   :  { %v5488_v48 = vmax.f32 %v5476_v40, 0.0 }
0x294b   :  { %v5493_v30 = vpack.c.bf16 %v5490_v44, %v5489_v43 }
0x294c   :  { %v5492_v50 = vpack.c.bf16 %v5488_v48, %v5487_v46 }
0x294e   :  { %8225 = vmatpush3.bf16.msra.mxu1 %v5492_v50 }
0x294f   :  { %8226 = vmatprep.subr.bf16.mxu1 %v9673_v52 }
0x2952   :  { %8227 = vmatpush3.bf16.msra.mxu1 %v5493_v30 }
0x2955   :  { %8229 = vmatmul.mubr.msk.bf16.vlgmr.msra.gmra.mrb[112].mxu1 %vm1300_vm2, %v5491_v51 }
0x2a28   :  { %v5537_v55 = vpop.f32.mrb[112].mxu1 }
0x2a29   :  { %v5538_v60 = vadd.f32 %v5537_v55, %v5498_v53  ;;  %v8230_v0 = vpop.f32.mrb[113].mxu1 }
0x2a2a   :  { %v5540_v54 = vpop.f32.mrb[114].mxu1 }
0x2a2b   :  { %5544 = vst.msk [vmem:[%s9843_s27] sm:$0xf] %vm5543_vm4, %v5538_v60  ;;  %v8231_v56 = vpop.f32.mrb[115].mxu1 }
0x2a2c   :  { %5549 = vsyncpa [#allocation3], 1 }

</bundles_post_ra>
